<compile_context>
chip_gen: v5e
topology: v5e:2x2
jax: 0.10.0
libtpu: 0.0.40
codegen_flags: <defaults>
</compile_context>

<pallas_src>
import jax
import jax.numpy as jnp
from jax.experimental import pallas as pl
from jax.experimental.pallas import tpu as pltpu


def gnn_kernel(x_ref, adj_ref, w1_ref, b1_ref, w2_ref, b2_ref, w3_ref, b3_ref,
               out_ref):
    # Block shapes: x_ref (F, N, BT), adj_ref (Nj, Ni, BT), out_ref (O, BT).
    F, N, _ = x_ref.shape
    H = w1_ref.shape[1]
    O = w3_ref.shape[1]

    # Lane-dense slabs: each is (N, BT) == one node per sublane, one graph per lane.
    x_f = [x_ref[f] for f in range(F)]
    # adj_j[j][i, b] == adj[b, i, j]  (node-transposed in the wrapper).
    adj_j = [adj_ref[j] for j in range(N)]

    def linear_tanh(feats, w_ref, b_ref, n_in, n_out):
        # feats: n_in slabs of (N, BT) -> n_out slabs of (N, BT).
        # Pure VPU broadcast-MACs with scalar weights from SMEM, tanh on the EUP.
        outs = []
        for k in range(n_out):
            acc = feats[0] * w_ref[0, k]
            for f in range(1, n_in):
                acc = acc + feats[f] * w_ref[f, k]
            outs.append(jnp.tanh(acc + b_ref[k]))
        return outs

    def aggregate(feats):
        # out[k][i, :] = sum_j adj[b, i, j] * feats[k][j, :]   (== bmm(adj, feats))
        outs = []
        for k in range(len(feats)):
            acc = adj_j[0] * feats[k][0:1, :]
            for j in range(1, N):
                acc = acc + adj_j[j] * feats[k][j:j + 1, :]
            outs.append(acc)
        return outs

    h1 = linear_tanh(x_f, w1_ref, b1_ref, F, H)   # round 1: Linear(3,10) + Tanh
    x1 = aggregate(h1)                            # bmm(adj, .)
    h2 = linear_tanh(x1, w2_ref, b2_ref, H, H)    # round 2: Linear(10,10) + Tanh
    x2 = aggregate(h2)                            # bmm(adj, .)

    # Readout: sum over nodes (sublane reduction), then Linear(10, 2), lane-parallel.
    s = [jnp.sum(x2[k], axis=0, keepdims=True) for k in range(H)]   # H x (1, BT)
    for o in range(O):
        acc = s[0] * w3_ref[0, o]
        for k in range(1, H):
            acc = acc + s[k] * w3_ref[k, o]
        out_ref[o:o + 1, :] = acc + b3_ref[o]


def _round_up(a, m):
    return ((a + m - 1) // m) * m


def gnn_forward(x, adj, params, *, max_block_b=512):
    """x: (B, N, 3) f32, adj: (B, N, N) f32 -> (B, 2) f32."""
    B, N, F_in = x.shape
    w1, b1, w2, b2, w3, b3 = params
    H = w1.shape[1]
    O = w3.shape[1]

    LANE = 128
    # Batch tile: lane-dense (multiple of 128), capped so double-buffered adj/x blocks
    # plus live intermediates stay well inside v7x's 64 MiB VMEM (and v5e/v6e's 128 MiB).
    vmem_budget = 32 * 1024 * 1024
    per_lane_bytes = 4 * (2 * (N * N + N * F_in)      # double-buffered adj + x blocks
                          + 3 * N * H + 2 * H + O)    # live intermediates / output
    bt_cap = max(LANE, (vmem_budget // per_lane_bytes) // LANE * LANE)
    bt = max(LANE, min(max_block_b, bt_cap, _round_up(B, LANE)))
    Bp = _round_up(B, bt)

    if Bp != B:
        pad = Bp - B
        x = jnp.pad(x, ((0, pad), (0, 0), (0, 0)))
        adj = jnp.pad(adj, ((0, pad), (0, 0), (0, 0)))

    # Put the batch on the lane axis.
    x_t = jnp.transpose(x, (2, 1, 0))       # (F, N, Bp)
    adj_t = jnp.transpose(adj, (2, 1, 0))   # (Nj, Ni, Bp); adj_t[j, i, b] = adj[b, i, j]

    smem = lambda: pl.BlockSpec(memory_space=pltpu.MemorySpace.SMEM)

    out_t = pl.pallas_call(
        gnn_kernel,
        out_shape=jax.ShapeDtypeStruct((O, Bp), jnp.float32),
        grid_spec=pltpu.PrefetchScalarGridSpec(
            num_scalar_prefetch=0,
            grid=(Bp // bt,),
            in_specs=[
                pl.BlockSpec((F_in, N, bt), lambda b: (0, 0, b)),   # x   (VMEM, lane-dense)
                pl.BlockSpec((N, N, bt), lambda b: (0, 0, b)),      # adj (VMEM, lane-dense)
                smem(),   # w1 (3, 10)  scalars
                smem(),   # b1 (10,)
                smem(),   # w2 (10, 10)
                smem(),   # b2 (10,)
                smem(),   # w3 (10, 2)
                smem(),   # b3 (2,)
            ],
            out_specs=pl.BlockSpec((O, bt), lambda b: (0, b)),
        ),
        compiler_params=pltpu.CompilerParams(
            dimension_semantics=("parallel",),       # megacore-shardable batch axis (v7x)
            vmem_limit_bytes=48 * 1024 * 1024,       # > 16/32 MiB scoped defaults, < 64 MiB v7x
        ),
    )(x_t, adj_t, w1, b1, w2, b2, w3, b3)

    return jnp.transpose(out_t[:, :B])    # (B, O)


def gnn_reference(x, adj, params):
    w1, b1, w2, b2, w3, b3 = params
    h = jnp.tanh(x @ w1 + b1)
    x = jnp.einsum('bij,bjf->bif', adj, h)
    h = jnp.tanh(x @ w2 + b2)
    x = jnp.einsum('bij,bjf->bif', adj, h)
    x = x.sum(axis=1)
    return x @ w3 + b3


def init_params(key):
    k1, k2, k3, k4, k5, k6 = jax.random.split(key, 6)
    # Weights stored as (in_features, out_features) == PyTorch W^T.
    w1 = jax.random.normal(k1, (3, 10), jnp.float32) * 0.3
    b1 = jax.random.normal(k2, (10,), jnp.float32) * 0.1
    w2 = jax.random.normal(k3, (10, 10), jnp.float32) * 0.3
    b2 = jax.random.normal(k4, (10,), jnp.float32) * 0.1
    w3 = jax.random.normal(k5, (10, 2), jnp.float32) * 0.3
    b3 = jax.random.normal(k6, (2,), jnp.float32) * 0.1
    return (w1, b1, w2, b2, w3, b3)


if __name__ == "__main__":
    key = jax.random.PRNGKey(0)
    kx, ka, kp = jax.random.split(key, 3)

    B, N = 2, 8
    x = jax.random.normal(kx, (B, N, 3), jnp.float32)
    adj = (jax.random.uniform(ka, (B, N, N), jnp.float32) > 0.5).astype(jnp.float32)

    params = init_params(kp)

    out = jax.block_until_ready(gnn_forward(x, adj, params))
    ref = gnn_reference(x, adj, params)

    assert out.shape == (B, 2), out.shape
    assert jnp.allclose(out, ref, atol=1e-4, rtol=1e-4), (out, ref)

    print("KERNEL_OK")
</pallas_src>

<mosaic_0001>
module attributes {stable_mosaic.version = 11 : i64} {
  func.func @gnn_kernel(%arg0: i32, %arg1: memref<3x8x128xf32, #tpu.memory_space<vmem>>, %arg2: memref<8x8x128xf32, #tpu.memory_space<vmem>>, %arg3: memref<3x10xf32, #tpu.memory_space<smem>>, %arg4: memref<10xf32, #tpu.memory_space<smem>>, %arg5: memref<10x10xf32, #tpu.memory_space<smem>>, %arg6: memref<10xf32, #tpu.memory_space<smem>>, %arg7: memref<10x2xf32, #tpu.memory_space<smem>>, %arg8: memref<2xf32, #tpu.memory_space<smem>>, %arg9: memref<2x128xf32, #tpu.memory_space<vmem>>) attributes {dimension_semantics = [#tpu.dimension_semantics<parallel>], iteration_bounds = array<i64: 1>, scalar_prefetch = 0 : i64, scratch_operands = 0 : i64, tpu.core_type = #tpu.core_type<tc>, window_params = [{transform_indices = @transform_0, window_bounds = array<i64: 3, 8, 128>}, {transform_indices = @transform_1, window_bounds = array<i64: 8, 8, 128>}, {transform_indices = @transform_2, window_bounds = array<i64: 3, 10>}, {transform_indices = @transform_3, window_bounds = array<i64: 10>}, {transform_indices = @transform_4, window_bounds = array<i64: 10, 10>}, {transform_indices = @transform_5, window_bounds = array<i64: 10>}, {transform_indices = @transform_6, window_bounds = array<i64: 10, 2>}, {transform_indices = @transform_7, window_bounds = array<i64: 2>}, {transform_indices = @transform_8, window_bounds = array<i64: 2, 128>}]} {
    %c0 = arith.constant 0 : index
    %c0_0 = arith.constant 0 : index
    %c0_1 = arith.constant 0 : index
    %0 = vector.load %arg1[%c0, %c0_0, %c0_1] : memref<3x8x128xf32, #tpu.memory_space<vmem>>, vector<1x8x128xf32>
    %1 = vector.shape_cast %0 : vector<1x8x128xf32> to vector<8x128xf32>
    %c1 = arith.constant 1 : index
    %c0_2 = arith.constant 0 : index
    %c0_3 = arith.constant 0 : index
    %2 = vector.load %arg1[%c1, %c0_2, %c0_3] : memref<3x8x128xf32, #tpu.memory_space<vmem>>, vector<1x8x128xf32>
    %3 = vector.shape_cast %2 : vector<1x8x128xf32> to vector<8x128xf32>
    %c2 = arith.constant 2 : index
    %c0_4 = arith.constant 0 : index
    %c0_5 = arith.constant 0 : index
    %4 = vector.load %arg1[%c2, %c0_4, %c0_5] : memref<3x8x128xf32, #tpu.memory_space<vmem>>, vector<1x8x128xf32>
    %5 = vector.shape_cast %4 : vector<1x8x128xf32> to vector<8x128xf32>
    %c0_6 = arith.constant 0 : index
    %c0_7 = arith.constant 0 : index
    %c0_8 = arith.constant 0 : index
    %6 = vector.load %arg2[%c0_6, %c0_7, %c0_8] : memref<8x8x128xf32, #tpu.memory_space<vmem>>, vector<1x8x128xf32>
    %7 = vector.shape_cast %6 : vector<1x8x128xf32> to vector<8x128xf32>
    %c1_9 = arith.constant 1 : index
    %c0_10 = arith.constant 0 : index
    %c0_11 = arith.constant 0 : index
    %8 = vector.load %arg2[%c1_9, %c0_10, %c0_11] : memref<8x8x128xf32, #tpu.memory_space<vmem>>, vector<1x8x128xf32>
    %9 = vector.shape_cast %8 : vector<1x8x128xf32> to vector<8x128xf32>
    %c2_12 = arith.constant 2 : index
    %c0_13 = arith.constant 0 : index
    %c0_14 = arith.constant 0 : index
    %10 = vector.load %arg2[%c2_12, %c0_13, %c0_14] : memref<8x8x128xf32, #tpu.memory_space<vmem>>, vector<1x8x128xf32>
    %11 = vector.shape_cast %10 : vector<1x8x128xf32> to vector<8x128xf32>
    %c3 = arith.constant 3 : index
    %c0_15 = arith.constant 0 : index
    %c0_16 = arith.constant 0 : index
    %12 = vector.load %arg2[%c3, %c0_15, %c0_16] : memref<8x8x128xf32, #tpu.memory_space<vmem>>, vector<1x8x128xf32>
    %13 = vector.shape_cast %12 : vector<1x8x128xf32> to vector<8x128xf32>
    %c4 = arith.constant 4 : index
    %c0_17 = arith.constant 0 : index
    %c0_18 = arith.constant 0 : index
    %14 = vector.load %arg2[%c4, %c0_17, %c0_18] : memref<8x8x128xf32, #tpu.memory_space<vmem>>, vector<1x8x128xf32>
    %15 = vector.shape_cast %14 : vector<1x8x128xf32> to vector<8x128xf32>
    %c5 = arith.constant 5 : index
    %c0_19 = arith.constant 0 : index
    %c0_20 = arith.constant 0 : index
    %16 = vector.load %arg2[%c5, %c0_19, %c0_20] : memref<8x8x128xf32, #tpu.memory_space<vmem>>, vector<1x8x128xf32>
    %17 = vector.shape_cast %16 : vector<1x8x128xf32> to vector<8x128xf32>
    %c6 = arith.constant 6 : index
    %c0_21 = arith.constant 0 : index
    %c0_22 = arith.constant 0 : index
    %18 = vector.load %arg2[%c6, %c0_21, %c0_22] : memref<8x8x128xf32, #tpu.memory_space<vmem>>, vector<1x8x128xf32>
    %19 = vector.shape_cast %18 : vector<1x8x128xf32> to vector<8x128xf32>
    %c7 = arith.constant 7 : index
    %c0_23 = arith.constant 0 : index
    %c0_24 = arith.constant 0 : index
    %20 = vector.load %arg2[%c7, %c0_23, %c0_24] : memref<8x8x128xf32, #tpu.memory_space<vmem>>, vector<1x8x128xf32>
    %21 = vector.shape_cast %20 : vector<1x8x128xf32> to vector<8x128xf32>
    %c0_25 = arith.constant 0 : index
    %c0_26 = arith.constant 0 : index
    %22 = memref.load %arg3[%c0_25, %c0_26] : memref<3x10xf32, #tpu.memory_space<smem>>
    %23 = vector.broadcast %22 : f32 to vector<8x128xf32>
    %24 = arith.mulf %1, %23 : vector<8x128xf32>
    %c1_27 = arith.constant 1 : index
    %c0_28 = arith.constant 0 : index
    %25 = memref.load %arg3[%c1_27, %c0_28] : memref<3x10xf32, #tpu.memory_space<smem>>
    %26 = vector.broadcast %25 : f32 to vector<8x128xf32>
    %27 = arith.mulf %3, %26 : vector<8x128xf32>
    %28 = arith.addf %24, %27 : vector<8x128xf32>
    %c2_29 = arith.constant 2 : index
    %c0_30 = arith.constant 0 : index
    %29 = memref.load %arg3[%c2_29, %c0_30] : memref<3x10xf32, #tpu.memory_space<smem>>
    %30 = vector.broadcast %29 : f32 to vector<8x128xf32>
    %31 = arith.mulf %5, %30 : vector<8x128xf32>
    %32 = arith.addf %28, %31 : vector<8x128xf32>
    %c0_31 = arith.constant 0 : index
    %33 = memref.load %arg4[%c0_31] : memref<10xf32, #tpu.memory_space<smem>>
    %34 = vector.broadcast %33 : f32 to vector<8x128xf32>
    %35 = arith.addf %32, %34 : vector<8x128xf32>
    %36 = math.tanh %35 : vector<8x128xf32>
    %c0_32 = arith.constant 0 : index
    %c1_33 = arith.constant 1 : index
    %37 = memref.load %arg3[%c0_32, %c1_33] : memref<3x10xf32, #tpu.memory_space<smem>>
    %38 = vector.broadcast %37 : f32 to vector<8x128xf32>
    %39 = arith.mulf %1, %38 : vector<8x128xf32>
    %c1_34 = arith.constant 1 : index
    %c1_35 = arith.constant 1 : index
    %40 = memref.load %arg3[%c1_34, %c1_35] : memref<3x10xf32, #tpu.memory_space<smem>>
    %41 = vector.broadcast %40 : f32 to vector<8x128xf32>
    %42 = arith.mulf %3, %41 : vector<8x128xf32>
    %43 = arith.addf %39, %42 : vector<8x128xf32>
    %c2_36 = arith.constant 2 : index
    %c1_37 = arith.constant 1 : index
    %44 = memref.load %arg3[%c2_36, %c1_37] : memref<3x10xf32, #tpu.memory_space<smem>>
    %45 = vector.broadcast %44 : f32 to vector<8x128xf32>
    %46 = arith.mulf %5, %45 : vector<8x128xf32>
    %47 = arith.addf %43, %46 : vector<8x128xf32>
    %c1_38 = arith.constant 1 : index
    %48 = memref.load %arg4[%c1_38] : memref<10xf32, #tpu.memory_space<smem>>
    %49 = vector.broadcast %48 : f32 to vector<8x128xf32>
    %50 = arith.addf %47, %49 : vector<8x128xf32>
    %51 = math.tanh %50 : vector<8x128xf32>
    %c0_39 = arith.constant 0 : index
    %c2_40 = arith.constant 2 : index
    %52 = memref.load %arg3[%c0_39, %c2_40] : memref<3x10xf32, #tpu.memory_space<smem>>
    %53 = vector.broadcast %52 : f32 to vector<8x128xf32>
    %54 = arith.mulf %1, %53 : vector<8x128xf32>
    %c1_41 = arith.constant 1 : index
    %c2_42 = arith.constant 2 : index
    %55 = memref.load %arg3[%c1_41, %c2_42] : memref<3x10xf32, #tpu.memory_space<smem>>
    %56 = vector.broadcast %55 : f32 to vector<8x128xf32>
    %57 = arith.mulf %3, %56 : vector<8x128xf32>
    %58 = arith.addf %54, %57 : vector<8x128xf32>
    %c2_43 = arith.constant 2 : index
    %c2_44 = arith.constant 2 : index
    %59 = memref.load %arg3[%c2_43, %c2_44] : memref<3x10xf32, #tpu.memory_space<smem>>
    %60 = vector.broadcast %59 : f32 to vector<8x128xf32>
    %61 = arith.mulf %5, %60 : vector<8x128xf32>
    %62 = arith.addf %58, %61 : vector<8x128xf32>
    %c2_45 = arith.constant 2 : index
    %63 = memref.load %arg4[%c2_45] : memref<10xf32, #tpu.memory_space<smem>>
    %64 = vector.broadcast %63 : f32 to vector<8x128xf32>
    %65 = arith.addf %62, %64 : vector<8x128xf32>
    %66 = math.tanh %65 : vector<8x128xf32>
    %c0_46 = arith.constant 0 : index
    %c3_47 = arith.constant 3 : index
    %67 = memref.load %arg3[%c0_46, %c3_47] : memref<3x10xf32, #tpu.memory_space<smem>>
    %68 = vector.broadcast %67 : f32 to vector<8x128xf32>
    %69 = arith.mulf %1, %68 : vector<8x128xf32>
    %c1_48 = arith.constant 1 : index
    %c3_49 = arith.constant 3 : index
    %70 = memref.load %arg3[%c1_48, %c3_49] : memref<3x10xf32, #tpu.memory_space<smem>>
    %71 = vector.broadcast %70 : f32 to vector<8x128xf32>
    %72 = arith.mulf %3, %71 : vector<8x128xf32>
    %73 = arith.addf %69, %72 : vector<8x128xf32>
    %c2_50 = arith.constant 2 : index
    %c3_51 = arith.constant 3 : index
    %74 = memref.load %arg3[%c2_50, %c3_51] : memref<3x10xf32, #tpu.memory_space<smem>>
    %75 = vector.broadcast %74 : f32 to vector<8x128xf32>
    %76 = arith.mulf %5, %75 : vector<8x128xf32>
    %77 = arith.addf %73, %76 : vector<8x128xf32>
    %c3_52 = arith.constant 3 : index
    %78 = memref.load %arg4[%c3_52] : memref<10xf32, #tpu.memory_space<smem>>
    %79 = vector.broadcast %78 : f32 to vector<8x128xf32>
    %80 = arith.addf %77, %79 : vector<8x128xf32>
    %81 = math.tanh %80 : vector<8x128xf32>
    %c0_53 = arith.constant 0 : index
    %c4_54 = arith.constant 4 : index
    %82 = memref.load %arg3[%c0_53, %c4_54] : memref<3x10xf32, #tpu.memory_space<smem>>
    %83 = vector.broadcast %82 : f32 to vector<8x128xf32>
    %84 = arith.mulf %1, %83 : vector<8x128xf32>
    %c1_55 = arith.constant 1 : index
    %c4_56 = arith.constant 4 : index
    %85 = memref.load %arg3[%c1_55, %c4_56] : memref<3x10xf32, #tpu.memory_space<smem>>
    %86 = vector.broadcast %85 : f32 to vector<8x128xf32>
    %87 = arith.mulf %3, %86 : vector<8x128xf32>
    %88 = arith.addf %84, %87 : vector<8x128xf32>
    %c2_57 = arith.constant 2 : index
    %c4_58 = arith.constant 4 : index
    %89 = memref.load %arg3[%c2_57, %c4_58] : memref<3x10xf32, #tpu.memory_space<smem>>
    %90 = vector.broadcast %89 : f32 to vector<8x128xf32>
    %91 = arith.mulf %5, %90 : vector<8x128xf32>
    %92 = arith.addf %88, %91 : vector<8x128xf32>
    %c4_59 = arith.constant 4 : index
    %93 = memref.load %arg4[%c4_59] : memref<10xf32, #tpu.memory_space<smem>>
    %94 = vector.broadcast %93 : f32 to vector<8x128xf32>
    %95 = arith.addf %92, %94 : vector<8x128xf32>
    %96 = math.tanh %95 : vector<8x128xf32>
    %c0_60 = arith.constant 0 : index
    %c5_61 = arith.constant 5 : index
    %97 = memref.load %arg3[%c0_60, %c5_61] : memref<3x10xf32, #tpu.memory_space<smem>>
    %98 = vector.broadcast %97 : f32 to vector<8x128xf32>
    %99 = arith.mulf %1, %98 : vector<8x128xf32>
    %c1_62 = arith.constant 1 : index
    %c5_63 = arith.constant 5 : index
    %100 = memref.load %arg3[%c1_62, %c5_63] : memref<3x10xf32, #tpu.memory_space<smem>>
    %101 = vector.broadcast %100 : f32 to vector<8x128xf32>
    %102 = arith.mulf %3, %101 : vector<8x128xf32>
    %103 = arith.addf %99, %102 : vector<8x128xf32>
    %c2_64 = arith.constant 2 : index
    %c5_65 = arith.constant 5 : index
    %104 = memref.load %arg3[%c2_64, %c5_65] : memref<3x10xf32, #tpu.memory_space<smem>>
    %105 = vector.broadcast %104 : f32 to vector<8x128xf32>
    %106 = arith.mulf %5, %105 : vector<8x128xf32>
    %107 = arith.addf %103, %106 : vector<8x128xf32>
    %c5_66 = arith.constant 5 : index
    %108 = memref.load %arg4[%c5_66] : memref<10xf32, #tpu.memory_space<smem>>
    %109 = vector.broadcast %108 : f32 to vector<8x128xf32>
    %110 = arith.addf %107, %109 : vector<8x128xf32>
    %111 = math.tanh %110 : vector<8x128xf32>
    %c0_67 = arith.constant 0 : index
    %c6_68 = arith.constant 6 : index
    %112 = memref.load %arg3[%c0_67, %c6_68] : memref<3x10xf32, #tpu.memory_space<smem>>
    %113 = vector.broadcast %112 : f32 to vector<8x128xf32>
    %114 = arith.mulf %1, %113 : vector<8x128xf32>
    %c1_69 = arith.constant 1 : index
    %c6_70 = arith.constant 6 : index
    %115 = memref.load %arg3[%c1_69, %c6_70] : memref<3x10xf32, #tpu.memory_space<smem>>
    %116 = vector.broadcast %115 : f32 to vector<8x128xf32>
    %117 = arith.mulf %3, %116 : vector<8x128xf32>
    %118 = arith.addf %114, %117 : vector<8x128xf32>
    %c2_71 = arith.constant 2 : index
    %c6_72 = arith.constant 6 : index
    %119 = memref.load %arg3[%c2_71, %c6_72] : memref<3x10xf32, #tpu.memory_space<smem>>
    %120 = vector.broadcast %119 : f32 to vector<8x128xf32>
    %121 = arith.mulf %5, %120 : vector<8x128xf32>
    %122 = arith.addf %118, %121 : vector<8x128xf32>
    %c6_73 = arith.constant 6 : index
    %123 = memref.load %arg4[%c6_73] : memref<10xf32, #tpu.memory_space<smem>>
    %124 = vector.broadcast %123 : f32 to vector<8x128xf32>
    %125 = arith.addf %122, %124 : vector<8x128xf32>
    %126 = math.tanh %125 : vector<8x128xf32>
    %c0_74 = arith.constant 0 : index
    %c7_75 = arith.constant 7 : index
    %127 = memref.load %arg3[%c0_74, %c7_75] : memref<3x10xf32, #tpu.memory_space<smem>>
    %128 = vector.broadcast %127 : f32 to vector<8x128xf32>
    %129 = arith.mulf %1, %128 : vector<8x128xf32>
    %c1_76 = arith.constant 1 : index
    %c7_77 = arith.constant 7 : index
    %130 = memref.load %arg3[%c1_76, %c7_77] : memref<3x10xf32, #tpu.memory_space<smem>>
    %131 = vector.broadcast %130 : f32 to vector<8x128xf32>
    %132 = arith.mulf %3, %131 : vector<8x128xf32>
    %133 = arith.addf %129, %132 : vector<8x128xf32>
    %c2_78 = arith.constant 2 : index
    %c7_79 = arith.constant 7 : index
    %134 = memref.load %arg3[%c2_78, %c7_79] : memref<3x10xf32, #tpu.memory_space<smem>>
    %135 = vector.broadcast %134 : f32 to vector<8x128xf32>
    %136 = arith.mulf %5, %135 : vector<8x128xf32>
    %137 = arith.addf %133, %136 : vector<8x128xf32>
    %c7_80 = arith.constant 7 : index
    %138 = memref.load %arg4[%c7_80] : memref<10xf32, #tpu.memory_space<smem>>
    %139 = vector.broadcast %138 : f32 to vector<8x128xf32>
    %140 = arith.addf %137, %139 : vector<8x128xf32>
    %141 = math.tanh %140 : vector<8x128xf32>
    %c0_81 = arith.constant 0 : index
    %c8 = arith.constant 8 : index
    %142 = memref.load %arg3[%c0_81, %c8] : memref<3x10xf32, #tpu.memory_space<smem>>
    %143 = vector.broadcast %142 : f32 to vector<8x128xf32>
    %144 = arith.mulf %1, %143 : vector<8x128xf32>
    %c1_82 = arith.constant 1 : index
    %c8_83 = arith.constant 8 : index
    %145 = memref.load %arg3[%c1_82, %c8_83] : memref<3x10xf32, #tpu.memory_space<smem>>
    %146 = vector.broadcast %145 : f32 to vector<8x128xf32>
    %147 = arith.mulf %3, %146 : vector<8x128xf32>
    %148 = arith.addf %144, %147 : vector<8x128xf32>
    %c2_84 = arith.constant 2 : index
    %c8_85 = arith.constant 8 : index
    %149 = memref.load %arg3[%c2_84, %c8_85] : memref<3x10xf32, #tpu.memory_space<smem>>
    %150 = vector.broadcast %149 : f32 to vector<8x128xf32>
    %151 = arith.mulf %5, %150 : vector<8x128xf32>
    %152 = arith.addf %148, %151 : vector<8x128xf32>
    %c8_86 = arith.constant 8 : index
    %153 = memref.load %arg4[%c8_86] : memref<10xf32, #tpu.memory_space<smem>>
    %154 = vector.broadcast %153 : f32 to vector<8x128xf32>
    %155 = arith.addf %152, %154 : vector<8x128xf32>
    %156 = math.tanh %155 : vector<8x128xf32>
    %c0_87 = arith.constant 0 : index
    %c9 = arith.constant 9 : index
    %157 = memref.load %arg3[%c0_87, %c9] : memref<3x10xf32, #tpu.memory_space<smem>>
    %158 = vector.broadcast %157 : f32 to vector<8x128xf32>
    %159 = arith.mulf %1, %158 : vector<8x128xf32>
    %c1_88 = arith.constant 1 : index
    %c9_89 = arith.constant 9 : index
    %160 = memref.load %arg3[%c1_88, %c9_89] : memref<3x10xf32, #tpu.memory_space<smem>>
    %161 = vector.broadcast %160 : f32 to vector<8x128xf32>
    %162 = arith.mulf %3, %161 : vector<8x128xf32>
    %163 = arith.addf %159, %162 : vector<8x128xf32>
    %c2_90 = arith.constant 2 : index
    %c9_91 = arith.constant 9 : index
    %164 = memref.load %arg3[%c2_90, %c9_91] : memref<3x10xf32, #tpu.memory_space<smem>>
    %165 = vector.broadcast %164 : f32 to vector<8x128xf32>
    %166 = arith.mulf %5, %165 : vector<8x128xf32>
    %167 = arith.addf %163, %166 : vector<8x128xf32>
    %c9_92 = arith.constant 9 : index
    %168 = memref.load %arg4[%c9_92] : memref<10xf32, #tpu.memory_space<smem>>
    %169 = vector.broadcast %168 : f32 to vector<8x128xf32>
    %170 = arith.addf %167, %169 : vector<8x128xf32>
    %171 = math.tanh %170 : vector<8x128xf32>
    %172 = vector.extract_strided_slice %36 {offsets = [0, 0], sizes = [1, 128], strides = [1, 1]} : vector<8x128xf32> to vector<1x128xf32>
    %173 = vector.broadcast %172 : vector<1x128xf32> to vector<8x128xf32>
    %174 = arith.mulf %7, %173 : vector<8x128xf32>
    %175 = vector.extract_strided_slice %36 {offsets = [1, 0], sizes = [1, 128], strides = [1, 1]} : vector<8x128xf32> to vector<1x128xf32>
    %176 = vector.broadcast %175 : vector<1x128xf32> to vector<8x128xf32>
    %177 = arith.mulf %9, %176 : vector<8x128xf32>
    %178 = arith.addf %174, %177 : vector<8x128xf32>
    %179 = vector.extract_strided_slice %36 {offsets = [2, 0], sizes = [1, 128], strides = [1, 1]} : vector<8x128xf32> to vector<1x128xf32>
    %180 = vector.broadcast %179 : vector<1x128xf32> to vector<8x128xf32>
    %181 = arith.mulf %11, %180 : vector<8x128xf32>
    %182 = arith.addf %178, %181 : vector<8x128xf32>
    %183 = vector.extract_strided_slice %36 {offsets = [3, 0], sizes = [1, 128], strides = [1, 1]} : vector<8x128xf32> to vector<1x128xf32>
    %184 = vector.broadcast %183 : vector<1x128xf32> to vector<8x128xf32>
    %185 = arith.mulf %13, %184 : vector<8x128xf32>
    %186 = arith.addf %182, %185 : vector<8x128xf32>
    %187 = vector.extract_strided_slice %36 {offsets = [4, 0], sizes = [1, 128], strides = [1, 1]} : vector<8x128xf32> to vector<1x128xf32>
    %188 = vector.broadcast %187 : vector<1x128xf32> to vector<8x128xf32>
    %189 = arith.mulf %15, %188 : vector<8x128xf32>
    %190 = arith.addf %186, %189 : vector<8x128xf32>
    %191 = vector.extract_strided_slice %36 {offsets = [5, 0], sizes = [1, 128], strides = [1, 1]} : vector<8x128xf32> to vector<1x128xf32>
    %192 = vector.broadcast %191 : vector<1x128xf32> to vector<8x128xf32>
    %193 = arith.mulf %17, %192 : vector<8x128xf32>
    %194 = arith.addf %190, %193 : vector<8x128xf32>
    %195 = vector.extract_strided_slice %36 {offsets = [6, 0], sizes = [1, 128], strides = [1, 1]} : vector<8x128xf32> to vector<1x128xf32>
    %196 = vector.broadcast %195 : vector<1x128xf32> to vector<8x128xf32>
    %197 = arith.mulf %19, %196 : vector<8x128xf32>
    %198 = arith.addf %194, %197 : vector<8x128xf32>
    %199 = vector.extract_strided_slice %36 {offsets = [7, 0], sizes = [1, 128], strides = [1, 1]} : vector<8x128xf32> to vector<1x128xf32>
    %200 = vector.broadcast %199 : vector<1x128xf32> to vector<8x128xf32>
    %201 = arith.mulf %21, %200 : vector<8x128xf32>
    %202 = arith.addf %198, %201 : vector<8x128xf32>
    %203 = vector.extract_strided_slice %51 {offsets = [0, 0], sizes = [1, 128], strides = [1, 1]} : vector<8x128xf32> to vector<1x128xf32>
    %204 = vector.broadcast %203 : vector<1x128xf32> to vector<8x128xf32>
    %205 = arith.mulf %7, %204 : vector<8x128xf32>
    %206 = vector.extract_strided_slice %51 {offsets = [1, 0], sizes = [1, 128], strides = [1, 1]} : vector<8x128xf32> to vector<1x128xf32>
    %207 = vector.broadcast %206 : vector<1x128xf32> to vector<8x128xf32>
    %208 = arith.mulf %9, %207 : vector<8x128xf32>
    %209 = arith.addf %205, %208 : vector<8x128xf32>
    %210 = vector.extract_strided_slice %51 {offsets = [2, 0], sizes = [1, 128], strides = [1, 1]} : vector<8x128xf32> to vector<1x128xf32>
    %211 = vector.broadcast %210 : vector<1x128xf32> to vector<8x128xf32>
    %212 = arith.mulf %11, %211 : vector<8x128xf32>
    %213 = arith.addf %209, %212 : vector<8x128xf32>
    %214 = vector.extract_strided_slice %51 {offsets = [3, 0], sizes = [1, 128], strides = [1, 1]} : vector<8x128xf32> to vector<1x128xf32>
    %215 = vector.broadcast %214 : vector<1x128xf32> to vector<8x128xf32>
    %216 = arith.mulf %13, %215 : vector<8x128xf32>
    %217 = arith.addf %213, %216 : vector<8x128xf32>
    %218 = vector.extract_strided_slice %51 {offsets = [4, 0], sizes = [1, 128], strides = [1, 1]} : vector<8x128xf32> to vector<1x128xf32>
    %219 = vector.broadcast %218 : vector<1x128xf32> to vector<8x128xf32>
    %220 = arith.mulf %15, %219 : vector<8x128xf32>
    %221 = arith.addf %217, %220 : vector<8x128xf32>
    %222 = vector.extract_strided_slice %51 {offsets = [5, 0], sizes = [1, 128], strides = [1, 1]} : vector<8x128xf32> to vector<1x128xf32>
    %223 = vector.broadcast %222 : vector<1x128xf32> to vector<8x128xf32>
    %224 = arith.mulf %17, %223 : vector<8x128xf32>
    %225 = arith.addf %221, %224 : vector<8x128xf32>
    %226 = vector.extract_strided_slice %51 {offsets = [6, 0], sizes = [1, 128], strides = [1, 1]} : vector<8x128xf32> to vector<1x128xf32>
    %227 = vector.broadcast %226 : vector<1x128xf32> to vector<8x128xf32>
    %228 = arith.mulf %19, %227 : vector<8x128xf32>
    %229 = arith.addf %225, %228 : vector<8x128xf32>
    %230 = vector.extract_strided_slice %51 {offsets = [7, 0], sizes = [1, 128], strides = [1, 1]} : vector<8x128xf32> to vector<1x128xf32>
    %231 = vector.broadcast %230 : vector<1x128xf32> to vector<8x128xf32>
    %232 = arith.mulf %21, %231 : vector<8x128xf32>
    %233 = arith.addf %229, %232 : vector<8x128xf32>
    %234 = vector.extract_strided_slice %66 {offsets = [0, 0], sizes = [1, 128], strides = [1, 1]} : vector<8x128xf32> to vector<1x128xf32>
    %235 = vector.broadcast %234 : vector<1x128xf32> to vector<8x128xf32>
    %236 = arith.mulf %7, %235 : vector<8x128xf32>
    %237 = vector.extract_strided_slice %66 {offsets = [1, 0], sizes = [1, 128], strides = [1, 1]} : vector<8x128xf32> to vector<1x128xf32>
    %238 = vector.broadcast %237 : vector<1x128xf32> to vector<8x128xf32>
    %239 = arith.mulf %9, %238 : vector<8x128xf32>
    %240 = arith.addf %236, %239 : vector<8x128xf32>
    %241 = vector.extract_strided_slice %66 {offsets = [2, 0], sizes = [1, 128], strides = [1, 1]} : vector<8x128xf32> to vector<1x128xf32>
    %242 = vector.broadcast %241 : vector<1x128xf32> to vector<8x128xf32>
    %243 = arith.mulf %11, %242 : vector<8x128xf32>
    %244 = arith.addf %240, %243 : vector<8x128xf32>
    %245 = vector.extract_strided_slice %66 {offsets = [3, 0], sizes = [1, 128], strides = [1, 1]} : vector<8x128xf32> to vector<1x128xf32>
    %246 = vector.broadcast %245 : vector<1x128xf32> to vector<8x128xf32>
    %247 = arith.mulf %13, %246 : vector<8x128xf32>
    %248 = arith.addf %244, %247 : vector<8x128xf32>
    %249 = vector.extract_strided_slice %66 {offsets = [4, 0], sizes = [1, 128], strides = [1, 1]} : vector<8x128xf32> to vector<1x128xf32>
    %250 = vector.broadcast %249 : vector<1x128xf32> to vector<8x128xf32>
    %251 = arith.mulf %15, %250 : vector<8x128xf32>
    %252 = arith.addf %248, %251 : vector<8x128xf32>
    %253 = vector.extract_strided_slice %66 {offsets = [5, 0], sizes = [1, 128], strides = [1, 1]} : vector<8x128xf32> to vector<1x128xf32>
    %254 = vector.broadcast %253 : vector<1x128xf32> to vector<8x128xf32>
    %255 = arith.mulf %17, %254 : vector<8x128xf32>
    %256 = arith.addf %252, %255 : vector<8x128xf32>
    %257 = vector.extract_strided_slice %66 {offsets = [6, 0], sizes = [1, 128], strides = [1, 1]} : vector<8x128xf32> to vector<1x128xf32>
    %258 = vector.broadcast %257 : vector<1x128xf32> to vector<8x128xf32>
    %259 = arith.mulf %19, %258 : vector<8x128xf32>
    %260 = arith.addf %256, %259 : vector<8x128xf32>
    %261 = vector.extract_strided_slice %66 {offsets = [7, 0], sizes = [1, 128], strides = [1, 1]} : vector<8x128xf32> to vector<1x128xf32>
    %262 = vector.broadcast %261 : vector<1x128xf32> to vector<8x128xf32>
    %263 = arith.mulf %21, %262 : vector<8x128xf32>
    %264 = arith.addf %260, %263 : vector<8x128xf32>
    %265 = vector.extract_strided_slice %81 {offsets = [0, 0], sizes = [1, 128], strides = [1, 1]} : vector<8x128xf32> to vector<1x128xf32>
    %266 = vector.broadcast %265 : vector<1x128xf32> to vector<8x128xf32>
    %267 = arith.mulf %7, %266 : vector<8x128xf32>
    %268 = vector.extract_strided_slice %81 {offsets = [1, 0], sizes = [1, 128], strides = [1, 1]} : vector<8x128xf32> to vector<1x128xf32>
    %269 = vector.broadcast %268 : vector<1x128xf32> to vector<8x128xf32>
    %270 = arith.mulf %9, %269 : vector<8x128xf32>
    %271 = arith.addf %267, %270 : vector<8x128xf32>
    %272 = vector.extract_strided_slice %81 {offsets = [2, 0], sizes = [1, 128], strides = [1, 1]} : vector<8x128xf32> to vector<1x128xf32>
    %273 = vector.broadcast %272 : vector<1x128xf32> to vector<8x128xf32>
    %274 = arith.mulf %11, %273 : vector<8x128xf32>
    %275 = arith.addf %271, %274 : vector<8x128xf32>
    %276 = vector.extract_strided_slice %81 {offsets = [3, 0], sizes = [1, 128], strides = [1, 1]} : vector<8x128xf32> to vector<1x128xf32>
    %277 = vector.broadcast %276 : vector<1x128xf32> to vector<8x128xf32>
    %278 = arith.mulf %13, %277 : vector<8x128xf32>
    %279 = arith.addf %275, %278 : vector<8x128xf32>
    %280 = vector.extract_strided_slice %81 {offsets = [4, 0], sizes = [1, 128], strides = [1, 1]} : vector<8x128xf32> to vector<1x128xf32>
    %281 = vector.broadcast %280 : vector<1x128xf32> to vector<8x128xf32>
    %282 = arith.mulf %15, %281 : vector<8x128xf32>
    %283 = arith.addf %279, %282 : vector<8x128xf32>
    %284 = vector.extract_strided_slice %81 {offsets = [5, 0], sizes = [1, 128], strides = [1, 1]} : vector<8x128xf32> to vector<1x128xf32>
    %285 = vector.broadcast %284 : vector<1x128xf32> to vector<8x128xf32>
    %286 = arith.mulf %17, %285 : vector<8x128xf32>
    %287 = arith.addf %283, %286 : vector<8x128xf32>
    %288 = vector.extract_strided_slice %81 {offsets = [6, 0], sizes = [1, 128], strides = [1, 1]} : vector<8x128xf32> to vector<1x128xf32>
    %289 = vector.broadcast %288 : vector<1x128xf32> to vector<8x128xf32>
    %290 = arith.mulf %19, %289 : vector<8x128xf32>
    %291 = arith.addf %287, %290 : vector<8x128xf32>
    %292 = vector.extract_strided_slice %81 {offsets = [7, 0], sizes = [1, 128], strides = [1, 1]} : vector<8x128xf32> to vector<1x128xf32>
    %293 = vector.broadcast %292 : vector<1x128xf32> to vector<8x128xf32>
    %294 = arith.mulf %21, %293 : vector<8x128xf32>
    %295 = arith.addf %291, %294 : vector<8x128xf32>
    %296 = vector.extract_strided_slice %96 {offsets = [0, 0], sizes = [1, 128], strides = [1, 1]} : vector<8x128xf32> to vector<1x128xf32>
    %297 = vector.broadcast %296 : vector<1x128xf32> to vector<8x128xf32>
    %298 = arith.mulf %7, %297 : vector<8x128xf32>
    %299 = vector.extract_strided_slice %96 {offsets = [1, 0], sizes = [1, 128], strides = [1, 1]} : vector<8x128xf32> to vector<1x128xf32>
    %300 = vector.broadcast %299 : vector<1x128xf32> to vector<8x128xf32>
    %301 = arith.mulf %9, %300 : vector<8x128xf32>
    %302 = arith.addf %298, %301 : vector<8x128xf32>
    %303 = vector.extract_strided_slice %96 {offsets = [2, 0], sizes = [1, 128], strides = [1, 1]} : vector<8x128xf32> to vector<1x128xf32>
    %304 = vector.broadcast %303 : vector<1x128xf32> to vector<8x128xf32>
    %305 = arith.mulf %11, %304 : vector<8x128xf32>
    %306 = arith.addf %302, %305 : vector<8x128xf32>
    %307 = vector.extract_strided_slice %96 {offsets = [3, 0], sizes = [1, 128], strides = [1, 1]} : vector<8x128xf32> to vector<1x128xf32>
    %308 = vector.broadcast %307 : vector<1x128xf32> to vector<8x128xf32>
    %309 = arith.mulf %13, %308 : vector<8x128xf32>
    %310 = arith.addf %306, %309 : vector<8x128xf32>
    %311 = vector.extract_strided_slice %96 {offsets = [4, 0], sizes = [1, 128], strides = [1, 1]} : vector<8x128xf32> to vector<1x128xf32>
    %312 = vector.broadcast %311 : vector<1x128xf32> to vector<8x128xf32>
    %313 = arith.mulf %15, %312 : vector<8x128xf32>
    %314 = arith.addf %310, %313 : vector<8x128xf32>
    %315 = vector.extract_strided_slice %96 {offsets = [5, 0], sizes = [1, 128], strides = [1, 1]} : vector<8x128xf32> to vector<1x128xf32>
    %316 = vector.broadcast %315 : vector<1x128xf32> to vector<8x128xf32>
    %317 = arith.mulf %17, %316 : vector<8x128xf32>
    %318 = arith.addf %314, %317 : vector<8x128xf32>
    %319 = vector.extract_strided_slice %96 {offsets = [6, 0], sizes = [1, 128], strides = [1, 1]} : vector<8x128xf32> to vector<1x128xf32>
    %320 = vector.broadcast %319 : vector<1x128xf32> to vector<8x128xf32>
    %321 = arith.mulf %19, %320 : vector<8x128xf32>
    %322 = arith.addf %318, %321 : vector<8x128xf32>
    %323 = vector.extract_strided_slice %96 {offsets = [7, 0], sizes = [1, 128], strides = [1, 1]} : vector<8x128xf32> to vector<1x128xf32>
    %324 = vector.broadcast %323 : vector<1x128xf32> to vector<8x128xf32>
    %325 = arith.mulf %21, %324 : vector<8x128xf32>
    %326 = arith.addf %322, %325 : vector<8x128xf32>
    %327 = vector.extract_strided_slice %111 {offsets = [0, 0], sizes = [1, 128], strides = [1, 1]} : vector<8x128xf32> to vector<1x128xf32>
    %328 = vector.broadcast %327 : vector<1x128xf32> to vector<8x128xf32>
    %329 = arith.mulf %7, %328 : vector<8x128xf32>
    %330 = vector.extract_strided_slice %111 {offsets = [1, 0], sizes = [1, 128], strides = [1, 1]} : vector<8x128xf32> to vector<1x128xf32>
    %331 = vector.broadcast %330 : vector<1x128xf32> to vector<8x128xf32>
    %332 = arith.mulf %9, %331 : vector<8x128xf32>
    %333 = arith.addf %329, %332 : vector<8x128xf32>
    %334 = vector.extract_strided_slice %111 {offsets = [2, 0], sizes = [1, 128], strides = [1, 1]} : vector<8x128xf32> to vector<1x128xf32>
    %335 = vector.broadcast %334 : vector<1x128xf32> to vector<8x128xf32>
    %336 = arith.mulf %11, %335 : vector<8x128xf32>
    %337 = arith.addf %333, %336 : vector<8x128xf32>
    %338 = vector.extract_strided_slice %111 {offsets = [3, 0], sizes = [1, 128], strides = [1, 1]} : vector<8x128xf32> to vector<1x128xf32>
    %339 = vector.broadcast %338 : vector<1x128xf32> to vector<8x128xf32>
    %340 = arith.mulf %13, %339 : vector<8x128xf32>
    %341 = arith.addf %337, %340 : vector<8x128xf32>
    %342 = vector.extract_strided_slice %111 {offsets = [4, 0], sizes = [1, 128], strides = [1, 1]} : vector<8x128xf32> to vector<1x128xf32>
    %343 = vector.broadcast %342 : vector<1x128xf32> to vector<8x128xf32>
    %344 = arith.mulf %15, %343 : vector<8x128xf32>
    %345 = arith.addf %341, %344 : vector<8x128xf32>
    %346 = vector.extract_strided_slice %111 {offsets = [5, 0], sizes = [1, 128], strides = [1, 1]} : vector<8x128xf32> to vector<1x128xf32>
    %347 = vector.broadcast %346 : vector<1x128xf32> to vector<8x128xf32>
    %348 = arith.mulf %17, %347 : vector<8x128xf32>
    %349 = arith.addf %345, %348 : vector<8x128xf32>
    %350 = vector.extract_strided_slice %111 {offsets = [6, 0], sizes = [1, 128], strides = [1, 1]} : vector<8x128xf32> to vector<1x128xf32>
    %351 = vector.broadcast %350 : vector<1x128xf32> to vector<8x128xf32>
    %352 = arith.mulf %19, %351 : vector<8x128xf32>
    %353 = arith.addf %349, %352 : vector<8x128xf32>
    %354 = vector.extract_strided_slice %111 {offsets = [7, 0], sizes = [1, 128], strides = [1, 1]} : vector<8x128xf32> to vector<1x128xf32>
    %355 = vector.broadcast %354 : vector<1x128xf32> to vector<8x128xf32>
    %356 = arith.mulf %21, %355 : vector<8x128xf32>
    %357 = arith.addf %353, %356 : vector<8x128xf32>
    %358 = vector.extract_strided_slice %126 {offsets = [0, 0], sizes = [1, 128], strides = [1, 1]} : vector<8x128xf32> to vector<1x128xf32>
    %359 = vector.broadcast %358 : vector<1x128xf32> to vector<8x128xf32>
    %360 = arith.mulf %7, %359 : vector<8x128xf32>
    %361 = vector.extract_strided_slice %126 {offsets = [1, 0], sizes = [1, 128], strides = [1, 1]} : vector<8x128xf32> to vector<1x128xf32>
    %362 = vector.broadcast %361 : vector<1x128xf32> to vector<8x128xf32>
    %363 = arith.mulf %9, %362 : vector<8x128xf32>
    %364 = arith.addf %360, %363 : vector<8x128xf32>
    %365 = vector.extract_strided_slice %126 {offsets = [2, 0], sizes = [1, 128], strides = [1, 1]} : vector<8x128xf32> to vector<1x128xf32>
    %366 = vector.broadcast %365 : vector<1x128xf32> to vector<8x128xf32>
    %367 = arith.mulf %11, %366 : vector<8x128xf32>
    %368 = arith.addf %364, %367 : vector<8x128xf32>
    %369 = vector.extract_strided_slice %126 {offsets = [3, 0], sizes = [1, 128], strides = [1, 1]} : vector<8x128xf32> to vector<1x128xf32>
    %370 = vector.broadcast %369 : vector<1x128xf32> to vector<8x128xf32>
    %371 = arith.mulf %13, %370 : vector<8x128xf32>
    %372 = arith.addf %368, %371 : vector<8x128xf32>
    %373 = vector.extract_strided_slice %126 {offsets = [4, 0], sizes = [1, 128], strides = [1, 1]} : vector<8x128xf32> to vector<1x128xf32>
    %374 = vector.broadcast %373 : vector<1x128xf32> to vector<8x128xf32>
    %375 = arith.mulf %15, %374 : vector<8x128xf32>
    %376 = arith.addf %372, %375 : vector<8x128xf32>
    %377 = vector.extract_strided_slice %126 {offsets = [5, 0], sizes = [1, 128], strides = [1, 1]} : vector<8x128xf32> to vector<1x128xf32>
    %378 = vector.broadcast %377 : vector<1x128xf32> to vector<8x128xf32>
    %379 = arith.mulf %17, %378 : vector<8x128xf32>
    %380 = arith.addf %376, %379 : vector<8x128xf32>
    %381 = vector.extract_strided_slice %126 {offsets = [6, 0], sizes = [1, 128], strides = [1, 1]} : vector<8x128xf32> to vector<1x128xf32>
    %382 = vector.broadcast %381 : vector<1x128xf32> to vector<8x128xf32>
    %383 = arith.mulf %19, %382 : vector<8x128xf32>
    %384 = arith.addf %380, %383 : vector<8x128xf32>
    %385 = vector.extract_strided_slice %126 {offsets = [7, 0], sizes = [1, 128], strides = [1, 1]} : vector<8x128xf32> to vector<1x128xf32>
    %386 = vector.broadcast %385 : vector<1x128xf32> to vector<8x128xf32>
    %387 = arith.mulf %21, %386 : vector<8x128xf32>
    %388 = arith.addf %384, %387 : vector<8x128xf32>
    %389 = vector.extract_strided_slice %141 {offsets = [0, 0], sizes = [1, 128], strides = [1, 1]} : vector<8x128xf32> to vector<1x128xf32>
    %390 = vector.broadcast %389 : vector<1x128xf32> to vector<8x128xf32>
    %391 = arith.mulf %7, %390 : vector<8x128xf32>
    %392 = vector.extract_strided_slice %141 {offsets = [1, 0], sizes = [1, 128], strides = [1, 1]} : vector<8x128xf32> to vector<1x128xf32>
    %393 = vector.broadcast %392 : vector<1x128xf32> to vector<8x128xf32>
    %394 = arith.mulf %9, %393 : vector<8x128xf32>
    %395 = arith.addf %391, %394 : vector<8x128xf32>
    %396 = vector.extract_strided_slice %141 {offsets = [2, 0], sizes = [1, 128], strides = [1, 1]} : vector<8x128xf32> to vector<1x128xf32>
    %397 = vector.broadcast %396 : vector<1x128xf32> to vector<8x128xf32>
    %398 = arith.mulf %11, %397 : vector<8x128xf32>
    %399 = arith.addf %395, %398 : vector<8x128xf32>
    %400 = vector.extract_strided_slice %141 {offsets = [3, 0], sizes = [1, 128], strides = [1, 1]} : vector<8x128xf32> to vector<1x128xf32>
    %401 = vector.broadcast %400 : vector<1x128xf32> to vector<8x128xf32>
    %402 = arith.mulf %13, %401 : vector<8x128xf32>
    %403 = arith.addf %399, %402 : vector<8x128xf32>
    %404 = vector.extract_strided_slice %141 {offsets = [4, 0], sizes = [1, 128], strides = [1, 1]} : vector<8x128xf32> to vector<1x128xf32>
    %405 = vector.broadcast %404 : vector<1x128xf32> to vector<8x128xf32>
    %406 = arith.mulf %15, %405 : vector<8x128xf32>
    %407 = arith.addf %403, %406 : vector<8x128xf32>
    %408 = vector.extract_strided_slice %141 {offsets = [5, 0], sizes = [1, 128], strides = [1, 1]} : vector<8x128xf32> to vector<1x128xf32>
    %409 = vector.broadcast %408 : vector<1x128xf32> to vector<8x128xf32>
    %410 = arith.mulf %17, %409 : vector<8x128xf32>
    %411 = arith.addf %407, %410 : vector<8x128xf32>
    %412 = vector.extract_strided_slice %141 {offsets = [6, 0], sizes = [1, 128], strides = [1, 1]} : vector<8x128xf32> to vector<1x128xf32>
    %413 = vector.broadcast %412 : vector<1x128xf32> to vector<8x128xf32>
    %414 = arith.mulf %19, %413 : vector<8x128xf32>
    %415 = arith.addf %411, %414 : vector<8x128xf32>
    %416 = vector.extract_strided_slice %141 {offsets = [7, 0], sizes = [1, 128], strides = [1, 1]} : vector<8x128xf32> to vector<1x128xf32>
    %417 = vector.broadcast %416 : vector<1x128xf32> to vector<8x128xf32>
    %418 = arith.mulf %21, %417 : vector<8x128xf32>
    %419 = arith.addf %415, %418 : vector<8x128xf32>
    %420 = vector.extract_strided_slice %156 {offsets = [0, 0], sizes = [1, 128], strides = [1, 1]} : vector<8x128xf32> to vector<1x128xf32>
    %421 = vector.broadcast %420 : vector<1x128xf32> to vector<8x128xf32>
    %422 = arith.mulf %7, %421 : vector<8x128xf32>
    %423 = vector.extract_strided_slice %156 {offsets = [1, 0], sizes = [1, 128], strides = [1, 1]} : vector<8x128xf32> to vector<1x128xf32>
    %424 = vector.broadcast %423 : vector<1x128xf32> to vector<8x128xf32>
    %425 = arith.mulf %9, %424 : vector<8x128xf32>
    %426 = arith.addf %422, %425 : vector<8x128xf32>
    %427 = vector.extract_strided_slice %156 {offsets = [2, 0], sizes = [1, 128], strides = [1, 1]} : vector<8x128xf32> to vector<1x128xf32>
    %428 = vector.broadcast %427 : vector<1x128xf32> to vector<8x128xf32>
    %429 = arith.mulf %11, %428 : vector<8x128xf32>
    %430 = arith.addf %426, %429 : vector<8x128xf32>
    %431 = vector.extract_strided_slice %156 {offsets = [3, 0], sizes = [1, 128], strides = [1, 1]} : vector<8x128xf32> to vector<1x128xf32>
    %432 = vector.broadcast %431 : vector<1x128xf32> to vector<8x128xf32>
    %433 = arith.mulf %13, %432 : vector<8x128xf32>
    %434 = arith.addf %430, %433 : vector<8x128xf32>
    %435 = vector.extract_strided_slice %156 {offsets = [4, 0], sizes = [1, 128], strides = [1, 1]} : vector<8x128xf32> to vector<1x128xf32>
    %436 = vector.broadcast %435 : vector<1x128xf32> to vector<8x128xf32>
    %437 = arith.mulf %15, %436 : vector<8x128xf32>
    %438 = arith.addf %434, %437 : vector<8x128xf32>
    %439 = vector.extract_strided_slice %156 {offsets = [5, 0], sizes = [1, 128], strides = [1, 1]} : vector<8x128xf32> to vector<1x128xf32>
    %440 = vector.broadcast %439 : vector<1x128xf32> to vector<8x128xf32>
    %441 = arith.mulf %17, %440 : vector<8x128xf32>
    %442 = arith.addf %438, %441 : vector<8x128xf32>
    %443 = vector.extract_strided_slice %156 {offsets = [6, 0], sizes = [1, 128], strides = [1, 1]} : vector<8x128xf32> to vector<1x128xf32>
    %444 = vector.broadcast %443 : vector<1x128xf32> to vector<8x128xf32>
    %445 = arith.mulf %19, %444 : vector<8x128xf32>
    %446 = arith.addf %442, %445 : vector<8x128xf32>
    %447 = vector.extract_strided_slice %156 {offsets = [7, 0], sizes = [1, 128], strides = [1, 1]} : vector<8x128xf32> to vector<1x128xf32>
    %448 = vector.broadcast %447 : vector<1x128xf32> to vector<8x128xf32>
    %449 = arith.mulf %21, %448 : vector<8x128xf32>
    %450 = arith.addf %446, %449 : vector<8x128xf32>
    %451 = vector.extract_strided_slice %171 {offsets = [0, 0], sizes = [1, 128], strides = [1, 1]} : vector<8x128xf32> to vector<1x128xf32>
    %452 = vector.broadcast %451 : vector<1x128xf32> to vector<8x128xf32>
    %453 = arith.mulf %7, %452 : vector<8x128xf32>
    %454 = vector.extract_strided_slice %171 {offsets = [1, 0], sizes = [1, 128], strides = [1, 1]} : vector<8x128xf32> to vector<1x128xf32>
    %455 = vector.broadcast %454 : vector<1x128xf32> to vector<8x128xf32>
    %456 = arith.mulf %9, %455 : vector<8x128xf32>
    %457 = arith.addf %453, %456 : vector<8x128xf32>
    %458 = vector.extract_strided_slice %171 {offsets = [2, 0], sizes = [1, 128], strides = [1, 1]} : vector<8x128xf32> to vector<1x128xf32>
    %459 = vector.broadcast %458 : vector<1x128xf32> to vector<8x128xf32>
    %460 = arith.mulf %11, %459 : vector<8x128xf32>
    %461 = arith.addf %457, %460 : vector<8x128xf32>
    %462 = vector.extract_strided_slice %171 {offsets = [3, 0], sizes = [1, 128], strides = [1, 1]} : vector<8x128xf32> to vector<1x128xf32>
    %463 = vector.broadcast %462 : vector<1x128xf32> to vector<8x128xf32>
    %464 = arith.mulf %13, %463 : vector<8x128xf32>
    %465 = arith.addf %461, %464 : vector<8x128xf32>
    %466 = vector.extract_strided_slice %171 {offsets = [4, 0], sizes = [1, 128], strides = [1, 1]} : vector<8x128xf32> to vector<1x128xf32>
    %467 = vector.broadcast %466 : vector<1x128xf32> to vector<8x128xf32>
    %468 = arith.mulf %15, %467 : vector<8x128xf32>
    %469 = arith.addf %465, %468 : vector<8x128xf32>
    %470 = vector.extract_strided_slice %171 {offsets = [5, 0], sizes = [1, 128], strides = [1, 1]} : vector<8x128xf32> to vector<1x128xf32>
    %471 = vector.broadcast %470 : vector<1x128xf32> to vector<8x128xf32>
    %472 = arith.mulf %17, %471 : vector<8x128xf32>
    %473 = arith.addf %469, %472 : vector<8x128xf32>
    %474 = vector.extract_strided_slice %171 {offsets = [6, 0], sizes = [1, 128], strides = [1, 1]} : vector<8x128xf32> to vector<1x128xf32>
    %475 = vector.broadcast %474 : vector<1x128xf32> to vector<8x128xf32>
    %476 = arith.mulf %19, %475 : vector<8x128xf32>
    %477 = arith.addf %473, %476 : vector<8x128xf32>
    %478 = vector.extract_strided_slice %171 {offsets = [7, 0], sizes = [1, 128], strides = [1, 1]} : vector<8x128xf32> to vector<1x128xf32>
    %479 = vector.broadcast %478 : vector<1x128xf32> to vector<8x128xf32>
    %480 = arith.mulf %21, %479 : vector<8x128xf32>
    %481 = arith.addf %477, %480 : vector<8x128xf32>
    %c0_93 = arith.constant 0 : index
    %c0_94 = arith.constant 0 : index
    %482 = memref.load %arg5[%c0_93, %c0_94] : memref<10x10xf32, #tpu.memory_space<smem>>
    %483 = vector.broadcast %482 : f32 to vector<8x128xf32>
    %484 = arith.mulf %202, %483 : vector<8x128xf32>
    %c1_95 = arith.constant 1 : index
    %c0_96 = arith.constant 0 : index
    %485 = memref.load %arg5[%c1_95, %c0_96] : memref<10x10xf32, #tpu.memory_space<smem>>
    %486 = vector.broadcast %485 : f32 to vector<8x128xf32>
    %487 = arith.mulf %233, %486 : vector<8x128xf32>
    %488 = arith.addf %484, %487 : vector<8x128xf32>
    %c2_97 = arith.constant 2 : index
    %c0_98 = arith.constant 0 : index
    %489 = memref.load %arg5[%c2_97, %c0_98] : memref<10x10xf32, #tpu.memory_space<smem>>
    %490 = vector.broadcast %489 : f32 to vector<8x128xf32>
    %491 = arith.mulf %264, %490 : vector<8x128xf32>
    %492 = arith.addf %488, %491 : vector<8x128xf32>
    %c3_99 = arith.constant 3 : index
    %c0_100 = arith.constant 0 : index
    %493 = memref.load %arg5[%c3_99, %c0_100] : memref<10x10xf32, #tpu.memory_space<smem>>
    %494 = vector.broadcast %493 : f32 to vector<8x128xf32>
    %495 = arith.mulf %295, %494 : vector<8x128xf32>
    %496 = arith.addf %492, %495 : vector<8x128xf32>
    %c4_101 = arith.constant 4 : index
    %c0_102 = arith.constant 0 : index
    %497 = memref.load %arg5[%c4_101, %c0_102] : memref<10x10xf32, #tpu.memory_space<smem>>
    %498 = vector.broadcast %497 : f32 to vector<8x128xf32>
    %499 = arith.mulf %326, %498 : vector<8x128xf32>
    %500 = arith.addf %496, %499 : vector<8x128xf32>
    %c5_103 = arith.constant 5 : index
    %c0_104 = arith.constant 0 : index
    %501 = memref.load %arg5[%c5_103, %c0_104] : memref<10x10xf32, #tpu.memory_space<smem>>
    %502 = vector.broadcast %501 : f32 to vector<8x128xf32>
    %503 = arith.mulf %357, %502 : vector<8x128xf32>
    %504 = arith.addf %500, %503 : vector<8x128xf32>
    %c6_105 = arith.constant 6 : index
    %c0_106 = arith.constant 0 : index
    %505 = memref.load %arg5[%c6_105, %c0_106] : memref<10x10xf32, #tpu.memory_space<smem>>
    %506 = vector.broadcast %505 : f32 to vector<8x128xf32>
    %507 = arith.mulf %388, %506 : vector<8x128xf32>
    %508 = arith.addf %504, %507 : vector<8x128xf32>
    %c7_107 = arith.constant 7 : index
    %c0_108 = arith.constant 0 : index
    %509 = memref.load %arg5[%c7_107, %c0_108] : memref<10x10xf32, #tpu.memory_space<smem>>
    %510 = vector.broadcast %509 : f32 to vector<8x128xf32>
    %511 = arith.mulf %419, %510 : vector<8x128xf32>
    %512 = arith.addf %508, %511 : vector<8x128xf32>
    %c8_109 = arith.constant 8 : index
    %c0_110 = arith.constant 0 : index
    %513 = memref.load %arg5[%c8_109, %c0_110] : memref<10x10xf32, #tpu.memory_space<smem>>
    %514 = vector.broadcast %513 : f32 to vector<8x128xf32>
    %515 = arith.mulf %450, %514 : vector<8x128xf32>
    %516 = arith.addf %512, %515 : vector<8x128xf32>
    %c9_111 = arith.constant 9 : index
    %c0_112 = arith.constant 0 : index
    %517 = memref.load %arg5[%c9_111, %c0_112] : memref<10x10xf32, #tpu.memory_space<smem>>
    %518 = vector.broadcast %517 : f32 to vector<8x128xf32>
    %519 = arith.mulf %481, %518 : vector<8x128xf32>
    %520 = arith.addf %516, %519 : vector<8x128xf32>
    %c0_113 = arith.constant 0 : index
    %521 = memref.load %arg6[%c0_113] : memref<10xf32, #tpu.memory_space<smem>>
    %522 = vector.broadcast %521 : f32 to vector<8x128xf32>
    %523 = arith.addf %520, %522 : vector<8x128xf32>
    %524 = math.tanh %523 : vector<8x128xf32>
    %c0_114 = arith.constant 0 : index
    %c1_115 = arith.constant 1 : index
    %525 = memref.load %arg5[%c0_114, %c1_115] : memref<10x10xf32, #tpu.memory_space<smem>>
    %526 = vector.broadcast %525 : f32 to vector<8x128xf32>
    %527 = arith.mulf %202, %526 : vector<8x128xf32>
    %c1_116 = arith.constant 1 : index
    %c1_117 = arith.constant 1 : index
    %528 = memref.load %arg5[%c1_116, %c1_117] : memref<10x10xf32, #tpu.memory_space<smem>>
    %529 = vector.broadcast %528 : f32 to vector<8x128xf32>
    %530 = arith.mulf %233, %529 : vector<8x128xf32>
    %531 = arith.addf %527, %530 : vector<8x128xf32>
    %c2_118 = arith.constant 2 : index
    %c1_119 = arith.constant 1 : index
    %532 = memref.load %arg5[%c2_118, %c1_119] : memref<10x10xf32, #tpu.memory_space<smem>>
    %533 = vector.broadcast %532 : f32 to vector<8x128xf32>
    %534 = arith.mulf %264, %533 : vector<8x128xf32>
    %535 = arith.addf %531, %534 : vector<8x128xf32>
    %c3_120 = arith.constant 3 : index
    %c1_121 = arith.constant 1 : index
    %536 = memref.load %arg5[%c3_120, %c1_121] : memref<10x10xf32, #tpu.memory_space<smem>>
    %537 = vector.broadcast %536 : f32 to vector<8x128xf32>
    %538 = arith.mulf %295, %537 : vector<8x128xf32>
    %539 = arith.addf %535, %538 : vector<8x128xf32>
    %c4_122 = arith.constant 4 : index
    %c1_123 = arith.constant 1 : index
    %540 = memref.load %arg5[%c4_122, %c1_123] : memref<10x10xf32, #tpu.memory_space<smem>>
    %541 = vector.broadcast %540 : f32 to vector<8x128xf32>
    %542 = arith.mulf %326, %541 : vector<8x128xf32>
    %543 = arith.addf %539, %542 : vector<8x128xf32>
    %c5_124 = arith.constant 5 : index
    %c1_125 = arith.constant 1 : index
    %544 = memref.load %arg5[%c5_124, %c1_125] : memref<10x10xf32, #tpu.memory_space<smem>>
    %545 = vector.broadcast %544 : f32 to vector<8x128xf32>
    %546 = arith.mulf %357, %545 : vector<8x128xf32>
    %547 = arith.addf %543, %546 : vector<8x128xf32>
    %c6_126 = arith.constant 6 : index
    %c1_127 = arith.constant 1 : index
    %548 = memref.load %arg5[%c6_126, %c1_127] : memref<10x10xf32, #tpu.memory_space<smem>>
    %549 = vector.broadcast %548 : f32 to vector<8x128xf32>
    %550 = arith.mulf %388, %549 : vector<8x128xf32>
    %551 = arith.addf %547, %550 : vector<8x128xf32>
    %c7_128 = arith.constant 7 : index
    %c1_129 = arith.constant 1 : index
    %552 = memref.load %arg5[%c7_128, %c1_129] : memref<10x10xf32, #tpu.memory_space<smem>>
    %553 = vector.broadcast %552 : f32 to vector<8x128xf32>
    %554 = arith.mulf %419, %553 : vector<8x128xf32>
    %555 = arith.addf %551, %554 : vector<8x128xf32>
    %c8_130 = arith.constant 8 : index
    %c1_131 = arith.constant 1 : index
    %556 = memref.load %arg5[%c8_130, %c1_131] : memref<10x10xf32, #tpu.memory_space<smem>>
    %557 = vector.broadcast %556 : f32 to vector<8x128xf32>
    %558 = arith.mulf %450, %557 : vector<8x128xf32>
    %559 = arith.addf %555, %558 : vector<8x128xf32>
    %c9_132 = arith.constant 9 : index
    %c1_133 = arith.constant 1 : index
    %560 = memref.load %arg5[%c9_132, %c1_133] : memref<10x10xf32, #tpu.memory_space<smem>>
    %561 = vector.broadcast %560 : f32 to vector<8x128xf32>
    %562 = arith.mulf %481, %561 : vector<8x128xf32>
    %563 = arith.addf %559, %562 : vector<8x128xf32>
    %c1_134 = arith.constant 1 : index
    %564 = memref.load %arg6[%c1_134] : memref<10xf32, #tpu.memory_space<smem>>
    %565 = vector.broadcast %564 : f32 to vector<8x128xf32>
    %566 = arith.addf %563, %565 : vector<8x128xf32>
    %567 = math.tanh %566 : vector<8x128xf32>
    %c0_135 = arith.constant 0 : index
    %c2_136 = arith.constant 2 : index
    %568 = memref.load %arg5[%c0_135, %c2_136] : memref<10x10xf32, #tpu.memory_space<smem>>
    %569 = vector.broadcast %568 : f32 to vector<8x128xf32>
    %570 = arith.mulf %202, %569 : vector<8x128xf32>
    %c1_137 = arith.constant 1 : index
    %c2_138 = arith.constant 2 : index
    %571 = memref.load %arg5[%c1_137, %c2_138] : memref<10x10xf32, #tpu.memory_space<smem>>
    %572 = vector.broadcast %571 : f32 to vector<8x128xf32>
    %573 = arith.mulf %233, %572 : vector<8x128xf32>
    %574 = arith.addf %570, %573 : vector<8x128xf32>
    %c2_139 = arith.constant 2 : index
    %c2_140 = arith.constant 2 : index
    %575 = memref.load %arg5[%c2_139, %c2_140] : memref<10x10xf32, #tpu.memory_space<smem>>
    %576 = vector.broadcast %575 : f32 to vector<8x128xf32>
    %577 = arith.mulf %264, %576 : vector<8x128xf32>
    %578 = arith.addf %574, %577 : vector<8x128xf32>
    %c3_141 = arith.constant 3 : index
    %c2_142 = arith.constant 2 : index
    %579 = memref.load %arg5[%c3_141, %c2_142] : memref<10x10xf32, #tpu.memory_space<smem>>
    %580 = vector.broadcast %579 : f32 to vector<8x128xf32>
    %581 = arith.mulf %295, %580 : vector<8x128xf32>
    %582 = arith.addf %578, %581 : vector<8x128xf32>
    %c4_143 = arith.constant 4 : index
    %c2_144 = arith.constant 2 : index
    %583 = memref.load %arg5[%c4_143, %c2_144] : memref<10x10xf32, #tpu.memory_space<smem>>
    %584 = vector.broadcast %583 : f32 to vector<8x128xf32>
    %585 = arith.mulf %326, %584 : vector<8x128xf32>
    %586 = arith.addf %582, %585 : vector<8x128xf32>
    %c5_145 = arith.constant 5 : index
    %c2_146 = arith.constant 2 : index
    %587 = memref.load %arg5[%c5_145, %c2_146] : memref<10x10xf32, #tpu.memory_space<smem>>
    %588 = vector.broadcast %587 : f32 to vector<8x128xf32>
    %589 = arith.mulf %357, %588 : vector<8x128xf32>
    %590 = arith.addf %586, %589 : vector<8x128xf32>
    %c6_147 = arith.constant 6 : index
    %c2_148 = arith.constant 2 : index
    %591 = memref.load %arg5[%c6_147, %c2_148] : memref<10x10xf32, #tpu.memory_space<smem>>
    %592 = vector.broadcast %591 : f32 to vector<8x128xf32>
    %593 = arith.mulf %388, %592 : vector<8x128xf32>
    %594 = arith.addf %590, %593 : vector<8x128xf32>
    %c7_149 = arith.constant 7 : index
    %c2_150 = arith.constant 2 : index
    %595 = memref.load %arg5[%c7_149, %c2_150] : memref<10x10xf32, #tpu.memory_space<smem>>
    %596 = vector.broadcast %595 : f32 to vector<8x128xf32>
    %597 = arith.mulf %419, %596 : vector<8x128xf32>
    %598 = arith.addf %594, %597 : vector<8x128xf32>
    %c8_151 = arith.constant 8 : index
    %c2_152 = arith.constant 2 : index
    %599 = memref.load %arg5[%c8_151, %c2_152] : memref<10x10xf32, #tpu.memory_space<smem>>
    %600 = vector.broadcast %599 : f32 to vector<8x128xf32>
    %601 = arith.mulf %450, %600 : vector<8x128xf32>
    %602 = arith.addf %598, %601 : vector<8x128xf32>
    %c9_153 = arith.constant 9 : index
    %c2_154 = arith.constant 2 : index
    %603 = memref.load %arg5[%c9_153, %c2_154] : memref<10x10xf32, #tpu.memory_space<smem>>
    %604 = vector.broadcast %603 : f32 to vector<8x128xf32>
    %605 = arith.mulf %481, %604 : vector<8x128xf32>
    %606 = arith.addf %602, %605 : vector<8x128xf32>
    %c2_155 = arith.constant 2 : index
    %607 = memref.load %arg6[%c2_155] : memref<10xf32, #tpu.memory_space<smem>>
    %608 = vector.broadcast %607 : f32 to vector<8x128xf32>
    %609 = arith.addf %606, %608 : vector<8x128xf32>
    %610 = math.tanh %609 : vector<8x128xf32>
    %c0_156 = arith.constant 0 : index
    %c3_157 = arith.constant 3 : index
    %611 = memref.load %arg5[%c0_156, %c3_157] : memref<10x10xf32, #tpu.memory_space<smem>>
    %612 = vector.broadcast %611 : f32 to vector<8x128xf32>
    %613 = arith.mulf %202, %612 : vector<8x128xf32>
    %c1_158 = arith.constant 1 : index
    %c3_159 = arith.constant 3 : index
    %614 = memref.load %arg5[%c1_158, %c3_159] : memref<10x10xf32, #tpu.memory_space<smem>>
    %615 = vector.broadcast %614 : f32 to vector<8x128xf32>
    %616 = arith.mulf %233, %615 : vector<8x128xf32>
    %617 = arith.addf %613, %616 : vector<8x128xf32>
    %c2_160 = arith.constant 2 : index
    %c3_161 = arith.constant 3 : index
    %618 = memref.load %arg5[%c2_160, %c3_161] : memref<10x10xf32, #tpu.memory_space<smem>>
    %619 = vector.broadcast %618 : f32 to vector<8x128xf32>
    %620 = arith.mulf %264, %619 : vector<8x128xf32>
    %621 = arith.addf %617, %620 : vector<8x128xf32>
    %c3_162 = arith.constant 3 : index
    %c3_163 = arith.constant 3 : index
    %622 = memref.load %arg5[%c3_162, %c3_163] : memref<10x10xf32, #tpu.memory_space<smem>>
    %623 = vector.broadcast %622 : f32 to vector<8x128xf32>
    %624 = arith.mulf %295, %623 : vector<8x128xf32>
    %625 = arith.addf %621, %624 : vector<8x128xf32>
    %c4_164 = arith.constant 4 : index
    %c3_165 = arith.constant 3 : index
    %626 = memref.load %arg5[%c4_164, %c3_165] : memref<10x10xf32, #tpu.memory_space<smem>>
    %627 = vector.broadcast %626 : f32 to vector<8x128xf32>
    %628 = arith.mulf %326, %627 : vector<8x128xf32>
    %629 = arith.addf %625, %628 : vector<8x128xf32>
    %c5_166 = arith.constant 5 : index
    %c3_167 = arith.constant 3 : index
    %630 = memref.load %arg5[%c5_166, %c3_167] : memref<10x10xf32, #tpu.memory_space<smem>>
    %631 = vector.broadcast %630 : f32 to vector<8x128xf32>
    %632 = arith.mulf %357, %631 : vector<8x128xf32>
    %633 = arith.addf %629, %632 : vector<8x128xf32>
    %c6_168 = arith.constant 6 : index
    %c3_169 = arith.constant 3 : index
    %634 = memref.load %arg5[%c6_168, %c3_169] : memref<10x10xf32, #tpu.memory_space<smem>>
    %635 = vector.broadcast %634 : f32 to vector<8x128xf32>
    %636 = arith.mulf %388, %635 : vector<8x128xf32>
    %637 = arith.addf %633, %636 : vector<8x128xf32>
    %c7_170 = arith.constant 7 : index
    %c3_171 = arith.constant 3 : index
    %638 = memref.load %arg5[%c7_170, %c3_171] : memref<10x10xf32, #tpu.memory_space<smem>>
    %639 = vector.broadcast %638 : f32 to vector<8x128xf32>
    %640 = arith.mulf %419, %639 : vector<8x128xf32>
    %641 = arith.addf %637, %640 : vector<8x128xf32>
    %c8_172 = arith.constant 8 : index
    %c3_173 = arith.constant 3 : index
    %642 = memref.load %arg5[%c8_172, %c3_173] : memref<10x10xf32, #tpu.memory_space<smem>>
    %643 = vector.broadcast %642 : f32 to vector<8x128xf32>
    %644 = arith.mulf %450, %643 : vector<8x128xf32>
    %645 = arith.addf %641, %644 : vector<8x128xf32>
    %c9_174 = arith.constant 9 : index
    %c3_175 = arith.constant 3 : index
    %646 = memref.load %arg5[%c9_174, %c3_175] : memref<10x10xf32, #tpu.memory_space<smem>>
    %647 = vector.broadcast %646 : f32 to vector<8x128xf32>
    %648 = arith.mulf %481, %647 : vector<8x128xf32>
    %649 = arith.addf %645, %648 : vector<8x128xf32>
    %c3_176 = arith.constant 3 : index
    %650 = memref.load %arg6[%c3_176] : memref<10xf32, #tpu.memory_space<smem>>
    %651 = vector.broadcast %650 : f32 to vector<8x128xf32>
    %652 = arith.addf %649, %651 : vector<8x128xf32>
    %653 = math.tanh %652 : vector<8x128xf32>
    %c0_177 = arith.constant 0 : index
    %c4_178 = arith.constant 4 : index
    %654 = memref.load %arg5[%c0_177, %c4_178] : memref<10x10xf32, #tpu.memory_space<smem>>
    %655 = vector.broadcast %654 : f32 to vector<8x128xf32>
    %656 = arith.mulf %202, %655 : vector<8x128xf32>
    %c1_179 = arith.constant 1 : index
    %c4_180 = arith.constant 4 : index
    %657 = memref.load %arg5[%c1_179, %c4_180] : memref<10x10xf32, #tpu.memory_space<smem>>
    %658 = vector.broadcast %657 : f32 to vector<8x128xf32>
    %659 = arith.mulf %233, %658 : vector<8x128xf32>
    %660 = arith.addf %656, %659 : vector<8x128xf32>
    %c2_181 = arith.constant 2 : index
    %c4_182 = arith.constant 4 : index
    %661 = memref.load %arg5[%c2_181, %c4_182] : memref<10x10xf32, #tpu.memory_space<smem>>
    %662 = vector.broadcast %661 : f32 to vector<8x128xf32>
    %663 = arith.mulf %264, %662 : vector<8x128xf32>
    %664 = arith.addf %660, %663 : vector<8x128xf32>
    %c3_183 = arith.constant 3 : index
    %c4_184 = arith.constant 4 : index
    %665 = memref.load %arg5[%c3_183, %c4_184] : memref<10x10xf32, #tpu.memory_space<smem>>
    %666 = vector.broadcast %665 : f32 to vector<8x128xf32>
    %667 = arith.mulf %295, %666 : vector<8x128xf32>
    %668 = arith.addf %664, %667 : vector<8x128xf32>
    %c4_185 = arith.constant 4 : index
    %c4_186 = arith.constant 4 : index
    %669 = memref.load %arg5[%c4_185, %c4_186] : memref<10x10xf32, #tpu.memory_space<smem>>
    %670 = vector.broadcast %669 : f32 to vector<8x128xf32>
    %671 = arith.mulf %326, %670 : vector<8x128xf32>
    %672 = arith.addf %668, %671 : vector<8x128xf32>
    %c5_187 = arith.constant 5 : index
    %c4_188 = arith.constant 4 : index
    %673 = memref.load %arg5[%c5_187, %c4_188] : memref<10x10xf32, #tpu.memory_space<smem>>
    %674 = vector.broadcast %673 : f32 to vector<8x128xf32>
    %675 = arith.mulf %357, %674 : vector<8x128xf32>
    %676 = arith.addf %672, %675 : vector<8x128xf32>
    %c6_189 = arith.constant 6 : index
    %c4_190 = arith.constant 4 : index
    %677 = memref.load %arg5[%c6_189, %c4_190] : memref<10x10xf32, #tpu.memory_space<smem>>
    %678 = vector.broadcast %677 : f32 to vector<8x128xf32>
    %679 = arith.mulf %388, %678 : vector<8x128xf32>
    %680 = arith.addf %676, %679 : vector<8x128xf32>
    %c7_191 = arith.constant 7 : index
    %c4_192 = arith.constant 4 : index
    %681 = memref.load %arg5[%c7_191, %c4_192] : memref<10x10xf32, #tpu.memory_space<smem>>
    %682 = vector.broadcast %681 : f32 to vector<8x128xf32>
    %683 = arith.mulf %419, %682 : vector<8x128xf32>
    %684 = arith.addf %680, %683 : vector<8x128xf32>
    %c8_193 = arith.constant 8 : index
    %c4_194 = arith.constant 4 : index
    %685 = memref.load %arg5[%c8_193, %c4_194] : memref<10x10xf32, #tpu.memory_space<smem>>
    %686 = vector.broadcast %685 : f32 to vector<8x128xf32>
    %687 = arith.mulf %450, %686 : vector<8x128xf32>
    %688 = arith.addf %684, %687 : vector<8x128xf32>
    %c9_195 = arith.constant 9 : index
    %c4_196 = arith.constant 4 : index
    %689 = memref.load %arg5[%c9_195, %c4_196] : memref<10x10xf32, #tpu.memory_space<smem>>
    %690 = vector.broadcast %689 : f32 to vector<8x128xf32>
    %691 = arith.mulf %481, %690 : vector<8x128xf32>
    %692 = arith.addf %688, %691 : vector<8x128xf32>
    %c4_197 = arith.constant 4 : index
    %693 = memref.load %arg6[%c4_197] : memref<10xf32, #tpu.memory_space<smem>>
    %694 = vector.broadcast %693 : f32 to vector<8x128xf32>
    %695 = arith.addf %692, %694 : vector<8x128xf32>
    %696 = math.tanh %695 : vector<8x128xf32>
    %c0_198 = arith.constant 0 : index
    %c5_199 = arith.constant 5 : index
    %697 = memref.load %arg5[%c0_198, %c5_199] : memref<10x10xf32, #tpu.memory_space<smem>>
    %698 = vector.broadcast %697 : f32 to vector<8x128xf32>
    %699 = arith.mulf %202, %698 : vector<8x128xf32>
    %c1_200 = arith.constant 1 : index
    %c5_201 = arith.constant 5 : index
    %700 = memref.load %arg5[%c1_200, %c5_201] : memref<10x10xf32, #tpu.memory_space<smem>>
    %701 = vector.broadcast %700 : f32 to vector<8x128xf32>
    %702 = arith.mulf %233, %701 : vector<8x128xf32>
    %703 = arith.addf %699, %702 : vector<8x128xf32>
    %c2_202 = arith.constant 2 : index
    %c5_203 = arith.constant 5 : index
    %704 = memref.load %arg5[%c2_202, %c5_203] : memref<10x10xf32, #tpu.memory_space<smem>>
    %705 = vector.broadcast %704 : f32 to vector<8x128xf32>
    %706 = arith.mulf %264, %705 : vector<8x128xf32>
    %707 = arith.addf %703, %706 : vector<8x128xf32>
    %c3_204 = arith.constant 3 : index
    %c5_205 = arith.constant 5 : index
    %708 = memref.load %arg5[%c3_204, %c5_205] : memref<10x10xf32, #tpu.memory_space<smem>>
    %709 = vector.broadcast %708 : f32 to vector<8x128xf32>
    %710 = arith.mulf %295, %709 : vector<8x128xf32>
    %711 = arith.addf %707, %710 : vector<8x128xf32>
    %c4_206 = arith.constant 4 : index
    %c5_207 = arith.constant 5 : index
    %712 = memref.load %arg5[%c4_206, %c5_207] : memref<10x10xf32, #tpu.memory_space<smem>>
    %713 = vector.broadcast %712 : f32 to vector<8x128xf32>
    %714 = arith.mulf %326, %713 : vector<8x128xf32>
    %715 = arith.addf %711, %714 : vector<8x128xf32>
    %c5_208 = arith.constant 5 : index
    %c5_209 = arith.constant 5 : index
    %716 = memref.load %arg5[%c5_208, %c5_209] : memref<10x10xf32, #tpu.memory_space<smem>>
    %717 = vector.broadcast %716 : f32 to vector<8x128xf32>
    %718 = arith.mulf %357, %717 : vector<8x128xf32>
    %719 = arith.addf %715, %718 : vector<8x128xf32>
    %c6_210 = arith.constant 6 : index
    %c5_211 = arith.constant 5 : index
    %720 = memref.load %arg5[%c6_210, %c5_211] : memref<10x10xf32, #tpu.memory_space<smem>>
    %721 = vector.broadcast %720 : f32 to vector<8x128xf32>
    %722 = arith.mulf %388, %721 : vector<8x128xf32>
    %723 = arith.addf %719, %722 : vector<8x128xf32>
    %c7_212 = arith.constant 7 : index
    %c5_213 = arith.constant 5 : index
    %724 = memref.load %arg5[%c7_212, %c5_213] : memref<10x10xf32, #tpu.memory_space<smem>>
    %725 = vector.broadcast %724 : f32 to vector<8x128xf32>
    %726 = arith.mulf %419, %725 : vector<8x128xf32>
    %727 = arith.addf %723, %726 : vector<8x128xf32>
    %c8_214 = arith.constant 8 : index
    %c5_215 = arith.constant 5 : index
    %728 = memref.load %arg5[%c8_214, %c5_215] : memref<10x10xf32, #tpu.memory_space<smem>>
    %729 = vector.broadcast %728 : f32 to vector<8x128xf32>
    %730 = arith.mulf %450, %729 : vector<8x128xf32>
    %731 = arith.addf %727, %730 : vector<8x128xf32>
    %c9_216 = arith.constant 9 : index
    %c5_217 = arith.constant 5 : index
    %732 = memref.load %arg5[%c9_216, %c5_217] : memref<10x10xf32, #tpu.memory_space<smem>>
    %733 = vector.broadcast %732 : f32 to vector<8x128xf32>
    %734 = arith.mulf %481, %733 : vector<8x128xf32>
    %735 = arith.addf %731, %734 : vector<8x128xf32>
    %c5_218 = arith.constant 5 : index
    %736 = memref.load %arg6[%c5_218] : memref<10xf32, #tpu.memory_space<smem>>
    %737 = vector.broadcast %736 : f32 to vector<8x128xf32>
    %738 = arith.addf %735, %737 : vector<8x128xf32>
    %739 = math.tanh %738 : vector<8x128xf32>
    %c0_219 = arith.constant 0 : index
    %c6_220 = arith.constant 6 : index
    %740 = memref.load %arg5[%c0_219, %c6_220] : memref<10x10xf32, #tpu.memory_space<smem>>
    %741 = vector.broadcast %740 : f32 to vector<8x128xf32>
    %742 = arith.mulf %202, %741 : vector<8x128xf32>
    %c1_221 = arith.constant 1 : index
    %c6_222 = arith.constant 6 : index
    %743 = memref.load %arg5[%c1_221, %c6_222] : memref<10x10xf32, #tpu.memory_space<smem>>
    %744 = vector.broadcast %743 : f32 to vector<8x128xf32>
    %745 = arith.mulf %233, %744 : vector<8x128xf32>
    %746 = arith.addf %742, %745 : vector<8x128xf32>
    %c2_223 = arith.constant 2 : index
    %c6_224 = arith.constant 6 : index
    %747 = memref.load %arg5[%c2_223, %c6_224] : memref<10x10xf32, #tpu.memory_space<smem>>
    %748 = vector.broadcast %747 : f32 to vector<8x128xf32>
    %749 = arith.mulf %264, %748 : vector<8x128xf32>
    %750 = arith.addf %746, %749 : vector<8x128xf32>
    %c3_225 = arith.constant 3 : index
    %c6_226 = arith.constant 6 : index
    %751 = memref.load %arg5[%c3_225, %c6_226] : memref<10x10xf32, #tpu.memory_space<smem>>
    %752 = vector.broadcast %751 : f32 to vector<8x128xf32>
    %753 = arith.mulf %295, %752 : vector<8x128xf32>
    %754 = arith.addf %750, %753 : vector<8x128xf32>
    %c4_227 = arith.constant 4 : index
    %c6_228 = arith.constant 6 : index
    %755 = memref.load %arg5[%c4_227, %c6_228] : memref<10x10xf32, #tpu.memory_space<smem>>
    %756 = vector.broadcast %755 : f32 to vector<8x128xf32>
    %757 = arith.mulf %326, %756 : vector<8x128xf32>
    %758 = arith.addf %754, %757 : vector<8x128xf32>
    %c5_229 = arith.constant 5 : index
    %c6_230 = arith.constant 6 : index
    %759 = memref.load %arg5[%c5_229, %c6_230] : memref<10x10xf32, #tpu.memory_space<smem>>
    %760 = vector.broadcast %759 : f32 to vector<8x128xf32>
    %761 = arith.mulf %357, %760 : vector<8x128xf32>
    %762 = arith.addf %758, %761 : vector<8x128xf32>
    %c6_231 = arith.constant 6 : index
    %c6_232 = arith.constant 6 : index
    %763 = memref.load %arg5[%c6_231, %c6_232] : memref<10x10xf32, #tpu.memory_space<smem>>
    %764 = vector.broadcast %763 : f32 to vector<8x128xf32>
    %765 = arith.mulf %388, %764 : vector<8x128xf32>
    %766 = arith.addf %762, %765 : vector<8x128xf32>
    %c7_233 = arith.constant 7 : index
    %c6_234 = arith.constant 6 : index
    %767 = memref.load %arg5[%c7_233, %c6_234] : memref<10x10xf32, #tpu.memory_space<smem>>
    %768 = vector.broadcast %767 : f32 to vector<8x128xf32>
    %769 = arith.mulf %419, %768 : vector<8x128xf32>
    %770 = arith.addf %766, %769 : vector<8x128xf32>
    %c8_235 = arith.constant 8 : index
    %c6_236 = arith.constant 6 : index
    %771 = memref.load %arg5[%c8_235, %c6_236] : memref<10x10xf32, #tpu.memory_space<smem>>
    %772 = vector.broadcast %771 : f32 to vector<8x128xf32>
    %773 = arith.mulf %450, %772 : vector<8x128xf32>
    %774 = arith.addf %770, %773 : vector<8x128xf32>
    %c9_237 = arith.constant 9 : index
    %c6_238 = arith.constant 6 : index
    %775 = memref.load %arg5[%c9_237, %c6_238] : memref<10x10xf32, #tpu.memory_space<smem>>
    %776 = vector.broadcast %775 : f32 to vector<8x128xf32>
    %777 = arith.mulf %481, %776 : vector<8x128xf32>
    %778 = arith.addf %774, %777 : vector<8x128xf32>
    %c6_239 = arith.constant 6 : index
    %779 = memref.load %arg6[%c6_239] : memref<10xf32, #tpu.memory_space<smem>>
    %780 = vector.broadcast %779 : f32 to vector<8x128xf32>
    %781 = arith.addf %778, %780 : vector<8x128xf32>
    %782 = math.tanh %781 : vector<8x128xf32>
    %c0_240 = arith.constant 0 : index
    %c7_241 = arith.constant 7 : index
    %783 = memref.load %arg5[%c0_240, %c7_241] : memref<10x10xf32, #tpu.memory_space<smem>>
    %784 = vector.broadcast %783 : f32 to vector<8x128xf32>
    %785 = arith.mulf %202, %784 : vector<8x128xf32>
    %c1_242 = arith.constant 1 : index
    %c7_243 = arith.constant 7 : index
    %786 = memref.load %arg5[%c1_242, %c7_243] : memref<10x10xf32, #tpu.memory_space<smem>>
    %787 = vector.broadcast %786 : f32 to vector<8x128xf32>
    %788 = arith.mulf %233, %787 : vector<8x128xf32>
    %789 = arith.addf %785, %788 : vector<8x128xf32>
    %c2_244 = arith.constant 2 : index
    %c7_245 = arith.constant 7 : index
    %790 = memref.load %arg5[%c2_244, %c7_245] : memref<10x10xf32, #tpu.memory_space<smem>>
    %791 = vector.broadcast %790 : f32 to vector<8x128xf32>
    %792 = arith.mulf %264, %791 : vector<8x128xf32>
    %793 = arith.addf %789, %792 : vector<8x128xf32>
    %c3_246 = arith.constant 3 : index
    %c7_247 = arith.constant 7 : index
    %794 = memref.load %arg5[%c3_246, %c7_247] : memref<10x10xf32, #tpu.memory_space<smem>>
    %795 = vector.broadcast %794 : f32 to vector<8x128xf32>
    %796 = arith.mulf %295, %795 : vector<8x128xf32>
    %797 = arith.addf %793, %796 : vector<8x128xf32>
    %c4_248 = arith.constant 4 : index
    %c7_249 = arith.constant 7 : index
    %798 = memref.load %arg5[%c4_248, %c7_249] : memref<10x10xf32, #tpu.memory_space<smem>>
    %799 = vector.broadcast %798 : f32 to vector<8x128xf32>
    %800 = arith.mulf %326, %799 : vector<8x128xf32>
    %801 = arith.addf %797, %800 : vector<8x128xf32>
    %c5_250 = arith.constant 5 : index
    %c7_251 = arith.constant 7 : index
    %802 = memref.load %arg5[%c5_250, %c7_251] : memref<10x10xf32, #tpu.memory_space<smem>>
    %803 = vector.broadcast %802 : f32 to vector<8x128xf32>
    %804 = arith.mulf %357, %803 : vector<8x128xf32>
    %805 = arith.addf %801, %804 : vector<8x128xf32>
    %c6_252 = arith.constant 6 : index
    %c7_253 = arith.constant 7 : index
    %806 = memref.load %arg5[%c6_252, %c7_253] : memref<10x10xf32, #tpu.memory_space<smem>>
    %807 = vector.broadcast %806 : f32 to vector<8x128xf32>
    %808 = arith.mulf %388, %807 : vector<8x128xf32>
    %809 = arith.addf %805, %808 : vector<8x128xf32>
    %c7_254 = arith.constant 7 : index
    %c7_255 = arith.constant 7 : index
    %810 = memref.load %arg5[%c7_254, %c7_255] : memref<10x10xf32, #tpu.memory_space<smem>>
    %811 = vector.broadcast %810 : f32 to vector<8x128xf32>
    %812 = arith.mulf %419, %811 : vector<8x128xf32>
    %813 = arith.addf %809, %812 : vector<8x128xf32>
    %c8_256 = arith.constant 8 : index
    %c7_257 = arith.constant 7 : index
    %814 = memref.load %arg5[%c8_256, %c7_257] : memref<10x10xf32, #tpu.memory_space<smem>>
    %815 = vector.broadcast %814 : f32 to vector<8x128xf32>
    %816 = arith.mulf %450, %815 : vector<8x128xf32>
    %817 = arith.addf %813, %816 : vector<8x128xf32>
    %c9_258 = arith.constant 9 : index
    %c7_259 = arith.constant 7 : index
    %818 = memref.load %arg5[%c9_258, %c7_259] : memref<10x10xf32, #tpu.memory_space<smem>>
    %819 = vector.broadcast %818 : f32 to vector<8x128xf32>
    %820 = arith.mulf %481, %819 : vector<8x128xf32>
    %821 = arith.addf %817, %820 : vector<8x128xf32>
    %c7_260 = arith.constant 7 : index
    %822 = memref.load %arg6[%c7_260] : memref<10xf32, #tpu.memory_space<smem>>
    %823 = vector.broadcast %822 : f32 to vector<8x128xf32>
    %824 = arith.addf %821, %823 : vector<8x128xf32>
    %825 = math.tanh %824 : vector<8x128xf32>
    %c0_261 = arith.constant 0 : index
    %c8_262 = arith.constant 8 : index
    %826 = memref.load %arg5[%c0_261, %c8_262] : memref<10x10xf32, #tpu.memory_space<smem>>
    %827 = vector.broadcast %826 : f32 to vector<8x128xf32>
    %828 = arith.mulf %202, %827 : vector<8x128xf32>
    %c1_263 = arith.constant 1 : index
    %c8_264 = arith.constant 8 : index
    %829 = memref.load %arg5[%c1_263, %c8_264] : memref<10x10xf32, #tpu.memory_space<smem>>
    %830 = vector.broadcast %829 : f32 to vector<8x128xf32>
    %831 = arith.mulf %233, %830 : vector<8x128xf32>
    %832 = arith.addf %828, %831 : vector<8x128xf32>
    %c2_265 = arith.constant 2 : index
    %c8_266 = arith.constant 8 : index
    %833 = memref.load %arg5[%c2_265, %c8_266] : memref<10x10xf32, #tpu.memory_space<smem>>
    %834 = vector.broadcast %833 : f32 to vector<8x128xf32>
    %835 = arith.mulf %264, %834 : vector<8x128xf32>
    %836 = arith.addf %832, %835 : vector<8x128xf32>
    %c3_267 = arith.constant 3 : index
    %c8_268 = arith.constant 8 : index
    %837 = memref.load %arg5[%c3_267, %c8_268] : memref<10x10xf32, #tpu.memory_space<smem>>
    %838 = vector.broadcast %837 : f32 to vector<8x128xf32>
    %839 = arith.mulf %295, %838 : vector<8x128xf32>
    %840 = arith.addf %836, %839 : vector<8x128xf32>
    %c4_269 = arith.constant 4 : index
    %c8_270 = arith.constant 8 : index
    %841 = memref.load %arg5[%c4_269, %c8_270] : memref<10x10xf32, #tpu.memory_space<smem>>
    %842 = vector.broadcast %841 : f32 to vector<8x128xf32>
    %843 = arith.mulf %326, %842 : vector<8x128xf32>
    %844 = arith.addf %840, %843 : vector<8x128xf32>
    %c5_271 = arith.constant 5 : index
    %c8_272 = arith.constant 8 : index
    %845 = memref.load %arg5[%c5_271, %c8_272] : memref<10x10xf32, #tpu.memory_space<smem>>
    %846 = vector.broadcast %845 : f32 to vector<8x128xf32>
    %847 = arith.mulf %357, %846 : vector<8x128xf32>
    %848 = arith.addf %844, %847 : vector<8x128xf32>
    %c6_273 = arith.constant 6 : index
    %c8_274 = arith.constant 8 : index
    %849 = memref.load %arg5[%c6_273, %c8_274] : memref<10x10xf32, #tpu.memory_space<smem>>
    %850 = vector.broadcast %849 : f32 to vector<8x128xf32>
    %851 = arith.mulf %388, %850 : vector<8x128xf32>
    %852 = arith.addf %848, %851 : vector<8x128xf32>
    %c7_275 = arith.constant 7 : index
    %c8_276 = arith.constant 8 : index
    %853 = memref.load %arg5[%c7_275, %c8_276] : memref<10x10xf32, #tpu.memory_space<smem>>
    %854 = vector.broadcast %853 : f32 to vector<8x128xf32>
    %855 = arith.mulf %419, %854 : vector<8x128xf32>
    %856 = arith.addf %852, %855 : vector<8x128xf32>
    %c8_277 = arith.constant 8 : index
    %c8_278 = arith.constant 8 : index
    %857 = memref.load %arg5[%c8_277, %c8_278] : memref<10x10xf32, #tpu.memory_space<smem>>
    %858 = vector.broadcast %857 : f32 to vector<8x128xf32>
    %859 = arith.mulf %450, %858 : vector<8x128xf32>
    %860 = arith.addf %856, %859 : vector<8x128xf32>
    %c9_279 = arith.constant 9 : index
    %c8_280 = arith.constant 8 : index
    %861 = memref.load %arg5[%c9_279, %c8_280] : memref<10x10xf32, #tpu.memory_space<smem>>
    %862 = vector.broadcast %861 : f32 to vector<8x128xf32>
    %863 = arith.mulf %481, %862 : vector<8x128xf32>
    %864 = arith.addf %860, %863 : vector<8x128xf32>
    %c8_281 = arith.constant 8 : index
    %865 = memref.load %arg6[%c8_281] : memref<10xf32, #tpu.memory_space<smem>>
    %866 = vector.broadcast %865 : f32 to vector<8x128xf32>
    %867 = arith.addf %864, %866 : vector<8x128xf32>
    %868 = math.tanh %867 : vector<8x128xf32>
    %c0_282 = arith.constant 0 : index
    %c9_283 = arith.constant 9 : index
    %869 = memref.load %arg5[%c0_282, %c9_283] : memref<10x10xf32, #tpu.memory_space<smem>>
    %870 = vector.broadcast %869 : f32 to vector<8x128xf32>
    %871 = arith.mulf %202, %870 : vector<8x128xf32>
    %c1_284 = arith.constant 1 : index
    %c9_285 = arith.constant 9 : index
    %872 = memref.load %arg5[%c1_284, %c9_285] : memref<10x10xf32, #tpu.memory_space<smem>>
    %873 = vector.broadcast %872 : f32 to vector<8x128xf32>
    %874 = arith.mulf %233, %873 : vector<8x128xf32>
    %875 = arith.addf %871, %874 : vector<8x128xf32>
    %c2_286 = arith.constant 2 : index
    %c9_287 = arith.constant 9 : index
    %876 = memref.load %arg5[%c2_286, %c9_287] : memref<10x10xf32, #tpu.memory_space<smem>>
    %877 = vector.broadcast %876 : f32 to vector<8x128xf32>
    %878 = arith.mulf %264, %877 : vector<8x128xf32>
    %879 = arith.addf %875, %878 : vector<8x128xf32>
    %c3_288 = arith.constant 3 : index
    %c9_289 = arith.constant 9 : index
    %880 = memref.load %arg5[%c3_288, %c9_289] : memref<10x10xf32, #tpu.memory_space<smem>>
    %881 = vector.broadcast %880 : f32 to vector<8x128xf32>
    %882 = arith.mulf %295, %881 : vector<8x128xf32>
    %883 = arith.addf %879, %882 : vector<8x128xf32>
    %c4_290 = arith.constant 4 : index
    %c9_291 = arith.constant 9 : index
    %884 = memref.load %arg5[%c4_290, %c9_291] : memref<10x10xf32, #tpu.memory_space<smem>>
    %885 = vector.broadcast %884 : f32 to vector<8x128xf32>
    %886 = arith.mulf %326, %885 : vector<8x128xf32>
    %887 = arith.addf %883, %886 : vector<8x128xf32>
    %c5_292 = arith.constant 5 : index
    %c9_293 = arith.constant 9 : index
    %888 = memref.load %arg5[%c5_292, %c9_293] : memref<10x10xf32, #tpu.memory_space<smem>>
    %889 = vector.broadcast %888 : f32 to vector<8x128xf32>
    %890 = arith.mulf %357, %889 : vector<8x128xf32>
    %891 = arith.addf %887, %890 : vector<8x128xf32>
    %c6_294 = arith.constant 6 : index
    %c9_295 = arith.constant 9 : index
    %892 = memref.load %arg5[%c6_294, %c9_295] : memref<10x10xf32, #tpu.memory_space<smem>>
    %893 = vector.broadcast %892 : f32 to vector<8x128xf32>
    %894 = arith.mulf %388, %893 : vector<8x128xf32>
    %895 = arith.addf %891, %894 : vector<8x128xf32>
    %c7_296 = arith.constant 7 : index
    %c9_297 = arith.constant 9 : index
    %896 = memref.load %arg5[%c7_296, %c9_297] : memref<10x10xf32, #tpu.memory_space<smem>>
    %897 = vector.broadcast %896 : f32 to vector<8x128xf32>
    %898 = arith.mulf %419, %897 : vector<8x128xf32>
    %899 = arith.addf %895, %898 : vector<8x128xf32>
    %c8_298 = arith.constant 8 : index
    %c9_299 = arith.constant 9 : index
    %900 = memref.load %arg5[%c8_298, %c9_299] : memref<10x10xf32, #tpu.memory_space<smem>>
    %901 = vector.broadcast %900 : f32 to vector<8x128xf32>
    %902 = arith.mulf %450, %901 : vector<8x128xf32>
    %903 = arith.addf %899, %902 : vector<8x128xf32>
    %c9_300 = arith.constant 9 : index
    %c9_301 = arith.constant 9 : index
    %904 = memref.load %arg5[%c9_300, %c9_301] : memref<10x10xf32, #tpu.memory_space<smem>>
    %905 = vector.broadcast %904 : f32 to vector<8x128xf32>
    %906 = arith.mulf %481, %905 : vector<8x128xf32>
    %907 = arith.addf %903, %906 : vector<8x128xf32>
    %c9_302 = arith.constant 9 : index
    %908 = memref.load %arg6[%c9_302] : memref<10xf32, #tpu.memory_space<smem>>
    %909 = vector.broadcast %908 : f32 to vector<8x128xf32>
    %910 = arith.addf %907, %909 : vector<8x128xf32>
    %911 = math.tanh %910 : vector<8x128xf32>
    %912 = vector.extract_strided_slice %524 {offsets = [0, 0], sizes = [1, 128], strides = [1, 1]} : vector<8x128xf32> to vector<1x128xf32>
    %913 = vector.broadcast %912 : vector<1x128xf32> to vector<8x128xf32>
    %914 = arith.mulf %7, %913 : vector<8x128xf32>
    %915 = vector.extract_strided_slice %524 {offsets = [1, 0], sizes = [1, 128], strides = [1, 1]} : vector<8x128xf32> to vector<1x128xf32>
    %916 = vector.broadcast %915 : vector<1x128xf32> to vector<8x128xf32>
    %917 = arith.mulf %9, %916 : vector<8x128xf32>
    %918 = arith.addf %914, %917 : vector<8x128xf32>
    %919 = vector.extract_strided_slice %524 {offsets = [2, 0], sizes = [1, 128], strides = [1, 1]} : vector<8x128xf32> to vector<1x128xf32>
    %920 = vector.broadcast %919 : vector<1x128xf32> to vector<8x128xf32>
    %921 = arith.mulf %11, %920 : vector<8x128xf32>
    %922 = arith.addf %918, %921 : vector<8x128xf32>
    %923 = vector.extract_strided_slice %524 {offsets = [3, 0], sizes = [1, 128], strides = [1, 1]} : vector<8x128xf32> to vector<1x128xf32>
    %924 = vector.broadcast %923 : vector<1x128xf32> to vector<8x128xf32>
    %925 = arith.mulf %13, %924 : vector<8x128xf32>
    %926 = arith.addf %922, %925 : vector<8x128xf32>
    %927 = vector.extract_strided_slice %524 {offsets = [4, 0], sizes = [1, 128], strides = [1, 1]} : vector<8x128xf32> to vector<1x128xf32>
    %928 = vector.broadcast %927 : vector<1x128xf32> to vector<8x128xf32>
    %929 = arith.mulf %15, %928 : vector<8x128xf32>
    %930 = arith.addf %926, %929 : vector<8x128xf32>
    %931 = vector.extract_strided_slice %524 {offsets = [5, 0], sizes = [1, 128], strides = [1, 1]} : vector<8x128xf32> to vector<1x128xf32>
    %932 = vector.broadcast %931 : vector<1x128xf32> to vector<8x128xf32>
    %933 = arith.mulf %17, %932 : vector<8x128xf32>
    %934 = arith.addf %930, %933 : vector<8x128xf32>
    %935 = vector.extract_strided_slice %524 {offsets = [6, 0], sizes = [1, 128], strides = [1, 1]} : vector<8x128xf32> to vector<1x128xf32>
    %936 = vector.broadcast %935 : vector<1x128xf32> to vector<8x128xf32>
    %937 = arith.mulf %19, %936 : vector<8x128xf32>
    %938 = arith.addf %934, %937 : vector<8x128xf32>
    %939 = vector.extract_strided_slice %524 {offsets = [7, 0], sizes = [1, 128], strides = [1, 1]} : vector<8x128xf32> to vector<1x128xf32>
    %940 = vector.broadcast %939 : vector<1x128xf32> to vector<8x128xf32>
    %941 = arith.mulf %21, %940 : vector<8x128xf32>
    %942 = arith.addf %938, %941 : vector<8x128xf32>
    %943 = vector.extract_strided_slice %567 {offsets = [0, 0], sizes = [1, 128], strides = [1, 1]} : vector<8x128xf32> to vector<1x128xf32>
    %944 = vector.broadcast %943 : vector<1x128xf32> to vector<8x128xf32>
    %945 = arith.mulf %7, %944 : vector<8x128xf32>
    %946 = vector.extract_strided_slice %567 {offsets = [1, 0], sizes = [1, 128], strides = [1, 1]} : vector<8x128xf32> to vector<1x128xf32>
    %947 = vector.broadcast %946 : vector<1x128xf32> to vector<8x128xf32>
    %948 = arith.mulf %9, %947 : vector<8x128xf32>
    %949 = arith.addf %945, %948 : vector<8x128xf32>
    %950 = vector.extract_strided_slice %567 {offsets = [2, 0], sizes = [1, 128], strides = [1, 1]} : vector<8x128xf32> to vector<1x128xf32>
    %951 = vector.broadcast %950 : vector<1x128xf32> to vector<8x128xf32>
    %952 = arith.mulf %11, %951 : vector<8x128xf32>
    %953 = arith.addf %949, %952 : vector<8x128xf32>
    %954 = vector.extract_strided_slice %567 {offsets = [3, 0], sizes = [1, 128], strides = [1, 1]} : vector<8x128xf32> to vector<1x128xf32>
    %955 = vector.broadcast %954 : vector<1x128xf32> to vector<8x128xf32>
    %956 = arith.mulf %13, %955 : vector<8x128xf32>
    %957 = arith.addf %953, %956 : vector<8x128xf32>
    %958 = vector.extract_strided_slice %567 {offsets = [4, 0], sizes = [1, 128], strides = [1, 1]} : vector<8x128xf32> to vector<1x128xf32>
    %959 = vector.broadcast %958 : vector<1x128xf32> to vector<8x128xf32>
    %960 = arith.mulf %15, %959 : vector<8x128xf32>
    %961 = arith.addf %957, %960 : vector<8x128xf32>
    %962 = vector.extract_strided_slice %567 {offsets = [5, 0], sizes = [1, 128], strides = [1, 1]} : vector<8x128xf32> to vector<1x128xf32>
    %963 = vector.broadcast %962 : vector<1x128xf32> to vector<8x128xf32>
    %964 = arith.mulf %17, %963 : vector<8x128xf32>
    %965 = arith.addf %961, %964 : vector<8x128xf32>
    %966 = vector.extract_strided_slice %567 {offsets = [6, 0], sizes = [1, 128], strides = [1, 1]} : vector<8x128xf32> to vector<1x128xf32>
    %967 = vector.broadcast %966 : vector<1x128xf32> to vector<8x128xf32>
    %968 = arith.mulf %19, %967 : vector<8x128xf32>
    %969 = arith.addf %965, %968 : vector<8x128xf32>
    %970 = vector.extract_strided_slice %567 {offsets = [7, 0], sizes = [1, 128], strides = [1, 1]} : vector<8x128xf32> to vector<1x128xf32>
    %971 = vector.broadcast %970 : vector<1x128xf32> to vector<8x128xf32>
    %972 = arith.mulf %21, %971 : vector<8x128xf32>
    %973 = arith.addf %969, %972 : vector<8x128xf32>
    %974 = vector.extract_strided_slice %610 {offsets = [0, 0], sizes = [1, 128], strides = [1, 1]} : vector<8x128xf32> to vector<1x128xf32>
    %975 = vector.broadcast %974 : vector<1x128xf32> to vector<8x128xf32>
    %976 = arith.mulf %7, %975 : vector<8x128xf32>
    %977 = vector.extract_strided_slice %610 {offsets = [1, 0], sizes = [1, 128], strides = [1, 1]} : vector<8x128xf32> to vector<1x128xf32>
    %978 = vector.broadcast %977 : vector<1x128xf32> to vector<8x128xf32>
    %979 = arith.mulf %9, %978 : vector<8x128xf32>
    %980 = arith.addf %976, %979 : vector<8x128xf32>
    %981 = vector.extract_strided_slice %610 {offsets = [2, 0], sizes = [1, 128], strides = [1, 1]} : vector<8x128xf32> to vector<1x128xf32>
    %982 = vector.broadcast %981 : vector<1x128xf32> to vector<8x128xf32>
    %983 = arith.mulf %11, %982 : vector<8x128xf32>
    %984 = arith.addf %980, %983 : vector<8x128xf32>
    %985 = vector.extract_strided_slice %610 {offsets = [3, 0], sizes = [1, 128], strides = [1, 1]} : vector<8x128xf32> to vector<1x128xf32>
    %986 = vector.broadcast %985 : vector<1x128xf32> to vector<8x128xf32>
    %987 = arith.mulf %13, %986 : vector<8x128xf32>
    %988 = arith.addf %984, %987 : vector<8x128xf32>
    %989 = vector.extract_strided_slice %610 {offsets = [4, 0], sizes = [1, 128], strides = [1, 1]} : vector<8x128xf32> to vector<1x128xf32>
    %990 = vector.broadcast %989 : vector<1x128xf32> to vector<8x128xf32>
    %991 = arith.mulf %15, %990 : vector<8x128xf32>
    %992 = arith.addf %988, %991 : vector<8x128xf32>
    %993 = vector.extract_strided_slice %610 {offsets = [5, 0], sizes = [1, 128], strides = [1, 1]} : vector<8x128xf32> to vector<1x128xf32>
    %994 = vector.broadcast %993 : vector<1x128xf32> to vector<8x128xf32>
    %995 = arith.mulf %17, %994 : vector<8x128xf32>
    %996 = arith.addf %992, %995 : vector<8x128xf32>
    %997 = vector.extract_strided_slice %610 {offsets = [6, 0], sizes = [1, 128], strides = [1, 1]} : vector<8x128xf32> to vector<1x128xf32>
    %998 = vector.broadcast %997 : vector<1x128xf32> to vector<8x128xf32>
    %999 = arith.mulf %19, %998 : vector<8x128xf32>
    %1000 = arith.addf %996, %999 : vector<8x128xf32>
    %1001 = vector.extract_strided_slice %610 {offsets = [7, 0], sizes = [1, 128], strides = [1, 1]} : vector<8x128xf32> to vector<1x128xf32>
    %1002 = vector.broadcast %1001 : vector<1x128xf32> to vector<8x128xf32>
    %1003 = arith.mulf %21, %1002 : vector<8x128xf32>
    %1004 = arith.addf %1000, %1003 : vector<8x128xf32>
    %1005 = vector.extract_strided_slice %653 {offsets = [0, 0], sizes = [1, 128], strides = [1, 1]} : vector<8x128xf32> to vector<1x128xf32>
    %1006 = vector.broadcast %1005 : vector<1x128xf32> to vector<8x128xf32>
    %1007 = arith.mulf %7, %1006 : vector<8x128xf32>
    %1008 = vector.extract_strided_slice %653 {offsets = [1, 0], sizes = [1, 128], strides = [1, 1]} : vector<8x128xf32> to vector<1x128xf32>
    %1009 = vector.broadcast %1008 : vector<1x128xf32> to vector<8x128xf32>
    %1010 = arith.mulf %9, %1009 : vector<8x128xf32>
    %1011 = arith.addf %1007, %1010 : vector<8x128xf32>
    %1012 = vector.extract_strided_slice %653 {offsets = [2, 0], sizes = [1, 128], strides = [1, 1]} : vector<8x128xf32> to vector<1x128xf32>
    %1013 = vector.broadcast %1012 : vector<1x128xf32> to vector<8x128xf32>
    %1014 = arith.mulf %11, %1013 : vector<8x128xf32>
    %1015 = arith.addf %1011, %1014 : vector<8x128xf32>
    %1016 = vector.extract_strided_slice %653 {offsets = [3, 0], sizes = [1, 128], strides = [1, 1]} : vector<8x128xf32> to vector<1x128xf32>
    %1017 = vector.broadcast %1016 : vector<1x128xf32> to vector<8x128xf32>
    %1018 = arith.mulf %13, %1017 : vector<8x128xf32>
    %1019 = arith.addf %1015, %1018 : vector<8x128xf32>
    %1020 = vector.extract_strided_slice %653 {offsets = [4, 0], sizes = [1, 128], strides = [1, 1]} : vector<8x128xf32> to vector<1x128xf32>
    %1021 = vector.broadcast %1020 : vector<1x128xf32> to vector<8x128xf32>
    %1022 = arith.mulf %15, %1021 : vector<8x128xf32>
    %1023 = arith.addf %1019, %1022 : vector<8x128xf32>
    %1024 = vector.extract_strided_slice %653 {offsets = [5, 0], sizes = [1, 128], strides = [1, 1]} : vector<8x128xf32> to vector<1x128xf32>
    %1025 = vector.broadcast %1024 : vector<1x128xf32> to vector<8x128xf32>
    %1026 = arith.mulf %17, %1025 : vector<8x128xf32>
    %1027 = arith.addf %1023, %1026 : vector<8x128xf32>
    %1028 = vector.extract_strided_slice %653 {offsets = [6, 0], sizes = [1, 128], strides = [1, 1]} : vector<8x128xf32> to vector<1x128xf32>
    %1029 = vector.broadcast %1028 : vector<1x128xf32> to vector<8x128xf32>
    %1030 = arith.mulf %19, %1029 : vector<8x128xf32>
    %1031 = arith.addf %1027, %1030 : vector<8x128xf32>
    %1032 = vector.extract_strided_slice %653 {offsets = [7, 0], sizes = [1, 128], strides = [1, 1]} : vector<8x128xf32> to vector<1x128xf32>
    %1033 = vector.broadcast %1032 : vector<1x128xf32> to vector<8x128xf32>
    %1034 = arith.mulf %21, %1033 : vector<8x128xf32>
    %1035 = arith.addf %1031, %1034 : vector<8x128xf32>
    %1036 = vector.extract_strided_slice %696 {offsets = [0, 0], sizes = [1, 128], strides = [1, 1]} : vector<8x128xf32> to vector<1x128xf32>
    %1037 = vector.broadcast %1036 : vector<1x128xf32> to vector<8x128xf32>
    %1038 = arith.mulf %7, %1037 : vector<8x128xf32>
    %1039 = vector.extract_strided_slice %696 {offsets = [1, 0], sizes = [1, 128], strides = [1, 1]} : vector<8x128xf32> to vector<1x128xf32>
    %1040 = vector.broadcast %1039 : vector<1x128xf32> to vector<8x128xf32>
    %1041 = arith.mulf %9, %1040 : vector<8x128xf32>
    %1042 = arith.addf %1038, %1041 : vector<8x128xf32>
    %1043 = vector.extract_strided_slice %696 {offsets = [2, 0], sizes = [1, 128], strides = [1, 1]} : vector<8x128xf32> to vector<1x128xf32>
    %1044 = vector.broadcast %1043 : vector<1x128xf32> to vector<8x128xf32>
    %1045 = arith.mulf %11, %1044 : vector<8x128xf32>
    %1046 = arith.addf %1042, %1045 : vector<8x128xf32>
    %1047 = vector.extract_strided_slice %696 {offsets = [3, 0], sizes = [1, 128], strides = [1, 1]} : vector<8x128xf32> to vector<1x128xf32>
    %1048 = vector.broadcast %1047 : vector<1x128xf32> to vector<8x128xf32>
    %1049 = arith.mulf %13, %1048 : vector<8x128xf32>
    %1050 = arith.addf %1046, %1049 : vector<8x128xf32>
    %1051 = vector.extract_strided_slice %696 {offsets = [4, 0], sizes = [1, 128], strides = [1, 1]} : vector<8x128xf32> to vector<1x128xf32>
    %1052 = vector.broadcast %1051 : vector<1x128xf32> to vector<8x128xf32>
    %1053 = arith.mulf %15, %1052 : vector<8x128xf32>
    %1054 = arith.addf %1050, %1053 : vector<8x128xf32>
    %1055 = vector.extract_strided_slice %696 {offsets = [5, 0], sizes = [1, 128], strides = [1, 1]} : vector<8x128xf32> to vector<1x128xf32>
    %1056 = vector.broadcast %1055 : vector<1x128xf32> to vector<8x128xf32>
    %1057 = arith.mulf %17, %1056 : vector<8x128xf32>
    %1058 = arith.addf %1054, %1057 : vector<8x128xf32>
    %1059 = vector.extract_strided_slice %696 {offsets = [6, 0], sizes = [1, 128], strides = [1, 1]} : vector<8x128xf32> to vector<1x128xf32>
    %1060 = vector.broadcast %1059 : vector<1x128xf32> to vector<8x128xf32>
    %1061 = arith.mulf %19, %1060 : vector<8x128xf32>
    %1062 = arith.addf %1058, %1061 : vector<8x128xf32>
    %1063 = vector.extract_strided_slice %696 {offsets = [7, 0], sizes = [1, 128], strides = [1, 1]} : vector<8x128xf32> to vector<1x128xf32>
    %1064 = vector.broadcast %1063 : vector<1x128xf32> to vector<8x128xf32>
    %1065 = arith.mulf %21, %1064 : vector<8x128xf32>
    %1066 = arith.addf %1062, %1065 : vector<8x128xf32>
    %1067 = vector.extract_strided_slice %739 {offsets = [0, 0], sizes = [1, 128], strides = [1, 1]} : vector<8x128xf32> to vector<1x128xf32>
    %1068 = vector.broadcast %1067 : vector<1x128xf32> to vector<8x128xf32>
    %1069 = arith.mulf %7, %1068 : vector<8x128xf32>
    %1070 = vector.extract_strided_slice %739 {offsets = [1, 0], sizes = [1, 128], strides = [1, 1]} : vector<8x128xf32> to vector<1x128xf32>
    %1071 = vector.broadcast %1070 : vector<1x128xf32> to vector<8x128xf32>
    %1072 = arith.mulf %9, %1071 : vector<8x128xf32>
    %1073 = arith.addf %1069, %1072 : vector<8x128xf32>
    %1074 = vector.extract_strided_slice %739 {offsets = [2, 0], sizes = [1, 128], strides = [1, 1]} : vector<8x128xf32> to vector<1x128xf32>
    %1075 = vector.broadcast %1074 : vector<1x128xf32> to vector<8x128xf32>
    %1076 = arith.mulf %11, %1075 : vector<8x128xf32>
    %1077 = arith.addf %1073, %1076 : vector<8x128xf32>
    %1078 = vector.extract_strided_slice %739 {offsets = [3, 0], sizes = [1, 128], strides = [1, 1]} : vector<8x128xf32> to vector<1x128xf32>
    %1079 = vector.broadcast %1078 : vector<1x128xf32> to vector<8x128xf32>
    %1080 = arith.mulf %13, %1079 : vector<8x128xf32>
    %1081 = arith.addf %1077, %1080 : vector<8x128xf32>
    %1082 = vector.extract_strided_slice %739 {offsets = [4, 0], sizes = [1, 128], strides = [1, 1]} : vector<8x128xf32> to vector<1x128xf32>
    %1083 = vector.broadcast %1082 : vector<1x128xf32> to vector<8x128xf32>
    %1084 = arith.mulf %15, %1083 : vector<8x128xf32>
    %1085 = arith.addf %1081, %1084 : vector<8x128xf32>
    %1086 = vector.extract_strided_slice %739 {offsets = [5, 0], sizes = [1, 128], strides = [1, 1]} : vector<8x128xf32> to vector<1x128xf32>
    %1087 = vector.broadcast %1086 : vector<1x128xf32> to vector<8x128xf32>
    %1088 = arith.mulf %17, %1087 : vector<8x128xf32>
    %1089 = arith.addf %1085, %1088 : vector<8x128xf32>
    %1090 = vector.extract_strided_slice %739 {offsets = [6, 0], sizes = [1, 128], strides = [1, 1]} : vector<8x128xf32> to vector<1x128xf32>
    %1091 = vector.broadcast %1090 : vector<1x128xf32> to vector<8x128xf32>
    %1092 = arith.mulf %19, %1091 : vector<8x128xf32>
    %1093 = arith.addf %1089, %1092 : vector<8x128xf32>
    %1094 = vector.extract_strided_slice %739 {offsets = [7, 0], sizes = [1, 128], strides = [1, 1]} : vector<8x128xf32> to vector<1x128xf32>
    %1095 = vector.broadcast %1094 : vector<1x128xf32> to vector<8x128xf32>
    %1096 = arith.mulf %21, %1095 : vector<8x128xf32>
    %1097 = arith.addf %1093, %1096 : vector<8x128xf32>
    %1098 = vector.extract_strided_slice %782 {offsets = [0, 0], sizes = [1, 128], strides = [1, 1]} : vector<8x128xf32> to vector<1x128xf32>
    %1099 = vector.broadcast %1098 : vector<1x128xf32> to vector<8x128xf32>
    %1100 = arith.mulf %7, %1099 : vector<8x128xf32>
    %1101 = vector.extract_strided_slice %782 {offsets = [1, 0], sizes = [1, 128], strides = [1, 1]} : vector<8x128xf32> to vector<1x128xf32>
    %1102 = vector.broadcast %1101 : vector<1x128xf32> to vector<8x128xf32>
    %1103 = arith.mulf %9, %1102 : vector<8x128xf32>
    %1104 = arith.addf %1100, %1103 : vector<8x128xf32>
    %1105 = vector.extract_strided_slice %782 {offsets = [2, 0], sizes = [1, 128], strides = [1, 1]} : vector<8x128xf32> to vector<1x128xf32>
    %1106 = vector.broadcast %1105 : vector<1x128xf32> to vector<8x128xf32>
    %1107 = arith.mulf %11, %1106 : vector<8x128xf32>
    %1108 = arith.addf %1104, %1107 : vector<8x128xf32>
    %1109 = vector.extract_strided_slice %782 {offsets = [3, 0], sizes = [1, 128], strides = [1, 1]} : vector<8x128xf32> to vector<1x128xf32>
    %1110 = vector.broadcast %1109 : vector<1x128xf32> to vector<8x128xf32>
    %1111 = arith.mulf %13, %1110 : vector<8x128xf32>
    %1112 = arith.addf %1108, %1111 : vector<8x128xf32>
    %1113 = vector.extract_strided_slice %782 {offsets = [4, 0], sizes = [1, 128], strides = [1, 1]} : vector<8x128xf32> to vector<1x128xf32>
    %1114 = vector.broadcast %1113 : vector<1x128xf32> to vector<8x128xf32>
    %1115 = arith.mulf %15, %1114 : vector<8x128xf32>
    %1116 = arith.addf %1112, %1115 : vector<8x128xf32>
    %1117 = vector.extract_strided_slice %782 {offsets = [5, 0], sizes = [1, 128], strides = [1, 1]} : vector<8x128xf32> to vector<1x128xf32>
    %1118 = vector.broadcast %1117 : vector<1x128xf32> to vector<8x128xf32>
    %1119 = arith.mulf %17, %1118 : vector<8x128xf32>
    %1120 = arith.addf %1116, %1119 : vector<8x128xf32>
    %1121 = vector.extract_strided_slice %782 {offsets = [6, 0], sizes = [1, 128], strides = [1, 1]} : vector<8x128xf32> to vector<1x128xf32>
    %1122 = vector.broadcast %1121 : vector<1x128xf32> to vector<8x128xf32>
    %1123 = arith.mulf %19, %1122 : vector<8x128xf32>
    %1124 = arith.addf %1120, %1123 : vector<8x128xf32>
    %1125 = vector.extract_strided_slice %782 {offsets = [7, 0], sizes = [1, 128], strides = [1, 1]} : vector<8x128xf32> to vector<1x128xf32>
    %1126 = vector.broadcast %1125 : vector<1x128xf32> to vector<8x128xf32>
    %1127 = arith.mulf %21, %1126 : vector<8x128xf32>
    %1128 = arith.addf %1124, %1127 : vector<8x128xf32>
    %1129 = vector.extract_strided_slice %825 {offsets = [0, 0], sizes = [1, 128], strides = [1, 1]} : vector<8x128xf32> to vector<1x128xf32>
    %1130 = vector.broadcast %1129 : vector<1x128xf32> to vector<8x128xf32>
    %1131 = arith.mulf %7, %1130 : vector<8x128xf32>
    %1132 = vector.extract_strided_slice %825 {offsets = [1, 0], sizes = [1, 128], strides = [1, 1]} : vector<8x128xf32> to vector<1x128xf32>
    %1133 = vector.broadcast %1132 : vector<1x128xf32> to vector<8x128xf32>
    %1134 = arith.mulf %9, %1133 : vector<8x128xf32>
    %1135 = arith.addf %1131, %1134 : vector<8x128xf32>
    %1136 = vector.extract_strided_slice %825 {offsets = [2, 0], sizes = [1, 128], strides = [1, 1]} : vector<8x128xf32> to vector<1x128xf32>
    %1137 = vector.broadcast %1136 : vector<1x128xf32> to vector<8x128xf32>
    %1138 = arith.mulf %11, %1137 : vector<8x128xf32>
    %1139 = arith.addf %1135, %1138 : vector<8x128xf32>
    %1140 = vector.extract_strided_slice %825 {offsets = [3, 0], sizes = [1, 128], strides = [1, 1]} : vector<8x128xf32> to vector<1x128xf32>
    %1141 = vector.broadcast %1140 : vector<1x128xf32> to vector<8x128xf32>
    %1142 = arith.mulf %13, %1141 : vector<8x128xf32>
    %1143 = arith.addf %1139, %1142 : vector<8x128xf32>
    %1144 = vector.extract_strided_slice %825 {offsets = [4, 0], sizes = [1, 128], strides = [1, 1]} : vector<8x128xf32> to vector<1x128xf32>
    %1145 = vector.broadcast %1144 : vector<1x128xf32> to vector<8x128xf32>
    %1146 = arith.mulf %15, %1145 : vector<8x128xf32>
    %1147 = arith.addf %1143, %1146 : vector<8x128xf32>
    %1148 = vector.extract_strided_slice %825 {offsets = [5, 0], sizes = [1, 128], strides = [1, 1]} : vector<8x128xf32> to vector<1x128xf32>
    %1149 = vector.broadcast %1148 : vector<1x128xf32> to vector<8x128xf32>
    %1150 = arith.mulf %17, %1149 : vector<8x128xf32>
    %1151 = arith.addf %1147, %1150 : vector<8x128xf32>
    %1152 = vector.extract_strided_slice %825 {offsets = [6, 0], sizes = [1, 128], strides = [1, 1]} : vector<8x128xf32> to vector<1x128xf32>
    %1153 = vector.broadcast %1152 : vector<1x128xf32> to vector<8x128xf32>
    %1154 = arith.mulf %19, %1153 : vector<8x128xf32>
    %1155 = arith.addf %1151, %1154 : vector<8x128xf32>
    %1156 = vector.extract_strided_slice %825 {offsets = [7, 0], sizes = [1, 128], strides = [1, 1]} : vector<8x128xf32> to vector<1x128xf32>
    %1157 = vector.broadcast %1156 : vector<1x128xf32> to vector<8x128xf32>
    %1158 = arith.mulf %21, %1157 : vector<8x128xf32>
    %1159 = arith.addf %1155, %1158 : vector<8x128xf32>
    %1160 = vector.extract_strided_slice %868 {offsets = [0, 0], sizes = [1, 128], strides = [1, 1]} : vector<8x128xf32> to vector<1x128xf32>
    %1161 = vector.broadcast %1160 : vector<1x128xf32> to vector<8x128xf32>
    %1162 = arith.mulf %7, %1161 : vector<8x128xf32>
    %1163 = vector.extract_strided_slice %868 {offsets = [1, 0], sizes = [1, 128], strides = [1, 1]} : vector<8x128xf32> to vector<1x128xf32>
    %1164 = vector.broadcast %1163 : vector<1x128xf32> to vector<8x128xf32>
    %1165 = arith.mulf %9, %1164 : vector<8x128xf32>
    %1166 = arith.addf %1162, %1165 : vector<8x128xf32>
    %1167 = vector.extract_strided_slice %868 {offsets = [2, 0], sizes = [1, 128], strides = [1, 1]} : vector<8x128xf32> to vector<1x128xf32>
    %1168 = vector.broadcast %1167 : vector<1x128xf32> to vector<8x128xf32>
    %1169 = arith.mulf %11, %1168 : vector<8x128xf32>
    %1170 = arith.addf %1166, %1169 : vector<8x128xf32>
    %1171 = vector.extract_strided_slice %868 {offsets = [3, 0], sizes = [1, 128], strides = [1, 1]} : vector<8x128xf32> to vector<1x128xf32>
    %1172 = vector.broadcast %1171 : vector<1x128xf32> to vector<8x128xf32>
    %1173 = arith.mulf %13, %1172 : vector<8x128xf32>
    %1174 = arith.addf %1170, %1173 : vector<8x128xf32>
    %1175 = vector.extract_strided_slice %868 {offsets = [4, 0], sizes = [1, 128], strides = [1, 1]} : vector<8x128xf32> to vector<1x128xf32>
    %1176 = vector.broadcast %1175 : vector<1x128xf32> to vector<8x128xf32>
    %1177 = arith.mulf %15, %1176 : vector<8x128xf32>
    %1178 = arith.addf %1174, %1177 : vector<8x128xf32>
    %1179 = vector.extract_strided_slice %868 {offsets = [5, 0], sizes = [1, 128], strides = [1, 1]} : vector<8x128xf32> to vector<1x128xf32>
    %1180 = vector.broadcast %1179 : vector<1x128xf32> to vector<8x128xf32>
    %1181 = arith.mulf %17, %1180 : vector<8x128xf32>
    %1182 = arith.addf %1178, %1181 : vector<8x128xf32>
    %1183 = vector.extract_strided_slice %868 {offsets = [6, 0], sizes = [1, 128], strides = [1, 1]} : vector<8x128xf32> to vector<1x128xf32>
    %1184 = vector.broadcast %1183 : vector<1x128xf32> to vector<8x128xf32>
    %1185 = arith.mulf %19, %1184 : vector<8x128xf32>
    %1186 = arith.addf %1182, %1185 : vector<8x128xf32>
    %1187 = vector.extract_strided_slice %868 {offsets = [7, 0], sizes = [1, 128], strides = [1, 1]} : vector<8x128xf32> to vector<1x128xf32>
    %1188 = vector.broadcast %1187 : vector<1x128xf32> to vector<8x128xf32>
    %1189 = arith.mulf %21, %1188 : vector<8x128xf32>
    %1190 = arith.addf %1186, %1189 : vector<8x128xf32>
    %1191 = vector.extract_strided_slice %911 {offsets = [0, 0], sizes = [1, 128], strides = [1, 1]} : vector<8x128xf32> to vector<1x128xf32>
    %1192 = vector.broadcast %1191 : vector<1x128xf32> to vector<8x128xf32>
    %1193 = arith.mulf %7, %1192 : vector<8x128xf32>
    %1194 = vector.extract_strided_slice %911 {offsets = [1, 0], sizes = [1, 128], strides = [1, 1]} : vector<8x128xf32> to vector<1x128xf32>
    %1195 = vector.broadcast %1194 : vector<1x128xf32> to vector<8x128xf32>
    %1196 = arith.mulf %9, %1195 : vector<8x128xf32>
    %1197 = arith.addf %1193, %1196 : vector<8x128xf32>
    %1198 = vector.extract_strided_slice %911 {offsets = [2, 0], sizes = [1, 128], strides = [1, 1]} : vector<8x128xf32> to vector<1x128xf32>
    %1199 = vector.broadcast %1198 : vector<1x128xf32> to vector<8x128xf32>
    %1200 = arith.mulf %11, %1199 : vector<8x128xf32>
    %1201 = arith.addf %1197, %1200 : vector<8x128xf32>
    %1202 = vector.extract_strided_slice %911 {offsets = [3, 0], sizes = [1, 128], strides = [1, 1]} : vector<8x128xf32> to vector<1x128xf32>
    %1203 = vector.broadcast %1202 : vector<1x128xf32> to vector<8x128xf32>
    %1204 = arith.mulf %13, %1203 : vector<8x128xf32>
    %1205 = arith.addf %1201, %1204 : vector<8x128xf32>
    %1206 = vector.extract_strided_slice %911 {offsets = [4, 0], sizes = [1, 128], strides = [1, 1]} : vector<8x128xf32> to vector<1x128xf32>
    %1207 = vector.broadcast %1206 : vector<1x128xf32> to vector<8x128xf32>
    %1208 = arith.mulf %15, %1207 : vector<8x128xf32>
    %1209 = arith.addf %1205, %1208 : vector<8x128xf32>
    %1210 = vector.extract_strided_slice %911 {offsets = [5, 0], sizes = [1, 128], strides = [1, 1]} : vector<8x128xf32> to vector<1x128xf32>
    %1211 = vector.broadcast %1210 : vector<1x128xf32> to vector<8x128xf32>
    %1212 = arith.mulf %17, %1211 : vector<8x128xf32>
    %1213 = arith.addf %1209, %1212 : vector<8x128xf32>
    %1214 = vector.extract_strided_slice %911 {offsets = [6, 0], sizes = [1, 128], strides = [1, 1]} : vector<8x128xf32> to vector<1x128xf32>
    %1215 = vector.broadcast %1214 : vector<1x128xf32> to vector<8x128xf32>
    %1216 = arith.mulf %19, %1215 : vector<8x128xf32>
    %1217 = arith.addf %1213, %1216 : vector<8x128xf32>
    %1218 = vector.extract_strided_slice %911 {offsets = [7, 0], sizes = [1, 128], strides = [1, 1]} : vector<8x128xf32> to vector<1x128xf32>
    %1219 = vector.broadcast %1218 : vector<1x128xf32> to vector<8x128xf32>
    %1220 = arith.mulf %21, %1219 : vector<8x128xf32>
    %1221 = arith.addf %1217, %1220 : vector<8x128xf32>
    %cst = arith.constant dense<0.000000e+00> : vector<128xf32>
    %1222 = vector.multi_reduction <add>, %942, %cst [0] : vector<8x128xf32> to vector<128xf32>
    %1223 = vector.shape_cast %1222 : vector<128xf32> to vector<1x128xf32>
    %cst_303 = arith.constant dense<0.000000e+00> : vector<128xf32>
    %1224 = vector.multi_reduction <add>, %973, %cst_303 [0] : vector<8x128xf32> to vector<128xf32>
    %1225 = vector.shape_cast %1224 : vector<128xf32> to vector<1x128xf32>
    %cst_304 = arith.constant dense<0.000000e+00> : vector<128xf32>
    %1226 = vector.multi_reduction <add>, %1004, %cst_304 [0] : vector<8x128xf32> to vector<128xf32>
    %1227 = vector.shape_cast %1226 : vector<128xf32> to vector<1x128xf32>
    %cst_305 = arith.constant dense<0.000000e+00> : vector<128xf32>
    %1228 = vector.multi_reduction <add>, %1035, %cst_305 [0] : vector<8x128xf32> to vector<128xf32>
    %1229 = vector.shape_cast %1228 : vector<128xf32> to vector<1x128xf32>
    %cst_306 = arith.constant dense<0.000000e+00> : vector<128xf32>
    %1230 = vector.multi_reduction <add>, %1066, %cst_306 [0] : vector<8x128xf32> to vector<128xf32>
    %1231 = vector.shape_cast %1230 : vector<128xf32> to vector<1x128xf32>
    %cst_307 = arith.constant dense<0.000000e+00> : vector<128xf32>
    %1232 = vector.multi_reduction <add>, %1097, %cst_307 [0] : vector<8x128xf32> to vector<128xf32>
    %1233 = vector.shape_cast %1232 : vector<128xf32> to vector<1x128xf32>
    %cst_308 = arith.constant dense<0.000000e+00> : vector<128xf32>
    %1234 = vector.multi_reduction <add>, %1128, %cst_308 [0] : vector<8x128xf32> to vector<128xf32>
    %1235 = vector.shape_cast %1234 : vector<128xf32> to vector<1x128xf32>
    %cst_309 = arith.constant dense<0.000000e+00> : vector<128xf32>
    %1236 = vector.multi_reduction <add>, %1159, %cst_309 [0] : vector<8x128xf32> to vector<128xf32>
    %1237 = vector.shape_cast %1236 : vector<128xf32> to vector<1x128xf32>
    %cst_310 = arith.constant dense<0.000000e+00> : vector<128xf32>
    %1238 = vector.multi_reduction <add>, %1190, %cst_310 [0] : vector<8x128xf32> to vector<128xf32>
    %1239 = vector.shape_cast %1238 : vector<128xf32> to vector<1x128xf32>
    %cst_311 = arith.constant dense<0.000000e+00> : vector<128xf32>
    %1240 = vector.multi_reduction <add>, %1221, %cst_311 [0] : vector<8x128xf32> to vector<128xf32>
    %1241 = vector.shape_cast %1240 : vector<128xf32> to vector<1x128xf32>
    %c0_312 = arith.constant 0 : index
    %c0_313 = arith.constant 0 : index
    %1242 = memref.load %arg7[%c0_312, %c0_313] : memref<10x2xf32, #tpu.memory_space<smem>>
    %1243 = vector.broadcast %1242 : f32 to vector<1x128xf32>
    %1244 = arith.mulf %1223, %1243 : vector<1x128xf32>
    %c1_314 = arith.constant 1 : index
    %c0_315 = arith.constant 0 : index
    %1245 = memref.load %arg7[%c1_314, %c0_315] : memref<10x2xf32, #tpu.memory_space<smem>>
    %1246 = vector.broadcast %1245 : f32 to vector<1x128xf32>
    %1247 = arith.mulf %1225, %1246 : vector<1x128xf32>
    %1248 = arith.addf %1244, %1247 : vector<1x128xf32>
    %c2_316 = arith.constant 2 : index
    %c0_317 = arith.constant 0 : index
    %1249 = memref.load %arg7[%c2_316, %c0_317] : memref<10x2xf32, #tpu.memory_space<smem>>
    %1250 = vector.broadcast %1249 : f32 to vector<1x128xf32>
    %1251 = arith.mulf %1227, %1250 : vector<1x128xf32>
    %1252 = arith.addf %1248, %1251 : vector<1x128xf32>
    %c3_318 = arith.constant 3 : index
    %c0_319 = arith.constant 0 : index
    %1253 = memref.load %arg7[%c3_318, %c0_319] : memref<10x2xf32, #tpu.memory_space<smem>>
    %1254 = vector.broadcast %1253 : f32 to vector<1x128xf32>
    %1255 = arith.mulf %1229, %1254 : vector<1x128xf32>
    %1256 = arith.addf %1252, %1255 : vector<1x128xf32>
    %c4_320 = arith.constant 4 : index
    %c0_321 = arith.constant 0 : index
    %1257 = memref.load %arg7[%c4_320, %c0_321] : memref<10x2xf32, #tpu.memory_space<smem>>
    %1258 = vector.broadcast %1257 : f32 to vector<1x128xf32>
    %1259 = arith.mulf %1231, %1258 : vector<1x128xf32>
    %1260 = arith.addf %1256, %1259 : vector<1x128xf32>
    %c5_322 = arith.constant 5 : index
    %c0_323 = arith.constant 0 : index
    %1261 = memref.load %arg7[%c5_322, %c0_323] : memref<10x2xf32, #tpu.memory_space<smem>>
    %1262 = vector.broadcast %1261 : f32 to vector<1x128xf32>
    %1263 = arith.mulf %1233, %1262 : vector<1x128xf32>
    %1264 = arith.addf %1260, %1263 : vector<1x128xf32>
    %c6_324 = arith.constant 6 : index
    %c0_325 = arith.constant 0 : index
    %1265 = memref.load %arg7[%c6_324, %c0_325] : memref<10x2xf32, #tpu.memory_space<smem>>
    %1266 = vector.broadcast %1265 : f32 to vector<1x128xf32>
    %1267 = arith.mulf %1235, %1266 : vector<1x128xf32>
    %1268 = arith.addf %1264, %1267 : vector<1x128xf32>
    %c7_326 = arith.constant 7 : index
    %c0_327 = arith.constant 0 : index
    %1269 = memref.load %arg7[%c7_326, %c0_327] : memref<10x2xf32, #tpu.memory_space<smem>>
    %1270 = vector.broadcast %1269 : f32 to vector<1x128xf32>
    %1271 = arith.mulf %1237, %1270 : vector<1x128xf32>
    %1272 = arith.addf %1268, %1271 : vector<1x128xf32>
    %c8_328 = arith.constant 8 : index
    %c0_329 = arith.constant 0 : index
    %1273 = memref.load %arg7[%c8_328, %c0_329] : memref<10x2xf32, #tpu.memory_space<smem>>
    %1274 = vector.broadcast %1273 : f32 to vector<1x128xf32>
    %1275 = arith.mulf %1239, %1274 : vector<1x128xf32>
    %1276 = arith.addf %1272, %1275 : vector<1x128xf32>
    %c9_330 = arith.constant 9 : index
    %c0_331 = arith.constant 0 : index
    %1277 = memref.load %arg7[%c9_330, %c0_331] : memref<10x2xf32, #tpu.memory_space<smem>>
    %1278 = vector.broadcast %1277 : f32 to vector<1x128xf32>
    %1279 = arith.mulf %1241, %1278 : vector<1x128xf32>
    %1280 = arith.addf %1276, %1279 : vector<1x128xf32>
    %c0_332 = arith.constant 0 : index
    %1281 = memref.load %arg8[%c0_332] : memref<2xf32, #tpu.memory_space<smem>>
    %1282 = vector.broadcast %1281 : f32 to vector<1x128xf32>
    %1283 = arith.addf %1280, %1282 : vector<1x128xf32>
    %c0_333 = arith.constant 0 : index
    %c0_334 = arith.constant 0 : index
    %1284 = vector.load %arg9[%c0_333, %c0_334] : memref<2x128xf32, #tpu.memory_space<vmem>>, vector<1x128xf32>
    tpu.vector_store %arg9[%c0_333, %c0_334], %1283 {strides = array<i32>} : memref<2x128xf32, #tpu.memory_space<vmem>>, vector<1x128xf32>,
    %c0_335 = arith.constant 0 : index
    %c1_336 = arith.constant 1 : index
    %1285 = memref.load %arg7[%c0_335, %c1_336] : memref<10x2xf32, #tpu.memory_space<smem>>
    %1286 = vector.broadcast %1285 : f32 to vector<1x128xf32>
    %1287 = arith.mulf %1223, %1286 : vector<1x128xf32>
    %c1_337 = arith.constant 1 : index
    %c1_338 = arith.constant 1 : index
    %1288 = memref.load %arg7[%c1_337, %c1_338] : memref<10x2xf32, #tpu.memory_space<smem>>
    %1289 = vector.broadcast %1288 : f32 to vector<1x128xf32>
    %1290 = arith.mulf %1225, %1289 : vector<1x128xf32>
    %1291 = arith.addf %1287, %1290 : vector<1x128xf32>
    %c2_339 = arith.constant 2 : index
    %c1_340 = arith.constant 1 : index
    %1292 = memref.load %arg7[%c2_339, %c1_340] : memref<10x2xf32, #tpu.memory_space<smem>>
    %1293 = vector.broadcast %1292 : f32 to vector<1x128xf32>
    %1294 = arith.mulf %1227, %1293 : vector<1x128xf32>
    %1295 = arith.addf %1291, %1294 : vector<1x128xf32>
    %c3_341 = arith.constant 3 : index
    %c1_342 = arith.constant 1 : index
    %1296 = memref.load %arg7[%c3_341, %c1_342] : memref<10x2xf32, #tpu.memory_space<smem>>
    %1297 = vector.broadcast %1296 : f32 to vector<1x128xf32>
    %1298 = arith.mulf %1229, %1297 : vector<1x128xf32>
    %1299 = arith.addf %1295, %1298 : vector<1x128xf32>
    %c4_343 = arith.constant 4 : index
    %c1_344 = arith.constant 1 : index
    %1300 = memref.load %arg7[%c4_343, %c1_344] : memref<10x2xf32, #tpu.memory_space<smem>>
    %1301 = vector.broadcast %1300 : f32 to vector<1x128xf32>
    %1302 = arith.mulf %1231, %1301 : vector<1x128xf32>
    %1303 = arith.addf %1299, %1302 : vector<1x128xf32>
    %c5_345 = arith.constant 5 : index
    %c1_346 = arith.constant 1 : index
    %1304 = memref.load %arg7[%c5_345, %c1_346] : memref<10x2xf32, #tpu.memory_space<smem>>
    %1305 = vector.broadcast %1304 : f32 to vector<1x128xf32>
    %1306 = arith.mulf %1233, %1305 : vector<1x128xf32>
    %1307 = arith.addf %1303, %1306 : vector<1x128xf32>
    %c6_347 = arith.constant 6 : index
    %c1_348 = arith.constant 1 : index
    %1308 = memref.load %arg7[%c6_347, %c1_348] : memref<10x2xf32, #tpu.memory_space<smem>>
    %1309 = vector.broadcast %1308 : f32 to vector<1x128xf32>
    %1310 = arith.mulf %1235, %1309 : vector<1x128xf32>
    %1311 = arith.addf %1307, %1310 : vector<1x128xf32>
    %c7_349 = arith.constant 7 : index
    %c1_350 = arith.constant 1 : index
    %1312 = memref.load %arg7[%c7_349, %c1_350] : memref<10x2xf32, #tpu.memory_space<smem>>
    %1313 = vector.broadcast %1312 : f32 to vector<1x128xf32>
    %1314 = arith.mulf %1237, %1313 : vector<1x128xf32>
    %1315 = arith.addf %1311, %1314 : vector<1x128xf32>
    %c8_351 = arith.constant 8 : index
    %c1_352 = arith.constant 1 : index
    %1316 = memref.load %arg7[%c8_351, %c1_352] : memref<10x2xf32, #tpu.memory_space<smem>>
    %1317 = vector.broadcast %1316 : f32 to vector<1x128xf32>
    %1318 = arith.mulf %1239, %1317 : vector<1x128xf32>
    %1319 = arith.addf %1315, %1318 : vector<1x128xf32>
    %c9_353 = arith.constant 9 : index
    %c1_354 = arith.constant 1 : index
    %1320 = memref.load %arg7[%c9_353, %c1_354] : memref<10x2xf32, #tpu.memory_space<smem>>
    %1321 = vector.broadcast %1320 : f32 to vector<1x128xf32>
    %1322 = arith.mulf %1241, %1321 : vector<1x128xf32>
    %1323 = arith.addf %1319, %1322 : vector<1x128xf32>
    %c1_355 = arith.constant 1 : index
    %1324 = memref.load %arg8[%c1_355] : memref<2xf32, #tpu.memory_space<smem>>
    %1325 = vector.broadcast %1324 : f32 to vector<1x128xf32>
    %1326 = arith.addf %1323, %1325 : vector<1x128xf32>
    %c1_356 = arith.constant 1 : index
    %c0_357 = arith.constant 0 : index
    %1327 = vector.load %arg9[%c1_356, %c0_357] : memref<2x128xf32, #tpu.memory_space<vmem>>, vector<1x128xf32>
    tpu.vector_store %arg9[%c1_356, %c0_357], %1326 {strides = array<i32>} : memref<2x128xf32, #tpu.memory_space<vmem>>, vector<1x128xf32>,
    return
  }
  func.func @transform_0(%arg0: i32) -> (i32, i32, i32) {
    %c0_i32 = arith.constant 0 : i32
    %c0_i32_0 = arith.constant 0 : i32
    %c0_i32_1 = arith.constant 0 : i32
    return %c0_i32, %c0_i32_0, %arg0 : i32, i32, i32
  }
  func.func @transform_1(%arg0: i32) -> (i32, i32, i32) {
    %c0_i32 = arith.constant 0 : i32
    %c0_i32_0 = arith.constant 0 : i32
    %c0_i32_1 = arith.constant 0 : i32
    return %c0_i32, %c0_i32_0, %arg0 : i32, i32, i32
  }
  func.func @transform_2(%arg0: i32) -> (i32, i32) {
    %c0_i32 = arith.constant 0 : i32
    %c0_i32_0 = arith.constant 0 : i32
    %c0_i32_1 = arith.constant 0 : i32
    return %c0_i32, %c0_i32_0 : i32, i32
  }
  func.func @transform_3(%arg0: i32) -> i32 {
    %c0_i32 = arith.constant 0 : i32
    %c0_i32_0 = arith.constant 0 : i32
    return %c0_i32 : i32
  }
  func.func @transform_4(%arg0: i32) -> (i32, i32) {
    %c0_i32 = arith.constant 0 : i32
    %c0_i32_0 = arith.constant 0 : i32
    %c0_i32_1 = arith.constant 0 : i32
    return %c0_i32, %c0_i32_0 : i32, i32
  }
  func.func @transform_5(%arg0: i32) -> i32 {
    %c0_i32 = arith.constant 0 : i32
    %c0_i32_0 = arith.constant 0 : i32
    return %c0_i32 : i32
  }
  func.func @transform_6(%arg0: i32) -> (i32, i32) {
    %c0_i32 = arith.constant 0 : i32
    %c0_i32_0 = arith.constant 0 : i32
    %c0_i32_1 = arith.constant 0 : i32
    return %c0_i32, %c0_i32_0 : i32, i32
  }
  func.func @transform_7(%arg0: i32) -> i32 {
    %c0_i32 = arith.constant 0 : i32
    %c0_i32_0 = arith.constant 0 : i32
    return %c0_i32 : i32
  }
  func.func @transform_8(%arg0: i32) -> (i32, i32) {
    %c0_i32 = arith.constant 0 : i32
    %c0_i32_0 = arith.constant 0 : i32
    return %c0_i32, %arg0 : i32, i32
  }
}

</mosaic_0001>

<bundles_post_ra>
// kernel: tpu_custom_call.1
= control target key start
LH: loop header
LB: loop body
LE: loop exit
PB: predicated region body
PF: predicated region fallthrough
CT: control target
= control target key end

     0   :  { %s2905_s0 = inlined_call_operand.hbm [shape: f32[3,8,128], index: 0, kind: input, shape index: {}]   ;;  %s2906_s1 = inlined_call_operand.hbm [shape: f32[8,8,128], index: 1, kind: input, shape index: {}]   ;;  %s2907_s2 = inlined_call_operand.hbm [shape: f32[3,10], index: 2, kind: input, shape index: {}]   ;;  %s2908_s3 = inlined_call_operand.vmem [shape: f32[10], index: 3, kind: input, shape index: {}]   ;;  %s2909_s4 = inlined_call_operand.vmem [shape: f32[10,10], index: 4, kind: input, shape index: {}]   ;;  %s2910_s5 = inlined_call_operand.vmem [shape: f32[10], index: 5, kind: input, shape index: {}]   ;;  %s2911_s6 = inlined_call_operand.vmem [shape: f32[10,2], index: 6, kind: input, shape index: {}]   ;;  %s2912_s7 = inlined_call_operand.vmem [shape: f32[2], index: 7, kind: input, shape index: {}]   ;;  %s2913_s8 = inlined_call_operand.hbm [shape: f32[2,128], index: 8, kind: output, shape index: {}]  }
   0x1   :  { %2915 = sst [smem:[#allocation36_spill]] %s2913_s8 }
   0x2   :  { %13 = vsyncpa [#allocation3], 0 }
   0x3   :  { %14 = vsyncpa [#allocation8], 0 }
   0x4   :  { %15 = vsyncpa [#allocation5], 0 }
   0x5   :  { %16 = vsyncpa [#allocation6], 0 }
   0x6   :  { %17 = vsyncpa [#allocation12], 0 }
   0x7   :  { %18 = vsyncpa [#allocation15], 0 }
   0x8   :  { %19 = vsyncpa [#allocation4], 0  ;;  %s68_s29 = sshll.u32 %s2909_s4, 4  ;;  %s88_s10 = sshll.u32 %s2911_s6, 4  ;;  %s69_s29 = int_to_ptr.vmem [resolvable:$true] %s68_s29  ;;  %s89_s10 = int_to_ptr.vmem [resolvable:$true] %s88_s10 }
   0x9   :  { %s1748_s11 = smov [#allocation11]   ;;  %s1749_s12 = smov 128  }
   0xa   :  { %s1750_s13 = smov 8   ;;  %s1751_s14 = smov [#allocation14]  }
   0xb   :  { %74 = dma.vmem_to_smem %s69_s29, 256, %s1748_s11, [#allocation12], %s1749_s12, %s1749_s12, %s1750_s13  }
   0xc   :  { %94 = dma.vmem_to_smem %s89_s10, 256, %s1751_s14, [#allocation15], %s1749_s12, %s1749_s12, %s1750_s13  }
   0xd   :  { %s24_s17 = sshll.u32 %s2905_s0, 4  ;;  %s1752_s18 = smov [#allocation2]   ;;  %s25_s17 = int_to_ptr.hbm [resolvable:$true] %s24_s17 }
   0xe   :  { %s26_s19 = sshll.u32 %s1752_s18, 4  ;;  %s37_s21 = sshll.u32 %s2906_s1, 4  ;;  %s27_s19 = int_to_ptr.vmem [resolvable:$true] %s26_s19  ;;  %s38_s21 = int_to_ptr.hbm [resolvable:$true] %s37_s21 }
   0xf   :  { %32 = dma.hbm_to_vmem [thread:$0]  %s25_s17, 384, %s27_s19, [#allocation3], %s1749_s12, %s1749_s12, %s1750_s13  }
  0x10   :  { %s1753_s6 = smov [#allocation7]   ;;  %s51_s25 = sshll.u32 %s2907_s2, 4  ;;  %s52_s25 = int_to_ptr.hbm [resolvable:$true] %s51_s25 }
  0x11   :  { %s39_s22 = sshll.u32 %s1753_s6, 4  ;;  %s60_s27 = sshll.u32 %s2908_s3, 4  ;;  %s40_s22 = int_to_ptr.vmem [resolvable:$true] %s39_s22  ;;  %s61_s27 = int_to_ptr.vmem [resolvable:$true] %s60_s27 }
  0x12   :  { %45 = dma.hbm_to_vmem [thread:$0]  %s38_s21, 1024, %s40_s22, [#allocation8], %s1749_s12, %s1749_s12, %s1750_s13  }
  0x13   :  { %s1754_s28 = smov [#allocation9]   ;;  %s1755_s29 = smov [#allocation10]  }
  0x14   :  { %54 = dma.hbm_to_smem %s52_s25, 64, %s1754_s28, [#allocation5]  }
  0x15   :  { %63 = dma.vmem_to_smem %s61_s27, 16, %s1755_s29, [#allocation6]  }
  0x16   :  { %s80_s9 = sshll.u32 %s2910_s5, 4  ;;  %s100_s2 = sshll.u32 %s2912_s7, 4  ;;  %s81_s9 = int_to_ptr.vmem [resolvable:$true] %s80_s9  ;;  %s101_s2 = int_to_ptr.vmem [resolvable:$true] %s100_s2 }
  0x17   :  { %s1756_s14 = smov [#allocation13]   ;;  %s1757_s12 = smov [#allocation16]  }
  0x18   :  { %83 = dma.vmem_to_smem %s81_s9, 16, %s1756_s14, [#allocation12]  }
  0x19   :  { %103 = dma.vmem_to_smem %s101_s2, 16, %s1757_s12, [#allocation15]  }
  0x1a   :  { %1734 = dma.done.wait [#allocation3], 384  }
  0x1b   :  { %1735 = vsyncadd [#allocation3], 4294966912 }
  0x1c   :  { %1736 = dma.done.wait [#allocation8], 1024  }
  0x1d   :  { %1737 = vsyncadd [#allocation8], 4294966272 }
  0x1e   :  { %1738 = dma.done.wait [#allocation5], 64  }
  0x1f   :  { %1739 = vsyncadd [#allocation5], 4294967232 }
  0x20   :  { %1740 = dma.done.wait [#allocation6], 16  }
  0x21   :  { %1741 = vsyncadd [#allocation6], 4294967280 }
  0x22   :  { %1742 = dma.done.wait [#allocation12], 272  }
  0x23   :  { %1743 = vsyncadd [#allocation12], 4294967024 }
  0x24   :  { %1744 = dma.done.wait [#allocation15], 272  }
  0x25   :  { %1745 = vsyncadd [#allocation15], 4294967024 }
  0x26   :  { %136 = sfence }
  0x27   :  { %s157_s3 = sld [smem:[#allocation9]]  ;;  %v1828_v0 = vld [vmem:[#allocation2] sm:$0xff]  ;;  %v1830_v1 = vld [vmem:[#allocation2 + $0x8] sm:$0xff]  ;;  %v1832_v2 = vld [vmem:[#allocation2 + $0x10] sm:$0xff] }
  0x28   :  { %s1365_s5 = sld [smem:[#allocation9 + $0x80]]  ;;  %v1864_v39 = vld [vmem:[#allocation7] sm:$0xff]  ;;  %v1866_v40 = vld [vmem:[#allocation7 + $0x8] sm:$0xff]  ;;  %v1886_v56 = vld [vmem:[#allocation7 + $0x10] sm:$0xff] }
  0x29   :  { %s1366_s7 = sld [smem:[#allocation9 + $0x100]]  ;;  %v1888_v57 = vld [vmem:[#allocation7 + $0x18] sm:$0xff] }
  0x2a   :  { %s168_s13 = sld [smem:[#allocation10]] }
  0x2b   :  { %s1367_s15 = sld [smem:[#allocation9 + $0x1]] }
  0x2c   :  { %s1368_s16 = sld [smem:[#allocation9 + $0x81]] }
  0x2d   :  { %v158_v3 = vstv %s157_s3  ;;  %s1369_s17 = sld [smem:[#allocation9 + $0x101]] }
  0x2e   :  { %v159_v4 = vmul.f32 %v158_v3, %v1828_v0  ;;  %v161_v5 = vstv %s1365_s5  ;;  %s1835_s18 = sld [smem:[#allocation10 + $0x1]] }
  0x2f   :  { %v162_v6 = vmul.f32 %v161_v5, %v1830_v1  ;;  %v165_v7 = vstv %s1366_s7  ;;  %s1371_s19 = sld [smem:[#allocation9 + $0x2]] }
  0x30   :  { %v166_v8 = vmul.f32 %v165_v7, %v1832_v2  ;;  %s1372_s4 = sld [smem:[#allocation9 + $0x82]]  ;;  %v169_v11 = vstv %s168_s13 }
  0x31   :  { %v163_v9 = vadd.f32 %v162_v6, %v159_v4  ;;  %v173_v10 = vstv %s1367_s15  ;;  %s1373_s20 = sld [smem:[#allocation9 + $0x102]] }
  0x32   :  { %v174_v12 = vmul.f32 %v173_v10, %v1828_v0  ;;  %v176_v13 = vstv %s1368_s16  ;;  %s1840_s21 = sld [smem:[#allocation10 + $0x2]] }
  0x33   :  { %v167_v14 = vadd.f32 %v166_v8, %v163_v9  ;;  %v177_v15 = vmul.f32 %v176_v13, %v1830_v1  ;;  %v180_v16 = vstv %s1369_s17  ;;  %s1375_s6 = sld [smem:[#allocation9 + $0x3]] }
  0x34   :  { %v181_v17 = vmul.f32 %v180_v16, %v1832_v2  ;;  %s1376_s22 = sld [smem:[#allocation9 + $0x83]]  ;;  %v184_v21 = vstv %s1835_s18 }
  0x35   :  { %v170_v18 = vadd.f32 %v169_v11, %v167_v14  ;;  %v178_v19 = vadd.f32 %v177_v15, %v174_v12  ;;  %v188_v20 = vstv %s1371_s19  ;;  %s1377_s23 = sld [smem:[#allocation9 + $0x103]]  ;;  %v1913_v14 = vld [vmem:[#allocation7 + $0x20] sm:$0xff] }
  0x36   :  { %v189_v22 = vmul.f32 %v188_v20, %v1828_v0  ;;  %v191_v23 = vstv %s1372_s4  ;;  %s1846_s24 = sld [smem:[#allocation10 + $0x3]] }
  0x37   :  { %1542 = vtanh.f32 %v170_v18  ;;  %v182_v24 = vadd.f32 %v181_v17, %v178_v19  ;;  %v192_v25 = vmul.f32 %v191_v23, %v1830_v1  ;;  %v195_v26 = vstv %s1373_s20  ;;  %s1379_s25 = sld [smem:[#allocation9 + $0x4]]  ;;  %v1919_v19 = vld [vmem:[#allocation7 + $0x28] sm:$0xff] }
  0x38   :  { %v196_v27 = vmul.f32 %v195_v26, %v1832_v2  ;;  %s1850_s0 = sld [smem:[#allocation9 + $0x84]]  ;;  %v199_v31 = vstv %s1840_s21 }
  0x39   :  { %v185_v28 = vadd.f32 %v184_v21, %v182_v24  ;;  %v193_v29 = vadd.f32 %v192_v25, %v189_v22  ;;  %v203_v30 = vstv %s1375_s6  ;;  %s1381_s26 = sld [smem:[#allocation9 + $0x104]] }
  0x3a   :  { %v204_v32 = vmul.f32 %v203_v30, %v1828_v0  ;;  %v206_v33 = vstv %s1376_s22  ;;  %s1854_s27 = sld [smem:[#allocation10 + $0x4]] }
  0x3b   :  { %v197_v34 = vadd.f32 %v196_v27, %v193_v29  ;;  %v207_v35 = vmul.f32 %v206_v33, %v1830_v1  ;;  %v210_v36 = vstv %s1377_s23  ;;  %s1857_s28 = sld [smem:[#allocation9 + $0x5]]  ;;  %1544 = vtanh.f32 %v185_v28 }
  0x3c   :  { %v211_v37 = vmul.f32 %v210_v36, %v1832_v2  ;;  %s1860_s29 = sld [smem:[#allocation9 + $0x85]]  ;;  %v214_v43 = vstv %s1846_s24 }
  0x3d   :  { %v1862_v38 = vpop.eup %1542  ;;  %v200_v41 = vadd.f32 %v199_v31, %v197_v34  ;;  %v208_v42 = vadd.f32 %v207_v35, %v204_v32  ;;  %v218_v44 = vstv %s1379_s25  ;;  %s1869_s1 = sld [smem:[#allocation9 + $0x105]]  ;;  %v1937_v32 = vld [vmem:[#allocation7 + $0x30] sm:$0xff] }
  0x3e   :  { %v219_v45 = vmul.f32 %v218_v44, %v1828_v0  ;;  %v221_v46 = vstv %s1850_s0  ;;  %s1873_s30 = sld [smem:[#allocation10 + $0x5]]  ;;  %v307_v47 = vperm.slane %v1862_v38, 0  ;;  %v309_v48 = vperm.slane %v1862_v38, 1 }
  0x3f   :  { %1546 = vtanh.f32 %v200_v41  ;;  %v212_v49 = vadd.f32 %v211_v37, %v208_v42  ;;  %v222_v50 = vmul.f32 %v221_v46, %v1830_v1  ;;  %v225_v51 = vstv %s1381_s26  ;;  %s1878_s9 = sld [smem:[#allocation9 + $0x6]] }
  0x40   :  { %v226_v52 = vmul.f32 %v225_v51, %v1832_v2  ;;  %v229_v53 = vstv %s1854_s27  ;;  %s1882_s10 = sld [smem:[#allocation9 + $0x86]]  ;;  %v308_v54 = vmul.f32 %v307_v47, %v1864_v39  ;;  %v310_v55 = vmul.f32 %v309_v48, %v1866_v40 }
  0x41   :  { %v215_v58 = vadd.f32 %v214_v43, %v212_v49  ;;  %v223_v59 = vadd.f32 %v222_v50, %v219_v45  ;;  %v233_v60 = vstv %s1857_s28  ;;  %s1891_s11 = sld [smem:[#allocation9 + $0x106]]  ;;  %v312_v61 = vperm.slane %v1862_v38, 2  ;;  %v1894_v62 = vpop.eup %1544 }
  0x42   :  { %v234_v63 = vmul.f32 %v233_v60, %v1828_v0  ;;  %v236_v3 = vstv %s1860_s29  ;;  %s1898_s2 = sld [smem:[#allocation10 + $0x6]]  ;;  %v311_v4 = vadd.f32 %v310_v55, %v308_v54  ;;  %v315_v5 = vperm.slane %v1862_v38, 3 }
  0x43   :  { %1548 = vtanh.f32 %v215_v58  ;;  %v227_v6 = vadd.f32 %v226_v52, %v223_v59  ;;  %v237_v7 = vmul.f32 %v236_v3, %v1830_v1  ;;  %v240_v8 = vstv %s1869_s1  ;;  %s1903_s14 = sld [smem:[#allocation9 + $0x7]]  ;;  %v1959_v52 = vld [vmem:[#allocation7 + $0x38] sm:$0xff] }
  0x44   :  { %v241_v9 = vmul.f32 %v240_v8, %v1832_v2  ;;  %v244_v10 = vstv %s1873_s30  ;;  %s1907_s12 = sld [smem:[#allocation9 + $0x87]]  ;;  %v313_v11 = vmul.f32 %v312_v61, %v1886_v56  ;;  %v316_v12 = vmul.f32 %v315_v5, %v1888_v57 }
  0x45   :  { %v1911_v13 = vpop.eup %1546  ;;  %v230_v15 = vadd.f32 %v229_v53, %v227_v6  ;;  %v238_v16 = vadd.f32 %v237_v7, %v234_v63  ;;  %v248_v17 = vstv %s1878_s9  ;;  %s1916_s3 = sld [smem:[#allocation9 + $0x107]]  ;;  %v318_v18 = vperm.slane %v1862_v38, 4 }
  0x46   :  { %v249_v20 = vmul.f32 %v248_v17, %v1828_v0  ;;  %v251_v21 = vstv %s1882_s10  ;;  %s1923_s5 = sld [smem:[#allocation10 + $0x7]]  ;;  %v314_v22 = vadd.f32 %v313_v11, %v311_v4  ;;  %v321_v23 = vperm.slane %v1862_v38, 5 }
  0x47   :  { %1550 = vtanh.f32 %v230_v15  ;;  %v242_v24 = vadd.f32 %v241_v9, %v238_v16  ;;  %v252_v25 = vmul.f32 %v251_v21, %v1830_v1  ;;  %v255_v26 = vstv %s1891_s11  ;;  %s1928_s7 = sld [smem:[#allocation9 + $0x8]] }
  0x48   :  { %v256_v27 = vmul.f32 %v255_v26, %v1832_v2  ;;  %v259_v28 = vstv %s1898_s2  ;;  %s1932_s13 = sld [smem:[#allocation9 + $0x88]]  ;;  %v317_v29 = vadd.f32 %v316_v12, %v314_v22  ;;  %v319_v30 = vmul.f32 %v318_v18, %v1913_v14 }
  0x49   :  { %v1935_v31 = vpop.eup %1548  ;;  %v245_v33 = vadd.f32 %v244_v10, %v242_v24  ;;  %v253_v34 = vadd.f32 %v252_v25, %v249_v20  ;;  %v263_v35 = vstv %s1903_s14  ;;  %s1940_s15 = sld [smem:[#allocation9 + $0x108]]  ;;  %v322_v36 = vmul.f32 %v321_v23, %v1919_v19 }
  0x4a   :  { %v264_v37 = vmul.f32 %v263_v35, %v1828_v0  ;;  %v266_v41 = vstv %s1907_s12  ;;  %s1945_s16 = sld [smem:[#allocation10 + $0x8]]  ;;  %v320_v42 = vadd.f32 %v319_v30, %v317_v29  ;;  %v324_v43 = vperm.slane %v1862_v38, 6 }
  0x4b   :  { %1552 = vtanh.f32 %v245_v33  ;;  %v257_v44 = vadd.f32 %v256_v27, %v253_v34  ;;  %v267_v45 = vmul.f32 %v266_v41, %v1830_v1  ;;  %v270_v46 = vstv %s1916_s3  ;;  %s1950_s17 = sld [smem:[#allocation9 + $0x9]] }
  0x4c   :  { %v271_v47 = vmul.f32 %v270_v46, %v1832_v2  ;;  %v274_v48 = vstv %s1923_s5  ;;  %s1954_s18 = sld [smem:[#allocation9 + $0x89]]  ;;  %v323_v49 = vadd.f32 %v322_v36, %v320_v42  ;;  %v325_v50 = vmul.f32 %v324_v43, %v1937_v32 }
  0x4d   :  { %v1957_v51 = vpop.eup %1550  ;;  %v260_v53 = vadd.f32 %v259_v28, %v257_v44  ;;  %v268_v54 = vadd.f32 %v267_v45, %v264_v37  ;;  %v278_v55 = vstv %s1928_s7  ;;  %s1401_s19 = sld [smem:[#allocation9 + $0x109]]  ;;  %v327_v58 = vperm.slane %v1862_v38, 7 }
  0x4e   :  { %v279_v59 = vmul.f32 %v278_v55, %v1828_v0  ;;  %v281_v60 = vstv %s1932_s13  ;;  %s1965_s4 = sld [smem:[#allocation10 + $0x9]]  ;;  %v326_v61 = vadd.f32 %v325_v50, %v323_v49  ;;  %v330_v63 = vperm.slane %v1894_v62, 0 }
  0x4f   :  { %1554 = vtanh.f32 %v260_v53  ;;  %v272_v3 = vadd.f32 %v271_v47, %v268_v54  ;;  %v282_v4 = vmul.f32 %v281_v60, %v1830_v1  ;;  %v285_v5 = vstv %s1940_s15  ;;  %s2025_s20 = sld [smem:[#allocation11]] }
  0x50   :  { %v286_v6 = vmul.f32 %v285_v5, %v1832_v2  ;;  %v289_v7 = vstv %s1945_s16  ;;  %v328_v38 = vmul.f32 %v327_v58, %v1959_v52  ;;  %v331_v8 = vmul.f32 %v330_v63, %v1864_v39  ;;  %s2030_s21 = sld [smem:[#allocation11 + $0x80]] }
  0x51   :  { %v1974_v9 = vpop.eup %1552  ;;  %v275_v10 = vadd.f32 %v274_v48, %v272_v3  ;;  %v283_v11 = vadd.f32 %v282_v4, %v279_v59  ;;  %v293_v12 = vstv %s1950_s17  ;;  %v332_v15 = vperm.slane %v1894_v62, 1  ;;  %s2037_s6 = sld [smem:[#allocation11 + $0x100]] }
  0x52   :  { %v294_v16 = vmul.f32 %v293_v12, %v1828_v0  ;;  %v296_v17 = vstv %s1954_s18  ;;  %v1980_v18 = vadd.f32 %v328_v38, %v326_v61  ;;  %v335_v20 = vperm.slane %v1894_v62, 2  ;;  %s2043_s22 = sld [smem:[#allocation11 + $0x180]] }
  0x53   :  { %1556 = vtanh.f32 %v275_v10  ;;  %v287_v21 = vadd.f32 %v286_v6, %v283_v11  ;;  %v297_v22 = vmul.f32 %v296_v17, %v1830_v1  ;;  %v300_v23 = vstv %s1401_s19  ;;  %s2048_s23 = sld [smem:[#allocation11 + $0x200]] }
  0x54   :  { %v301_v24 = vmul.f32 %v300_v23, %v1832_v2  ;;  %v304_v25 = vstv %s1965_s4  ;;  %v333_v26 = vmul.f32 %v332_v15, %v1866_v40  ;;  %v336_v27 = vmul.f32 %v335_v20, %v1886_v56  ;;  %s2053_s24 = sld [smem:[#allocation11 + $0x280]] }
  0x55   :  { %v1988_v28 = vpop.eup %1554  ;;  %v290_v0 = vadd.f32 %v289_v7, %v287_v21  ;;  %v298_v29 = vadd.f32 %v297_v22, %v294_v16  ;;  %v338_v30 = vperm.slane %v1894_v62, 3  ;;  %v341_v33 = vperm.slane %v1894_v62, 4  ;;  %s2058_s25 = sld [smem:[#allocation11 + $0x300]] }
  0x56   :  { %v334_v34 = vadd.f32 %v333_v26, %v331_v8  ;;  %v344_v35 = vperm.slane %v1894_v62, 5  ;;  %v347_v1 = vperm.slane %v1894_v62, 6  ;;  %v350_v2 = vperm.slane %v1894_v62, 7  ;;  %s2063_s0 = sld [smem:[#allocation11 + $0x380]] }
  0x57   :  { %1558 = vtanh.f32 %v290_v0  ;;  %v302_v36 = vadd.f32 %v301_v24, %v298_v29  ;;  %v339_v37 = vmul.f32 %v338_v30, %v1888_v57  ;;  %v342_v41 = vmul.f32 %v341_v33, %v1913_v14  ;;  %s2068_s26 = sld [smem:[#allocation11 + $0x400]] }
  0x58   :  { %v337_v42 = vadd.f32 %v336_v27, %v334_v34  ;;  %v345_v43 = vmul.f32 %v344_v35, %v1919_v19  ;;  %v348_v44 = vmul.f32 %v347_v1, %v1937_v32  ;;  %v351_v45 = vmul.f32 %v350_v2, %v1959_v52  ;;  %s2072_s27 = sld [smem:[#allocation11 + $0x480]] }
  0x59   :  { %v2000_v46 = vpop.eup %1556  ;;  %v305_v47 = vadd.f32 %v304_v25, %v302_v36  ;;  %v353_v48 = vperm.slane %v1911_v13, 0  ;;  %v355_v62 = vperm.slane %v1911_v13, 1  ;;  %v358_v49 = vperm.slane %v1911_v13, 2  ;;  %s2079_s28 = sld [smem:[#allocation13]] }
  0x5a   :  { %v340_v50 = vadd.f32 %v339_v37, %v337_v42  ;;  %v361_v53 = vperm.slane %v1911_v13, 3  ;;  %v364_v54 = vperm.slane %v1911_v13, 4  ;;  %v367_v55 = vperm.slane %v1911_v13, 5  ;;  %s2083_s29 = sld [smem:[#allocation11 + $0x1]] }
  0x5b   :  { %1560 = vtanh.f32 %v305_v47  ;;  %v354_v58 = vmul.f32 %v353_v48, %v1864_v39  ;;  %v356_v59 = vmul.f32 %v355_v62, %v1866_v40  ;;  %v359_v60 = vmul.f32 %v358_v49, %v1886_v56  ;;  %s2089_s1 = sld [smem:[#allocation11 + $0x81]] }
  0x5c   :  { %v343_v61 = vadd.f32 %v342_v41, %v340_v50  ;;  %v362_v63 = vmul.f32 %v361_v53, %v1888_v57  ;;  %v365_v3 = vmul.f32 %v364_v54, %v1913_v14  ;;  %v368_v4 = vmul.f32 %v367_v55, %v1919_v19  ;;  %s2093_s30 = sld [smem:[#allocation11 + $0x101]] }
  0x5d   :  { %v2014_v5 = vpop.eup %1558  ;;  %v357_v6 = vadd.f32 %v356_v59, %v354_v58  ;;  %v370_v7 = vperm.slane %v1911_v13, 6  ;;  %v373_v38 = vperm.slane %v1911_v13, 7  ;;  %v376_v8 = vperm.slane %v1935_v31, 0  ;;  %s2098_s9 = sld [smem:[#allocation11 + $0x181]] }
  0x5e   :  { %v346_v10 = vadd.f32 %v345_v43, %v343_v61  ;;  %v378_v11 = vperm.slane %v1935_v31, 1  ;;  %v381_v12 = vperm.slane %v1935_v31, 2  ;;  %v384_v15 = vperm.slane %v1935_v31, 3  ;;  %s2104_s10 = sld [smem:[#allocation11 + $0x201]] }
  0x5f   :  { %v360_v16 = vadd.f32 %v359_v60, %v357_v6  ;;  %v371_v17 = vmul.f32 %v370_v7, %v1937_v32  ;;  %v374_v20 = vmul.f32 %v373_v38, %v1959_v52  ;;  %v377_v21 = vmul.f32 %v376_v8, %v1864_v39  ;;  %s2109_s11 = sld [smem:[#allocation11 + $0x281]] }
  0x60   :  { %v349_v22 = vadd.f32 %v348_v44, %v346_v10  ;;  %v379_v13 = vmul.f32 %v378_v11, %v1866_v40  ;;  %v382_v23 = vmul.f32 %v381_v12, %v1886_v56  ;;  %v385_v24 = vmul.f32 %v384_v15, %v1888_v57  ;;  %s2114_s2 = sld [smem:[#allocation11 + $0x301]] }
  0x61   :  { %v2032_v25 = vpop.eup %1560  ;;  %v363_v26 = vadd.f32 %v362_v63, %v360_v16  ;;  %v387_v27 = vperm.slane %v1935_v31, 4  ;;  %v390_v0 = vperm.slane %v1935_v31, 5  ;;  %v393_v29 = vperm.slane %v1935_v31, 6  ;;  %s2119_s14 = sld [smem:[#allocation11 + $0x381]] }
  0x62   :  { %v2039_v30 = vadd.f32 %v351_v45, %v349_v22  ;;  %v380_v33 = vadd.f32 %v379_v13, %v377_v21  ;;  %v396_v34 = vperm.slane %v1935_v31, 7  ;;  %v399_v35 = vperm.slane %v1957_v51, 0  ;;  %s2124_s12 = sld [smem:[#allocation11 + $0x401]] }
  0x63   :  { %v366_v1 = vadd.f32 %v365_v3, %v363_v26  ;;  %v388_v2 = vmul.f32 %v387_v27, %v1913_v14  ;;  %v391_v36 = vmul.f32 %v390_v0, %v1919_v19  ;;  %v394_v37 = vmul.f32 %v393_v29, %v1937_v32  ;;  %s2128_s3 = sld [smem:[#allocation11 + $0x481]] }
  0x64   :  { %v383_v41 = vadd.f32 %v382_v23, %v380_v33  ;;  %v397_v42 = vmul.f32 %v396_v34, %v1959_v52  ;;  %v400_v43 = vmul.f32 %v399_v35, %v1864_v39  ;;  %v401_v31 = vperm.slane %v1957_v51, 1  ;;  %s2135_s5 = sld [smem:[#allocation13 + $0x1]] }
  0x65   :  { %v369_v44 = vadd.f32 %v368_v4, %v366_v1  ;;  %v404_v45 = vperm.slane %v1957_v51, 2  ;;  %v407_v47 = vperm.slane %v1957_v51, 3  ;;  %v410_v48 = vperm.slane %v1957_v51, 4  ;;  %s2139_s7 = sld [smem:[#allocation11 + $0x2]] }
  0x66   :  { %v386_v62 = vadd.f32 %v385_v24, %v383_v41  ;;  %v402_v49 = vmul.f32 %v401_v31, %v1866_v40  ;;  %v413_v50 = vperm.slane %v1957_v51, 5  ;;  %v416_v53 = vperm.slane %v1957_v51, 6  ;;  %s2145_s13 = sld [smem:[#allocation11 + $0x82]] }
  0x67   :  { %v372_v54 = vadd.f32 %v371_v17, %v369_v44  ;;  %v405_v55 = vmul.f32 %v404_v45, %v1886_v56  ;;  %v408_v58 = vmul.f32 %v407_v47, %v1888_v57  ;;  %v411_v59 = vmul.f32 %v410_v48, %v1913_v14  ;;  %s2149_s15 = sld [smem:[#allocation11 + $0x102]] }
  0x68   :  { %v389_v60 = vadd.f32 %v388_v2, %v386_v62  ;;  %v403_v61 = vadd.f32 %v402_v49, %v400_v43  ;;  %v414_v63 = vmul.f32 %v413_v50, %v1919_v19  ;;  %v417_v3 = vmul.f32 %v416_v53, %v1937_v32  ;;  %s2155_s16 = sld [smem:[#allocation11 + $0x182]] }
  0x69   :  { %v2074_v4 = vadd.f32 %v374_v20, %v372_v54  ;;  %v419_v6 = vperm.slane %v1957_v51, 7  ;;  %v422_v7 = vperm.slane %v1974_v9, 0  ;;  %v424_v38 = vperm.slane %v1974_v9, 1  ;;  %s2160_s17 = sld [smem:[#allocation11 + $0x202]] }
  0x6a   :  { %v392_v8 = vadd.f32 %v391_v36, %v389_v60  ;;  %v406_v10 = vadd.f32 %v405_v55, %v403_v61  ;;  %v427_v11 = vperm.slane %v1974_v9, 2  ;;  %v430_v12 = vperm.slane %v1974_v9, 3  ;;  %s2166_s18 = sld [smem:[#allocation11 + $0x282]] }
  0x6b   :  { %v420_v15 = vmul.f32 %v419_v6, %v1959_v52  ;;  %v423_v16 = vmul.f32 %v422_v7, %v1864_v39  ;;  %v425_v51 = vmul.f32 %v424_v38, %v1866_v40  ;;  %v433_v17 = vperm.slane %v1974_v9, 4  ;;  %s2170_s19 = sld [smem:[#allocation11 + $0x302]] }
  0x6c   :  { %v395_v20 = vadd.f32 %v394_v37, %v392_v8  ;;  %v409_v21 = vadd.f32 %v408_v58, %v406_v10  ;;  %v428_v22 = vmul.f32 %v427_v11, %v1886_v56  ;;  %v431_v13 = vmul.f32 %v430_v12, %v1888_v57  ;;  %s2176_s4 = sld [smem:[#allocation11 + $0x382]] }
  0x6d   :  { %v426_v23 = vadd.f32 %v425_v51, %v423_v16  ;;  %v434_v24 = vmul.f32 %v433_v17, %v1913_v14  ;;  %v436_v26 = vperm.slane %v1974_v9, 5  ;;  %v439_v27 = vperm.slane %v1974_v9, 6  ;;  %s2180_s8 = sld [smem:[#allocation11 + $0x402]] }
  0x6e   :  { %v2100_v0 = vadd.f32 %v397_v42, %v395_v20  ;;  %v412_v29 = vadd.f32 %v411_v59, %v409_v21  ;;  %v442_v33 = vperm.slane %v1974_v9, 7  ;;  %v445_v34 = vperm.slane %v1988_v28, 0 }
  0x6f   :  { %v429_v35 = vadd.f32 %v428_v22, %v426_v23  ;;  %v437_v1 = vmul.f32 %v436_v26, %v1919_v19  ;;  %v440_v2 = vmul.f32 %v439_v27, %v1937_v32  ;;  %v447_v36 = vperm.slane %v1988_v28, 1 }
  0x70   :  { %v415_v37 = vadd.f32 %v414_v63, %v412_v29  ;;  %v443_v41 = vmul.f32 %v442_v33, %v1959_v52  ;;  %v446_v42 = vmul.f32 %v445_v34, %v1864_v39  ;;  %v450_v9 = vperm.slane %v1988_v28, 2 }
  0x71   :  { %v432_v43 = vadd.f32 %v431_v13, %v429_v35  ;;  %v448_v31 = vmul.f32 %v447_v36, %v1866_v40  ;;  %v453_v44 = vperm.slane %v1988_v28, 3  ;;  %v456_v45 = vperm.slane %v1988_v28, 4  ;;  %2916 = sst [smem:[#allocation25_spill]] %s2170_s19 }
  0x72   :  { %v418_v47 = vadd.f32 %v417_v3, %v415_v37  ;;  %v451_v48 = vmul.f32 %v450_v9, %v1886_v56  ;;  %v459_v62 = vperm.slane %v1988_v28, 5  ;;  %v462_v49 = vperm.slane %v1988_v28, 6  ;;  %2917 = sst [smem:[#allocation26_spill]] %s2176_s4 }
  0x73   :  { %v435_v50 = vadd.f32 %v434_v24, %v432_v43  ;;  %v449_v53 = vadd.f32 %v448_v31, %v446_v42  ;;  %v454_v54 = vmul.f32 %v453_v44, %v1888_v57  ;;  %v457_v55 = vmul.f32 %v456_v45, %v1913_v14  ;;  %2918 = sst [smem:[#allocation27_spill]] %s2180_s8 }
  0x74   :  { %v2130_v58 = vadd.f32 %v420_v15, %v418_v47  ;;  %v460_v59 = vmul.f32 %v459_v62, %v1919_v19  ;;  %v463_v60 = vmul.f32 %v462_v49, %v1937_v32  ;;  %v465_v61 = vperm.slane %v1988_v28, 7  ;;  %s2185_s19 = sld [smem:[#allocation11 + $0x482]] }
  0x75   :  { %v438_v63 = vadd.f32 %v437_v1, %v435_v50  ;;  %v452_v3 = vadd.f32 %v451_v48, %v449_v53  ;;  %v468_v6 = vperm.slane %v2000_v46, 0  ;;  %v470_v7 = vperm.slane %v2000_v46, 1  ;;  %s2191_s4 = sld [smem:[#allocation13 + $0x2]] }
  0x76   :  { %v466_v38 = vmul.f32 %v465_v61, %v1959_v52  ;;  %v473_v8 = vperm.slane %v2000_v46, 2  ;;  %v476_v10 = vperm.slane %v2000_v46, 3  ;;  %v479_v11 = vperm.slane %v2000_v46, 4  ;;  %s2196_s8 = sld [smem:[#allocation11 + $0x3]] }
  0x77   :  { %v441_v28 = vadd.f32 %v440_v2, %v438_v63  ;;  %v455_v12 = vadd.f32 %v454_v54, %v452_v3  ;;  %v469_v15 = vmul.f32 %v468_v6, %v1864_v39  ;;  %v471_v16 = vmul.f32 %v470_v7, %v1866_v40 }
  0x78   :  { %v474_v51 = vmul.f32 %v473_v8, %v1886_v56  ;;  %v477_v17 = vmul.f32 %v476_v10, %v1888_v57  ;;  %v480_v20 = vmul.f32 %v479_v11, %v1913_v14  ;;  %v482_v21 = vperm.slane %v2000_v46, 5 }
  0x79   :  { %v2157_v22 = vadd.f32 %v443_v41, %v441_v28  ;;  %v458_v13 = vadd.f32 %v457_v55, %v455_v12  ;;  %v472_v23 = vadd.f32 %v471_v16, %v469_v15  ;;  %v485_v24 = vperm.slane %v2000_v46, 6 }
  0x7a   :  { %v483_v26 = vmul.f32 %v482_v21, %v1919_v19  ;;  %v488_v27 = vperm.slane %v2000_v46, 7  ;;  %v491_v29 = vperm.slane %v2014_v5, 0  ;;  %v493_v33 = vperm.slane %v2014_v5, 1  ;;  %2919 = sst [smem:[#allocation28_spill]] %s2185_s19 }
  0x7b   :  { %v461_v34 = vadd.f32 %v460_v59, %v458_v13  ;;  %v475_v35 = vadd.f32 %v474_v51, %v472_v23  ;;  %v486_v1 = vmul.f32 %v485_v24, %v1937_v32  ;;  %v496_v2 = vperm.slane %v2014_v5, 2  ;;  %2920 = sst [smem:[#allocation29_spill]] %s2191_s4 }
  0x7c   :  { %v489_v36 = vmul.f32 %v488_v27, %v1959_v52  ;;  %v492_v37 = vmul.f32 %v491_v29, %v1864_v39  ;;  %v494_v46 = vmul.f32 %v493_v33, %v1866_v40  ;;  %v499_v41 = vperm.slane %v2014_v5, 3  ;;  %2921 = sst [smem:[#allocation30_spill]] %s2196_s8 }
  0x7d   :  { %v464_v42 = vadd.f32 %v463_v60, %v461_v34  ;;  %v478_v9 = vadd.f32 %v477_v17, %v475_v35  ;;  %v497_v43 = vmul.f32 %v496_v2, %v1886_v56  ;;  %v502_v31 = vperm.slane %v2014_v5, 4  ;;  %s2201_s19 = sld [smem:[#allocation11 + $0x83]] }
  0x7e   :  { %v495_v44 = vadd.f32 %v494_v46, %v492_v37  ;;  %v500_v45 = vmul.f32 %v499_v41, %v1888_v57  ;;  %v505_v47 = vperm.slane %v2014_v5, 5  ;;  %v508_v48 = vperm.slane %v2014_v5, 6  ;;  %s2206_s4 = sld [smem:[#allocation11 + $0x103]] }
  0x7f   :  { %v2187_v62 = vadd.f32 %v466_v38, %v464_v42  ;;  %v481_v49 = vadd.f32 %v480_v20, %v478_v9  ;;  %v503_v50 = vmul.f32 %v502_v31, %v1913_v14  ;;  %v511_v53 = vperm.slane %v2014_v5, 7  ;;  %s2211_s8 = sld [smem:[#allocation11 + $0x183]] }
  0x80   :  { %v498_v54 = vadd.f32 %v497_v43, %v495_v44  ;;  %v506_v55 = vmul.f32 %v505_v47, %v1919_v19  ;;  %v509_v59 = vmul.f32 %v508_v48, %v1937_v32  ;;  %v514_v60 = vperm.slane %v2032_v25, 0 }
  0x81   :  { %v484_v61 = vadd.f32 %v483_v26, %v481_v49  ;;  %v512_v63 = vmul.f32 %v511_v53, %v1959_v52  ;;  %v516_v3 = vperm.slane %v2032_v25, 1  ;;  %v519_v6 = vperm.slane %v2032_v25, 2 }
  0x82   :  { %v501_v5 = vadd.f32 %v500_v45, %v498_v54  ;;  %v515_v7 = vmul.f32 %v514_v60, %v1864_v39  ;;  %v522_v38 = vperm.slane %v2032_v25, 3  ;;  %v525_v8 = vperm.slane %v2032_v25, 4 }
  0x83   :  { %2922 = sst [smem:[#allocation31_spill]] %s2201_s19  ;;  %v487_v10 = vadd.f32 %v486_v1, %v484_v61  ;;  %v517_v11 = vmul.f32 %v516_v3, %v1866_v40  ;;  %v520_v28 = vmul.f32 %v519_v6, %v1886_v56  ;;  %v528_v12 = vperm.slane %v2032_v25, 5 }
  0x84   :  { %2923 = sst [smem:[#allocation32_spill]] %s2206_s4  ;;  %v504_v15 = vadd.f32 %v503_v50, %v501_v5  ;;  %v523_v39 = vmul.f32 %v522_v38, %v1888_v57  ;;  %v526_v16 = vmul.f32 %v525_v8, %v1913_v14  ;;  %v531_v51 = vperm.slane %v2032_v25, 6 }
  0x85   :  { %2924 = sst [smem:[#allocation33_spill]] %s2211_s8  ;;  %v2218_v17 = vadd.f32 %v489_v36, %v487_v10  ;;  %v518_v40 = vadd.f32 %v517_v11, %v515_v7  ;;  %v529_v56 = vmul.f32 %v528_v12, %v1919_v19  ;;  %v534_v20 = vperm.slane %v2032_v25, 7 }
  0x86   :  { %s2216_s19 = sld [smem:[#allocation11 + $0x203]]  ;;  %v507_v21 = vadd.f32 %v506_v55, %v504_v15  ;;  %v532_v57 = vmul.f32 %v531_v51, %v1937_v32  ;;  %v538_v14 = vstv %s2025_s20  ;;  %v541_v13 = vstv %s2030_s21 }
  0x87   :  { %s2222_s8 = sld [smem:[#allocation11 + $0x283]]  ;;  %v521_v23 = vadd.f32 %v520_v28, %v518_v40  ;;  %v535_v24 = vmul.f32 %v534_v20, %v1959_v52  ;;  %v539_v26 = vmul.f32 %v538_v14, %v1980_v18  ;;  %v542_v19 = vmul.f32 %v541_v13, %v2039_v30 }
  0x88   :  { %s2227_s4 = sld [smem:[#allocation11 + $0x303]]  ;;  %v510_v25 = vadd.f32 %v509_v59, %v507_v21  ;;  %v545_v27 = vstv %s2037_s6  ;;  %v549_v29 = vstv %s2043_s22  ;;  %v553_v33 = vstv %s2048_s23 }
  0x89   :  { %v524_v32 = vadd.f32 %v523_v39, %v521_v23  ;;  %v543_v34 = vadd.f32 %v542_v19, %v539_v26  ;;  %v546_v52 = vmul.f32 %v545_v27, %v2074_v4  ;;  %v550_v35 = vmul.f32 %v549_v29, %v2100_v0  ;;  %s2241_s20 = sld [smem:[#allocation11 + $0x483]] }
  0x8a   :  { %v2243_v1 = vadd.f32 %v512_v63, %v510_v25  ;;  %v554_v2 = vmul.f32 %v553_v33, %v2130_v58  ;;  %v557_v36 = vstv %s2053_s24  ;;  %v561_v37 = vstv %s2058_s25  ;;  %s2248_s21 = sld [smem:[#allocation13 + $0x3]] }
  0x8b   :  { %v527_v46 = vadd.f32 %v526_v16, %v524_v32  ;;  %v547_v41 = vadd.f32 %v546_v52, %v543_v34  ;;  %v558_v42 = vmul.f32 %v557_v36, %v2157_v22  ;;  %v562_v9 = vmul.f32 %v561_v37, %v2187_v62  ;;  %s2252_s6 = sld [smem:[#allocation11 + $0x4]] }
  0x8c   :  { %2925 = sst [smem:[#allocation34_spill]] %s2216_s19  ;;  %v565_v43 = vstv %s2063_s0  ;;  %v569_v31 = vstv %s2068_s26  ;;  %v573_v44 = vstv %s2072_s27  ;;  %v577_v45 = vstv %s2079_s28 }
  0x8d   :  { %2926 = sst [smem:[#allocation35_spill]] %s2222_s8  ;;  %v530_v47 = vadd.f32 %v529_v56, %v527_v46  ;;  %v551_v48 = vadd.f32 %v550_v35, %v547_v41  ;;  %v566_v49 = vmul.f32 %v565_v43, %v2218_v17  ;;  %v570_v50 = vmul.f32 %v569_v31, %v2243_v1 }
  0x8e   :  { %s2232_s19 = sld [smem:[#allocation11 + $0x383]]  ;;  %v581_v53 = vstv %s2083_s29  ;;  %v584_v54 = vstv %s2089_s1  ;;  %v588_v55 = vstv %s2093_s30  ;;  %v592_v59 = vstv %s2098_s9 }
  0x8f   :  { %s2237_s8 = sld [smem:[#allocation11 + $0x403]]  ;;  %v533_v60 = vadd.f32 %v532_v57, %v530_v47  ;;  %v555_v61 = vadd.f32 %v554_v2, %v551_v48  ;;  %v582_v63 = vmul.f32 %v581_v53, %v1980_v18  ;;  %v585_v3 = vmul.f32 %v584_v54, %v2039_v30 }
  0x90   :  { %s2258_s22 = sld [smem:[#allocation11 + $0x84]]  ;;  %v589_v6 = vmul.f32 %v588_v55, %v2074_v4  ;;  %v593_v5 = vmul.f32 %v592_v59, %v2100_v0  ;;  %v596_v7 = vstv %s2104_s10  ;;  %v600_v38 = vstv %s2109_s11 }
  0x91   :  { %s2262_s23 = sld [smem:[#allocation11 + $0x104]]  ;;  %v2280_v8 = vadd.f32 %v535_v24, %v533_v60  ;;  %v559_v10 = vadd.f32 %v558_v42, %v555_v61  ;;  %v586_v11 = vadd.f32 %v585_v3, %v582_v63  ;;  %v597_v28 = vmul.f32 %v596_v7, %v2130_v58 }
  0x92   :  { %s2268_s24 = sld [smem:[#allocation11 + $0x184]]  ;;  %v601_v12 = vmul.f32 %v600_v38, %v2157_v22  ;;  %v604_v15 = vstv %s2114_s2  ;;  %v608_v39 = vstv %s2119_s14  ;;  %v612_v16 = vstv %s2124_s12 }
  0x93   :  { %s2272_s25 = sld [smem:[#allocation11 + $0x204]]  ;;  %v563_v51 = vadd.f32 %v562_v9, %v559_v10  ;;  %v574_v40 = vmul.f32 %v573_v44, %v2280_v8  ;;  %v590_v56 = vadd.f32 %v589_v6, %v586_v11  ;;  %v605_v20 = vmul.f32 %v604_v15, %v2187_v62 }
  0x94   :  { %s2278_s0 = sld [smem:[#allocation11 + $0x284]]  ;;  %v609_v21 = vmul.f32 %v608_v39, %v2218_v17  ;;  %v613_v57 = vmul.f32 %v612_v16, %v2243_v1  ;;  %v616_v14 = vstv %s2128_s3  ;;  %v620_v13 = vstv %s2135_s5 }
  0x95   :  { %s2283_s26 = sld [smem:[#allocation11 + $0x304]]  ;;  %v567_v23 = vadd.f32 %v566_v49, %v563_v51  ;;  %v594_v24 = vadd.f32 %v593_v5, %v590_v56  ;;  %v617_v26 = vmul.f32 %v616_v14, %v2280_v8  ;;  %v624_v19 = vstv %s2139_s7 }
  0x96   :  { %s2289_s27 = sld [smem:[#allocation11 + $0x384]]  ;;  %v625_v25 = vmul.f32 %v624_v19, %v1980_v18  ;;  %v627_v27 = vstv %s2145_s13  ;;  %v631_v29 = vstv %s2149_s15  ;;  %v635_v33 = vstv %s2155_s16 }
  0x97   :  { %s2293_s29 = sld [smem:[#allocation11 + $0x404]]  ;;  %v571_v32 = vadd.f32 %v570_v50, %v567_v23  ;;  %v598_v34 = vadd.f32 %v597_v28, %v594_v24  ;;  %v628_v52 = vmul.f32 %v627_v27, %v2039_v30  ;;  %v632_v35 = vmul.f32 %v631_v29, %v2074_v4 }
  0x98   :  { %s2299_s1 = sld [smem:[#allocation11 + $0x484]]  ;;  %v636_v2 = vmul.f32 %v635_v33, %v2100_v0  ;;  %v639_v36 = vstv %s2160_s17  ;;  %v643_v37 = vstv %s2166_s18  ;;  %v690_v51 = vstv %s2227_s4 }
  0x99   :  { %s2927_s30 = sld [smem:[#allocation25_spill]]  ;;  %v575_v41 = vadd.f32 %v574_v40, %v571_v32  ;;  %v602_v42 = vadd.f32 %v601_v12, %v598_v34  ;;  %v629_v9 = vadd.f32 %v628_v52, %v625_v25  ;;  %v640_v43 = vmul.f32 %v639_v36, %v2130_v58 }
  0x9a   :  { %s2303_s9 = sld [smem:[#allocation13 + $0x4]]  ;;  %v644_v31 = vmul.f32 %v643_v37, %v2157_v22  ;;  %v691_v14 = vmul.f32 %v690_v51, %v2187_v62  ;;  %v694_v23 = vstv %s2232_s19  ;;  %v698_v24 = vstv %s2237_s8 }
  0x9b   :  { %s2309_s10 = sld [smem:[#allocation11 + $0x5]]  ;;  %v578_v49 = vadd.f32 %v577_v45, %v575_v41  ;;  %v606_v50 = vadd.f32 %v605_v20, %v602_v42  ;;  %v633_v53 = vadd.f32 %v632_v35, %v629_v9  ;;  %v695_v29 = vmul.f32 %v694_v23, %v2218_v17 }
  0x9c   :  { %s2928_s11 = sld [smem:[#allocation26_spill]]  ;;  %v699_v33 = vmul.f32 %v698_v24, %v2243_v1  ;;  %v702_v32 = vstv %s2241_s20  ;;  %v706_v34 = vstv %s2248_s21  ;;  %v710_v52 = vstv %s2252_s6 }
  0x9d   :  { %s2929_s2 = sld [smem:[#allocation27_spill]]  ;;  %1562 = vtanh.f32 %v578_v49  ;;  %v610_v63 = vadd.f32 %v609_v21, %v606_v50  ;;  %v637_v45 = vadd.f32 %v636_v2, %v633_v53  ;;  %v703_v2 = vmul.f32 %v702_v32, %v2280_v8 }
  0x9e   :  { %s2313_s14 = sld [smem:[#allocation11 + $0x85]]  ;;  %v711_v36 = vmul.f32 %v710_v52, %v1980_v18  ;;  %v713_v37 = vstv %s2258_s22  ;;  %v721_v41 = vstv %s2268_s24  ;;  %v733_v49 = vstv %s2283_s26 }
  0x9f   :  { %v647_v46 = vstv %s2927_s30  ;;  %s2319_s12 = sld [smem:[#allocation11 + $0x105]]  ;;  %v614_v10 = vadd.f32 %v613_v57, %v610_v63  ;;  %v641_v11 = vadd.f32 %v640_v43, %v637_v45  ;;  %v714_v43 = vmul.f32 %v713_v37, %v2039_v30 }
  0xa0   :  { %s2931_s3 = sld [smem:[#allocation28_spill]]  ;;  %v648_v44 = vmul.f32 %v647_v46, %v2187_v62  ;;  %v717_v46 = vstv %s2262_s23  ;;  %v737_v63 = vstv %s2289_s27  ;;  %v741_v45 = vstv %s2293_s29 }
  0xa1   :  { %s2932_s7 = sld [smem:[#allocation29_spill]]  ;;  %v618_v40 = vadd.f32 %v617_v26, %v614_v10  ;;  %v645_v56 = vadd.f32 %v644_v31, %v641_v11  ;;  %v718_v31 = vmul.f32 %v717_v46, %v2074_v4  ;;  %v742_v10 = vmul.f32 %v741_v45, %v2243_v1 }
  0xa2   :  { %s2933_s13 = sld [smem:[#allocation30_spill]]  ;;  %v651_v47 = vstv %s2928_s11  ;;  %v745_v11 = vstv %s2299_s1 }
  0xa3   :  { %s2322_s15 = sld [smem:[#allocation11 + $0x185]]  ;;  %v655_v48 = vstv %s2929_s2  ;;  %v652_v54 = vmul.f32 %v651_v47, %v2218_v17  ;;  %v2369_v19 = vpop.eup %1562  ;;  %v621_v26 = vadd.f32 %v620_v13, %v618_v40  ;;  %v649_v25 = vadd.f32 %v648_v44, %v645_v56 }
  0xa4   :  { %s2328_s16 = sld [smem:[#allocation11 + $0x205]]  ;;  %v656_v55 = vmul.f32 %v655_v48, %v2243_v1  ;;  %v722_v44 = vmul.f32 %v721_v41, %v2100_v0  ;;  %v725_v47 = vstv %s2272_s25  ;;  %v729_v48 = vstv %s2278_s0 }
  0xa5   :  { %2930 = sst [smem:[#allocation25_spill]] %s2319_s12  ;;  %1564 = vtanh.f32 %v621_v26  ;;  %v653_v35 = vadd.f32 %v652_v54, %v649_v25  ;;  %v715_v54 = vadd.f32 %v714_v43, %v711_v36  ;;  %v756_v51 = vstv %s2313_s14 }
  0xa6   :  { %s2935_s17 = sld [smem:[#allocation31_spill]]  ;;  %v659_v59 = vstv %s2931_s3 }
  0xa7   :  { %s2936_s18 = sld [smem:[#allocation32_spill]]  ;;  %v663_v60 = vstv %s2932_s7  ;;  %v660_v3 = vmul.f32 %v659_v59, %v2280_v8  ;;  %v657_v42 = vadd.f32 %v656_v55, %v653_v35  ;;  %v726_v55 = vmul.f32 %v725_v47, %v2130_v58 }
  0xa8   :  { %s2937_s30 = sld [smem:[#allocation33_spill]]  ;;  %v667_v61 = vstv %s2933_s13  ;;  %v730_v59 = vmul.f32 %v729_v48, %v2157_v22 }
  0xa9   :  { %s2333_s12 = sld [smem:[#allocation11 + $0x285]]  ;;  %v668_v6 = vmul.f32 %v667_v61, %v1980_v18  ;;  %v661_v50 = vadd.f32 %v660_v3, %v657_v42  ;;  %v734_v61 = vmul.f32 %v733_v49, %v2187_v62  ;;  %v764_v56 = vstv %s2322_s15 }
  0xaa   :  { %2934 = sst [smem:[#allocation26_spill]] %s2328_s16  ;;  %v765_v23 = vmul.f32 %v764_v56, %v2100_v0 }
  0xab   :  { %s2339_s11 = sld [smem:[#allocation11 + $0x305]]  ;;  %v664_v3 = vadd.f32 %v663_v60, %v661_v50 }
  0xac   :  { %s2938_s2 = sld [smem:[#allocation34_spill]]  ;;  %v670_v5 = vstv %s2935_s17 }
  0xad   :  { %s2939_s28 = sld [smem:[#allocation35_spill]]  ;;  %v674_v7 = vstv %s2936_s18  ;;  %v671_v28 = vmul.f32 %v670_v5, %v2039_v30  ;;  %1566 = vtanh.f32 %v664_v3 }
  0xae   :  { %s2342_s16 = sld [smem:[#allocation11 + $0x385]]  ;;  %v678_v38 = vstv %s2937_s30  ;;  %v675_v12 = vmul.f32 %v674_v7, %v2074_v4  ;;  %v719_v7 = vadd.f32 %v718_v31, %v715_v54 }
  0xaf   :  { %s2348_s3 = sld [smem:[#allocation11 + $0x405]]  ;;  %v679_v15 = vmul.f32 %v678_v38, %v2100_v0  ;;  %v672_v20 = vadd.f32 %v671_v28, %v668_v6  ;;  %v2410_v6 = vpop.eup %1564  ;;  %v738_v38 = vmul.f32 %v737_v63, %v2218_v17  ;;  %v749_v28 = vstv %s2303_s9 }
  0xb0   :  { %s2352_s13 = sld [smem:[#allocation11 + $0x485]]  ;;  %v723_v60 = vadd.f32 %v722_v44, %v719_v7  ;;  %v772_v26 = vstv %s2333_s12 }
  0xb1   :  { %s2358_s17 = sld [smem:[#allocation13 + $0x5]]  ;;  %v676_v27 = vadd.f32 %v675_v12, %v672_v20  ;;  %v753_v12 = vstv %s2309_s10  ;;  %v776_v25 = vstv %s2339_s11  ;;  %v773_v52 = vmul.f32 %v772_v26, %v2157_v22 }
  0xb2   :  { %v682_v39 = vstv %s2938_s2  ;;  %s2361_s18 = sld [smem:[#allocation11 + $0x6]]  ;;  %v777_v35 = vmul.f32 %v776_v25, %v2187_v62 }
  0xb3   :  { %v686_v16 = vstv %s2939_s28  ;;  %v683_v21 = vmul.f32 %v682_v39, %v2130_v58  ;;  %s2367_s30 = sld [smem:[#allocation11 + $0x86]]  ;;  %v680_v13 = vadd.f32 %v679_v15, %v676_v27  ;;  %v746_v39 = vmul.f32 %v745_v11, %v2280_v8  ;;  %v2451_v37 = vpop.eup %1566 }
  0xb4   :  { %v687_v57 = vmul.f32 %v686_v16, %v2157_v22  ;;  %s2374_s4 = sld [smem:[#allocation11 + $0x106]]  ;;  %v754_v16 = vmul.f32 %v753_v12, %v1980_v18 }
  0xb5   :  { %s2380_s8 = sld [smem:[#allocation11 + $0x186]]  ;;  %v684_v9 = vadd.f32 %v683_v21, %v680_v13  ;;  %v727_v21 = vadd.f32 %v726_v55, %v723_v60  ;;  %v780_v13 = vstv %s2342_s16  ;;  %v784_v36 = vstv %s2348_s3 }
  0xb6   :  { %s2383_s5 = sld [smem:[#allocation11 + $0x206]]  ;;  %v781_v42 = vmul.f32 %v780_v13, %v2218_v17  ;;  %v788_v43 = vstv %s2352_s13 }
  0xb7   :  { %s2389_s19 = sld [smem:[#allocation11 + $0x286]]  ;;  %v688_v53 = vadd.f32 %v687_v57, %v684_v9  ;;  %v757_v57 = vmul.f32 %v756_v51, %v2039_v30  ;;  %v785_v9 = vmul.f32 %v784_v36, %v2243_v1  ;;  %v792_v31 = vstv %s2358_s17 }
  0xb8   :  { %s2393_s20 = sld [smem:[#allocation11 + $0x306]]  ;;  %v796_v44 = vstv %s2361_s18  ;;  %v789_v48 = vmul.f32 %v788_v43, %v2280_v8 }
  0xb9   :  { %s2399_s6 = sld [smem:[#allocation11 + $0x386]]  ;;  %v692_v5 = vadd.f32 %v691_v14, %v688_v53  ;;  %v797_v49 = vmul.f32 %v796_v44, %v1980_v18  ;;  %v799_v50 = vstv %s2367_s30 }
  0xba   :  { %s2402_s22 = sld [smem:[#allocation11 + $0x406]]  ;;  %v803_v53 = vstv %s2374_s4 }
  0xbb   :  { %s2408_s23 = sld [smem:[#allocation11 + $0x486]]  ;;  %v696_v15 = vadd.f32 %v695_v29, %v692_v5  ;;  %v731_v29 = vadd.f32 %v730_v59, %v727_v21  ;;  %v807_v54 = vstv %s2380_s8  ;;  %v804_v63 = vmul.f32 %v803_v53, %v2074_v4 }
  0xbc   :  { %s2940_s24 = sld [smem:[#allocation25_spill]]  ;;  %v808_v45 = vmul.f32 %v807_v54, %v2100_v0  ;;  %v811_v3 = vstv %s2383_s5 }
  0xbd   :  { %s2415_s25 = sld [smem:[#allocation13 + $0x6]]  ;;  %v700_v20 = vadd.f32 %v699_v33, %v696_v15  ;;  %v758_v33 = vadd.f32 %v757_v57, %v754_v16  ;;  %v735_v46 = vadd.f32 %v734_v61, %v731_v29  ;;  %v800_v61 = vmul.f32 %v799_v50, %v2039_v30 }
  0xbe   :  { %s2421_s0 = sld [smem:[#allocation11 + $0x7]]  ;;  %v815_v5 = vstv %s2389_s19  ;;  %v819_v7 = vstv %s2393_s20  ;;  %v812_v12 = vmul.f32 %v811_v3, %v2130_v58 }
  0xbf   :  { %s2941_s26 = sld [smem:[#allocation26_spill]]  ;;  %v704_v27 = vadd.f32 %v703_v2, %v700_v20  ;;  %v739_v47 = vadd.f32 %v738_v38, %v735_v46  ;;  %v816_v15 = vmul.f32 %v815_v5, %v2157_v22  ;;  %v820_v60 = vmul.f32 %v819_v7, %v2187_v62 }
  0xc0   :  { %s2424_s27 = sld [smem:[#allocation11 + $0x87]]  ;;  %v823_v16 = vstv %s2399_s6  ;;  %v827_v51 = vstv %s2402_s22 }
  0xc1   :  { %s2430_s29 = sld [smem:[#allocation11 + $0x107]]  ;;  %v707_v2 = vadd.f32 %v706_v34, %v704_v27  ;;  %v743_v55 = vadd.f32 %v742_v10, %v739_v47  ;;  %v801_v10 = vadd.f32 %v800_v61, %v797_v49  ;;  %v824_v21 = vmul.f32 %v823_v16, %v2218_v17 }
  0xc2   :  { %v760_v40 = vstv %s2940_s24  ;;  %s2434_s1 = sld [smem:[#allocation11 + $0x187]]  ;;  %v828_v57 = vmul.f32 %v827_v51, %v2243_v1 }
  0xc3   :  { %v761_v14 = vmul.f32 %v760_v40, %v2074_v4  ;;  %s2440_s10 = sld [smem:[#allocation11 + $0x207]]  ;;  %1568 = vtanh.f32 %v707_v2  ;;  %v747_v38 = vadd.f32 %v746_v39, %v743_v55  ;;  %v805_v20 = vadd.f32 %v804_v63, %v801_v10 }
  0xc4   :  { %s2443_s14 = sld [smem:[#allocation11 + $0x287]] }
  0xc5   :  { %v768_v24 = vstv %s2941_s26  ;;  %s2449_s12 = sld [smem:[#allocation11 + $0x307]]  ;;  %v762_v41 = vadd.f32 %v761_v14, %v758_v33  ;;  %v750_v39 = vadd.f32 %v749_v28, %v747_v38  ;;  %v831_v14 = vstv %s2408_s23 }
  0xc6   :  { %v769_v32 = vmul.f32 %v768_v24, %v2130_v58  ;;  %s2456_s7 = sld [smem:[#allocation11 + $0x387]]  ;;  %v839_v24 = vstv %s2421_s0  ;;  %v809_v28 = vadd.f32 %v808_v45, %v805_v20  ;;  %v832_v25 = vmul.f32 %v831_v14, %v2280_v8 }
  0xc7   :  { %s2462_s15 = sld [smem:[#allocation11 + $0x407]]  ;;  %v766_v34 = vadd.f32 %v765_v23, %v762_v41  ;;  %v835_v23 = vstv %s2415_s25  ;;  %1570 = vtanh.f32 %v750_v39  ;;  %v840_v27 = vmul.f32 %v839_v24, %v1980_v18 }
  0xc8   :  { %s2465_s21 = sld [smem:[#allocation11 + $0x487]]  ;;  %v842_v29 = vstv %s2424_s27  ;;  %v846_v33 = vstv %s2430_s29 }
  0xc9   :  { %s2471_s16 = sld [smem:[#allocation13 + $0x7]]  ;;  %v770_v59 = vadd.f32 %v769_v32, %v766_v34  ;;  %v2492_v40 = vpop.eup %1568  ;;  %v850_v32 = vstv %s2434_s1  ;;  %v843_v13 = vmul.f32 %v842_v29, %v2039_v30  ;;  %v847_v36 = vmul.f32 %v846_v33, %v2074_v4 }
  0xca   :  { %s2475_s11 = sld [smem:[#allocation11 + $0x8]]  ;;  %v851_v2 = vmul.f32 %v850_v32, %v2100_v0  ;;  %v854_v46 = vstv %s2440_s10  ;;  %v858_v41 = vstv %s2443_s14 }
  0xcb   :  { %s2481_s2 = sld [smem:[#allocation11 + $0x88]]  ;;  %v774_v11 = vadd.f32 %v773_v52, %v770_v59  ;;  %v855_v47 = vmul.f32 %v854_v46, %v2130_v58  ;;  %v859_v34 = vmul.f32 %v858_v41, %v2157_v22 }
  0xcc   :  { %s2484_s28 = sld [smem:[#allocation11 + $0x108]]  ;;  %v866_v50 = vstv %s2456_s7 }
  0xcd   :  { %s2490_s3 = sld [smem:[#allocation11 + $0x188]]  ;;  %v778_v56 = vadd.f32 %v777_v35, %v774_v11  ;;  %v813_v35 = vadd.f32 %v812_v12, %v809_v28  ;;  %v870_v53 = vstv %s2462_s15  ;;  %v2533_v54 = vpop.eup %1570  ;;  %v867_v61 = vmul.f32 %v866_v50, %v2218_v17 }
  0xce   :  { %s2497_s13 = sld [smem:[#allocation11 + $0x208]]  ;;  %v871_v63 = vmul.f32 %v870_v53, %v2243_v1  ;;  %v874_v45 = vstv %s2465_s21 }
  0xcf   :  { %s2503_s18 = sld [smem:[#allocation11 + $0x288]]  ;;  %v782_v26 = vadd.f32 %v781_v42, %v778_v56  ;;  %v862_v42 = vstv %s2449_s12  ;;  %v817_v44 = vadd.f32 %v816_v15, %v813_v35  ;;  %v878_v3 = vstv %s2471_s16 }
  0xd0   :  { %s2506_s9 = sld [smem:[#allocation11 + $0x308]]  ;;  %v863_v49 = vmul.f32 %v862_v42, %v2187_v62  ;;  %v882_v5 = vstv %s2475_s11  ;;  %v875_v38 = vmul.f32 %v874_v45, %v2280_v8 }
  0xd1   :  { %s2512_s30 = sld [smem:[#allocation11 + $0x388]]  ;;  %v786_v52 = vadd.f32 %v785_v9, %v782_v26  ;;  %v844_v9 = vadd.f32 %v843_v13, %v840_v27  ;;  %v821_v55 = vadd.f32 %v820_v60, %v817_v44  ;;  %v883_v11 = vmul.f32 %v882_v5, %v1980_v18 }
  0xd2   :  { %s2516_s4 = sld [smem:[#allocation11 + $0x408]]  ;;  %v885_v10 = vstv %s2481_s2  ;;  %v889_v12 = vstv %s2484_s28 }
  0xd3   :  { %s2522_s8 = sld [smem:[#allocation11 + $0x488]]  ;;  %v790_v43 = vadd.f32 %v789_v48, %v786_v52  ;;  %v848_v59 = vadd.f32 %v847_v36, %v844_v9  ;;  %v825_v7 = vadd.f32 %v824_v21, %v821_v55  ;;  %v893_v15 = vstv %s2490_s3 }
  0xd4   :  { %s2525_s5 = sld [smem:[#allocation13 + $0x8]]  ;;  %v886_v51 = vmul.f32 %v885_v10, %v2039_v30  ;;  %v890_v39 = vmul.f32 %v889_v12, %v2074_v4  ;;  %v894_v56 = vmul.f32 %v893_v15, %v2100_v0  ;;  %v897_v20 = vstv %s2497_s13 }
  0xd5   :  { %s2531_s19 = sld [smem:[#allocation11 + $0x9]]  ;;  %v793_v48 = vadd.f32 %v792_v31, %v790_v43  ;;  %v852_v31 = vadd.f32 %v851_v2, %v848_v59  ;;  %v829_v60 = vadd.f32 %v828_v57, %v825_v7  ;;  %v901_v21 = vstv %s2503_s18 }
  0xd6   :  { %s2538_s20 = sld [smem:[#allocation11 + $0x89]]  ;;  %v905_v14 = vstv %s2506_s9  ;;  %v887_v57 = vadd.f32 %v886_v51, %v883_v11  ;;  %v898_v28 = vmul.f32 %v897_v20, %v2130_v58  ;;  %v902_v27 = vmul.f32 %v901_v21, %v2157_v22  ;;  %v2613_v20 = vld [vmem:[#allocation7] sm:$0xff] }
  0xd7   :  { %s2544_s6 = sld [smem:[#allocation11 + $0x109]]  ;;  %1572 = vtanh.f32 %v793_v48  ;;  %v856_v16 = vadd.f32 %v855_v47, %v852_v31  ;;  %v833_v24 = vadd.f32 %v832_v25, %v829_v60  ;;  %v906_v29 = vmul.f32 %v905_v14, %v2187_v62 }
  0xd8   :  { %s2547_s17 = sld [smem:[#allocation11 + $0x189]]  ;;  %v909_v33 = vstv %s2512_s30  ;;  %v913_v32 = vstv %s2516_s4  ;;  %v891_v13 = vadd.f32 %v890_v39, %v887_v57  ;;  %v972_v14 = vperm.slane %v2369_v19, 2 }
  0xd9   :  { %s2553_s22 = sld [smem:[#allocation11 + $0x209]]  ;;  %v860_v26 = vadd.f32 %v859_v34, %v856_v16  ;;  %v836_v25 = vadd.f32 %v835_v23, %v833_v24  ;;  %v910_v36 = vmul.f32 %v909_v33, %v2218_v17  ;;  %v914_v2 = vmul.f32 %v913_v32, %v2243_v1  ;;  %v2627_v33 = vld [vmem:[#allocation7 + $0x18] sm:$0xff] }
  0xda   :  { %s2557_s23 = sld [smem:[#allocation11 + $0x289]]  ;;  %v917_v46 = vstv %s2522_s8  ;;  %v921_v41 = vstv %s2525_s5  ;;  %v895_v43 = vadd.f32 %v894_v56, %v891_v13  ;;  %v981_v57 = vperm.slane %v2369_v19, 5 }
  0xdb   :  { %s2563_s24 = sld [smem:[#allocation11 + $0x309]]  ;;  %v864_v35 = vadd.f32 %v863_v49, %v860_v26  ;;  %v925_v42 = vstv %s2531_s19  ;;  %1574 = vtanh.f32 %v836_v25  ;;  %v918_v44 = vmul.f32 %v917_v46, %v2280_v8  ;;  %v2634_v46 = vld [vmem:[#allocation7 + $0x28] sm:$0xff] }
  0xdc   :  { %s2566_s0 = sld [smem:[#allocation11 + $0x389]]  ;;  %v926_v9 = vmul.f32 %v925_v42, %v1980_v18  ;;  %v928_v47 = vstv %s2538_s20  ;;  %v899_v53 = vadd.f32 %v898_v28, %v895_v43  ;;  %v978_v26 = vperm.slane %v2369_v19, 4  ;;  %v2621_v28 = vld [vmem:[#allocation7 + $0x8] sm:$0xff]  ;;  %v2637_v43 = vld [vmem:[#allocation7 + $0x30] sm:$0xff] }
  0xdd   :  { %s2572_s26 = sld [smem:[#allocation11 + $0x409]]  ;;  %v2574_v52 = vpop.eup %1572  ;;  %v868_v23 = vadd.f32 %v867_v61, %v864_v35  ;;  %v932_v34 = vstv %s2544_s6  ;;  %v929_v48 = vmul.f32 %v928_v47, %v2039_v30  ;;  %v984_v25 = vperm.slane %v2369_v19, 6  ;;  %s1758_s6 = smov [#allocation17]  }
  0xde   :  { %s2579_s27 = sld [smem:[#allocation11 + $0x489]]  ;;  %v936_v49 = vstv %s2547_s17  ;;  %v933_v55 = vmul.f32 %v932_v34, %v2074_v4  ;;  %v903_v7 = vadd.f32 %v902_v27, %v899_v53  ;;  %v2624_v27 = vld [vmem:[#allocation7 + $0x10] sm:$0xff]  ;;  %v982_v42 = vmul.f32 %v2634_v46, %v981_v57  ;;  %s1348_s17 = sshll.u32 %s1758_s6, 4  ;;  %s1349_s17 = int_to_ptr.vmem [resolvable:$true] %s1348_s17 }
  0xdf   :  { %s2585_s29 = sld [smem:[#allocation13 + $0x9]]  ;;  %v872_v50 = vadd.f32 %v871_v63, %v868_v23  ;;  %v937_v59 = vmul.f32 %v936_v49, %v2100_v0  ;;  %v940_v61 = vstv %s2553_s22  ;;  %v930_v31 = vadd.f32 %v929_v48, %v926_v9 }
  0xe0   :  { %v944_v45 = vstv %s2557_s23  ;;  %v941_v11 = vmul.f32 %v940_v61, %v2130_v58  ;;  %v907_v0 = vadd.f32 %v906_v29, %v903_v7  ;;  %v967_v58 = vperm.slane %v2369_v19, 0  ;;  %s2825_s25 = sld [smem:[#allocation14]] }
  0xe1   :  { %v948_v5 = vstv %s2563_s24  ;;  %v876_v18 = vadd.f32 %v875_v38, %v872_v50  ;;  %v945_v63 = vmul.f32 %v944_v45, %v2157_v22  ;;  %v2603_v15 = vpop.eup %1574  ;;  %v934_v60 = vadd.f32 %v933_v55, %v930_v31  ;;  %s2828_s1 = sld [smem:[#allocation14 + $0x80]] }
  0xe2   :  { %v949_v10 = vmul.f32 %v948_v5, %v2187_v62  ;;  %v952_v12 = vstv %s2566_s0  ;;  %v911_v22 = vadd.f32 %v910_v36, %v907_v0  ;;  %v968_v21 = vmul.f32 %v2613_v20, %v967_v58  ;;  %v2631_v36 = vld [vmem:[#allocation7 + $0x20] sm:$0xff]  ;;  %s2830_s10 = sld [smem:[#allocation14 + $0x100]] }
  0xe3   :  { %v956_v30 = vstv %s2572_s26  ;;  %v879_v4 = vadd.f32 %v878_v3, %v876_v18  ;;  %v953_v16 = vmul.f32 %v952_v12, %v2218_v17  ;;  %v938_v56 = vadd.f32 %v937_v59, %v934_v60  ;;  %v2648_v59 = vld [vmem:[#allocation7 + $0x38] sm:$0xff]  ;;  %s2833_s14 = sld [smem:[#allocation14 + $0x180]] }
  0xe4   :  { %v957_v38 = vmul.f32 %v956_v30, %v2243_v1  ;;  %v960_v51 = vstv %s2579_s27  ;;  %v969_v3 = vperm.slane %v2369_v19, 1  ;;  %v975_v17 = vperm.slane %v2369_v19, 3  ;;  %s2835_s12 = sld [smem:[#allocation14 + $0x200]] }
  0xe5   :  { %v964_v39 = vstv %s2585_s29  ;;  %1576 = vtanh.f32 %v879_v4  ;;  %v961_v62 = vmul.f32 %v960_v51, %v2280_v8  ;;  %v915_v1 = vadd.f32 %v914_v2, %v911_v22  ;;  %s2838_s7 = sld [smem:[#allocation14 + $0x280]] }
  0xe6   :  { %v942_v24 = vadd.f32 %v941_v11, %v938_v56  ;;  %v970_v8 = vmul.f32 %v2621_v28, %v969_v3  ;;  %v973_v29 = vmul.f32 %v2624_v27, %v972_v14  ;;  %v976_v32 = vmul.f32 %v2627_v33, %v975_v17  ;;  %s2840_s15 = sld [smem:[#allocation14 + $0x300]] }
  0xe7   :  { %v919_v35 = vadd.f32 %v918_v44, %v915_v1  ;;  %v979_v2 = vmul.f32 %v2631_v36, %v978_v26  ;;  %v985_v9 = vmul.f32 %v2637_v43, %v984_v25  ;;  %v987_v47 = vperm.slane %v2369_v19, 7  ;;  %s2842_s21 = sld [smem:[#allocation14 + $0x380]] }
  0xe8   :  { %v946_v13 = vadd.f32 %v945_v63, %v942_v24  ;;  %v971_v23 = vadd.f32 %v970_v8, %v968_v21  ;;  %v990_v34 = vperm.slane %v2410_v6, 0  ;;  %v992_v53 = vperm.slane %v2410_v6, 1  ;;  %s2849_s16 = sld [smem:[#allocation14 + $0x400]] }
  0xe9   :  { %v922_v44 = vadd.f32 %v921_v41, %v919_v35  ;;  %v995_v48 = vperm.slane %v2410_v6, 2  ;;  %v988_v61 = vmul.f32 %v2648_v59, %v987_v47  ;;  %v998_v19 = vperm.slane %v2410_v6, 3  ;;  %s2853_s11 = sld [smem:[#allocation14 + $0x480]] }
  0xea   :  { %v950_v50 = vadd.f32 %v949_v10, %v946_v13  ;;  %v974_v55 = vadd.f32 %v973_v29, %v971_v23  ;;  %v991_v45 = vmul.f32 %v2613_v20, %v990_v34  ;;  %v993_v18 = vmul.f32 %v2621_v28, %v992_v53  ;;  %s2859_s2 = sld [smem:[#allocation14 + $0x1]] }
  0xeb   :  { %v2642_v49 = vpop.eup %1576  ;;  %1578 = vtanh.f32 %v922_v44  ;;  %v996_v41 = vmul.f32 %v2624_v27, %v995_v48  ;;  %v999_v31 = vmul.f32 %v2627_v33, %v998_v19  ;;  %v1001_v11 = vperm.slane %v2410_v6, 4  ;;  %s2861_s28 = sld [smem:[#allocation14 + $0x81]] }
  0xec   :  { %v954_v5 = vadd.f32 %v953_v16, %v950_v50  ;;  %v977_v7 = vadd.f32 %v976_v32, %v974_v55  ;;  %v1004_v63 = vperm.slane %v2410_v6, 5  ;;  %v994_v12 = vadd.f32 %v993_v18, %v991_v45  ;;  %s2865_s3 = sld [smem:[#allocation14 + $0x101]] }
  0xed   :  { %v1007_v30 = vperm.slane %v2410_v6, 6  ;;  %v1010_v4 = vperm.slane %v2410_v6, 7  ;;  %v1002_v60 = vmul.f32 %v2631_v36, %v1001_v11  ;;  %v1013_v51 = vperm.slane %v2451_v37, 0  ;;  %s2867_s13 = sld [smem:[#allocation14 + $0x181]] }
  0xee   :  { %v958_v10 = vadd.f32 %v957_v38, %v954_v5  ;;  %v980_v0 = vadd.f32 %v979_v2, %v977_v7  ;;  %v1005_v16 = vmul.f32 %v2634_v46, %v1004_v63  ;;  %v997_v22 = vadd.f32 %v996_v41, %v994_v12  ;;  %s2871_s18 = sld [smem:[#allocation14 + $0x201]] }
  0xef   :  { %v1008_v56 = vmul.f32 %v2637_v43, %v1007_v30  ;;  %v1011_v21 = vmul.f32 %v2648_v59, %v1010_v4  ;;  %v1014_v3 = vmul.f32 %v2613_v20, %v1013_v51  ;;  %v1015_v14 = vperm.slane %v2451_v37, 1  ;;  %s2874_s9 = sld [smem:[#allocation14 + $0x281]] }
  0xf0   :  { %v962_v58 = vadd.f32 %v961_v62, %v958_v10  ;;  %v983_v38 = vadd.f32 %v982_v42, %v980_v0  ;;  %v1018_v6 = vperm.slane %v2451_v37, 2  ;;  %v1000_v24 = vadd.f32 %v999_v31, %v997_v22  ;;  %s2878_s30 = sld [smem:[#allocation14 + $0x301]] }
  0xf1   :  { %v2668_v17 = vpop.eup %1578  ;;  %v1021_v26 = vperm.slane %v2451_v37, 3  ;;  %v1024_v62 = vperm.slane %v2451_v37, 4  ;;  %v1016_v8 = vmul.f32 %v2621_v28, %v1015_v14  ;;  %v1027_v32 = vperm.slane %v2451_v37, 5  ;;  %s2884_s4 = sld [smem:[#allocation14 + $0x381]] }
  0xf2   :  { %v965_v1 = vadd.f32 %v964_v39, %v962_v58  ;;  %v986_v57 = vadd.f32 %v985_v9, %v983_v38  ;;  %v1019_v29 = vmul.f32 %v2624_v27, %v1018_v6  ;;  %v1003_v25 = vadd.f32 %v1002_v60, %v1000_v24  ;;  %s2886_s8 = sld [smem:[#allocation16]] }
  0xf3   :  { %v1022_v35 = vmul.f32 %v2627_v33, %v1021_v26  ;;  %v1025_v13 = vmul.f32 %v2631_v36, %v1024_v62  ;;  %v1017_v39 = vadd.f32 %v1016_v8, %v1014_v3  ;;  %v1028_v42 = vmul.f32 %v2634_v46, %v1027_v32  ;;  %s2890_s5 = sld [smem:[#allocation14 + $0x401]] }
  0xf4   :  { %1580 = vtanh.f32 %v965_v1  ;;  %v2679_v2 = vadd.f32 %v988_v61, %v986_v57  ;;  %v1030_v23 = vperm.slane %v2451_v37, 6  ;;  %v1006_v9 = vadd.f32 %v1005_v16, %v1003_v25  ;;  %s1529_s19 = sld [smem:[#allocation14 + $0x481]] }
  0xf5   :  { %v1033_v47 = vperm.slane %v2451_v37, 7  ;;  %v1036_v34 = vperm.slane %v2492_v40, 0  ;;  %v1038_v44 = vperm.slane %v2492_v40, 1  ;;  %v1020_v50 = vadd.f32 %v1019_v29, %v1017_v39  ;;  %s1530_s20 = sld [smem:[#allocation16 + $0x1]] }
  0xf6   :  { %v1031_v53 = vmul.f32 %v2637_v43, %v1030_v23  ;;  %v1041_v48 = vperm.slane %v2492_v40, 2  ;;  %v1044_v55 = vperm.slane %v2492_v40, 3  ;;  %v1009_v61 = vadd.f32 %v1008_v56, %v1006_v9  ;;  %s2942_s24 = sld [smem:[#allocation36_spill]] }
  0xf7   :  { %v1034_v45 = vmul.f32 %v2648_v59, %v1033_v47  ;;  %v1037_v19 = vmul.f32 %v2613_v20, %v1036_v34  ;;  %v1039_v5 = vmul.f32 %v2621_v28, %v1038_v44  ;;  %v1023_v18 = vadd.f32 %v1022_v35, %v1020_v50 }
  0xf8   :  { %v1042_v37 = vmul.f32 %v2624_v27, %v1041_v48  ;;  %v1045_v41 = vmul.f32 %v2627_v33, %v1044_v55  ;;  %v1047_v7 = vperm.slane %v2492_v40, 4  ;;  %v2697_v11 = vadd.f32 %v1011_v21, %v1009_v61 }
  0xf9   :  { %v1040_v63 = vadd.f32 %v1039_v5, %v1037_v19  ;;  %v1050_v10 = vperm.slane %v2492_v40, 5  ;;  %v1053_v12 = vperm.slane %v2492_v40, 6  ;;  %v1026_v30 = vadd.f32 %v1025_v13, %v1023_v18 }
  0xfa   :  { %v2695_v31 = vpop.eup %1580  ;;  %v1048_v4 = vmul.f32 %v2631_v36, %v1047_v7  ;;  %v1056_v0 = vperm.slane %v2492_v40, 7  ;;  %v1059_v60 = vperm.slane %v2533_v54, 0  ;;  %v1061_v22 = vperm.slane %v2533_v54, 1 }
  0xfb   :  { %v1043_v16 = vadd.f32 %v1042_v37, %v1040_v63  ;;  %v1051_v51 = vmul.f32 %v2634_v46, %v1050_v10  ;;  %v1054_v58 = vmul.f32 %v2637_v43, %v1053_v12  ;;  %v1029_v56 = vadd.f32 %v1028_v42, %v1026_v30 }
  0xfc   :  { %v1057_v21 = vmul.f32 %v2648_v59, %v1056_v0  ;;  %v1060_v38 = vmul.f32 %v2613_v20, %v1059_v60  ;;  %v1064_v3 = vperm.slane %v2533_v54, 2  ;;  %v1062_v6 = vmul.f32 %v2621_v28, %v1061_v22  ;;  %s1350_s0 = sshll.u32 %s2942_s24, 4  ;;  %s1351_s0 = int_to_ptr.hbm [resolvable:$true] %s1350_s0 }
  0xfd   :  { %v1046_v14 = vadd.f32 %v1045_v41, %v1043_v16  ;;  %v1067_v40 = vperm.slane %v2533_v54, 3  ;;  %v1070_v1 = vperm.slane %v2533_v54, 4  ;;  %v1032_v24 = vadd.f32 %v1031_v53, %v1029_v56 }
  0xfe   :  { %v1065_v26 = vmul.f32 %v2624_v27, %v1064_v3  ;;  %v1073_v62 = vperm.slane %v2533_v54, 5  ;;  %v1076_v57 = vperm.slane %v2533_v54, 6  ;;  %v1063_v29 = vadd.f32 %v1062_v6, %v1060_v38 }
  0xff   :  { %v1049_v8 = vadd.f32 %v1048_v4, %v1046_v14  ;;  %v1068_v32 = vmul.f32 %v2627_v33, %v1067_v40  ;;  %v1071_v25 = vmul.f32 %v2631_v36, %v1070_v1  ;;  %v2718_v35 = vadd.f32 %v1034_v45, %v1032_v24 }
 0x100   :  { %v1074_v13 = vmul.f32 %v2634_v46, %v1073_v62  ;;  %v1077_v39 = vmul.f32 %v2637_v43, %v1076_v57  ;;  %v1079_v42 = vperm.slane %v2533_v54, 7  ;;  %v1066_v9 = vadd.f32 %v1065_v26, %v1063_v29 }
 0x101   :  { %v1052_v23 = vadd.f32 %v1051_v51, %v1049_v8  ;;  %v1082_v47 = vperm.slane %v2574_v52, 0  ;;  %v1084_v34 = vperm.slane %v2574_v52, 1  ;;  %v1087_v50 = vperm.slane %v2574_v52, 2 }
 0x102   :  { %v1080_v44 = vmul.f32 %v2648_v59, %v1079_v42  ;;  %v1090_v53 = vperm.slane %v2574_v52, 3  ;;  %v1093_v48 = vperm.slane %v2574_v52, 4  ;;  %v1069_v61 = vadd.f32 %v1068_v32, %v1066_v9 }
 0x103   :  { %v1055_v55 = vadd.f32 %v1054_v58, %v1052_v23  ;;  %v1083_v45 = vmul.f32 %v2613_v20, %v1082_v47  ;;  %v1085_v54 = vmul.f32 %v2621_v28, %v1084_v34  ;;  %v1088_v19 = vmul.f32 %v2624_v27, %v1087_v50 }
 0x104   :  { %v1091_v5 = vmul.f32 %v2627_v33, %v1090_v53  ;;  %v1094_v18 = vmul.f32 %v2631_v36, %v1093_v48  ;;  %v1096_v37 = vperm.slane %v2574_v52, 5  ;;  %v1072_v7 = vadd.f32 %v1071_v25, %v1069_v61 }
 0x105   :  { %v2735_v41 = vadd.f32 %v1057_v21, %v1055_v55  ;;  %v1086_v63 = vadd.f32 %v1085_v54, %v1083_v45  ;;  %v1099_v10 = vperm.slane %v2574_v52, 6  ;;  %v1102_v30 = vperm.slane %v2574_v52, 7 }
 0x106   :  { %v1097_v12 = vmul.f32 %v2634_v46, %v1096_v37  ;;  %v1105_v4 = vperm.slane %v2603_v15, 0  ;;  %v1107_v0 = vperm.slane %v2603_v15, 1  ;;  %v1075_v60 = vadd.f32 %v1074_v13, %v1072_v7 }
 0x107   :  { %v1089_v16 = vadd.f32 %v1088_v19, %v1086_v63  ;;  %v1100_v51 = vmul.f32 %v2637_v43, %v1099_v10  ;;  %v1110_v58 = vperm.slane %v2603_v15, 2  ;;  %v1103_v22 = vmul.f32 %v2648_v59, %v1102_v30 }
 0x108   :  { %v1106_v56 = vmul.f32 %v2613_v20, %v1105_v4  ;;  %v1108_v21 = vmul.f32 %v2621_v28, %v1107_v0  ;;  %v1113_v38 = vperm.slane %v2603_v15, 3  ;;  %v1078_v3 = vadd.f32 %v1077_v39, %v1075_v60 }
 0x109   :  { %v1092_v52 = vadd.f32 %v1091_v5, %v1089_v16  ;;  %v1111_v14 = vmul.f32 %v2624_v27, %v1110_v58  ;;  %v1116_v6 = vperm.slane %v2603_v15, 4  ;;  %v1119_v24 = vperm.slane %v2603_v15, 5 }
 0x10a   :  { %v1109_v40 = vadd.f32 %v1108_v21, %v1106_v56  ;;  %v1114_v1 = vmul.f32 %v2627_v33, %v1113_v38  ;;  %v1122_v26 = vperm.slane %v2603_v15, 6  ;;  %v2753_v62 = vadd.f32 %v1080_v44, %v1078_v3 }
 0x10b   :  { %v1095_v57 = vadd.f32 %v1094_v18, %v1092_v52  ;;  %v1117_v8 = vmul.f32 %v2631_v36, %v1116_v6  ;;  %v1125_v29 = vperm.slane %v2603_v15, 7  ;;  %v1120_v25 = vmul.f32 %v2634_v46, %v1119_v24 }
 0x10c   :  { %v1112_v32 = vadd.f32 %v1111_v14, %v1109_v40  ;;  %v1123_v13 = vmul.f32 %v2637_v43, %v1122_v26  ;;  %v1128_v39 = vperm.slane %v2642_v49, 0  ;;  %v1130_v9 = vperm.slane %v2642_v49, 1 }
 0x10d   :  { %v1098_v42 = vadd.f32 %v1097_v12, %v1095_v57  ;;  %v1126_v23 = vmul.f32 %v2648_v59, %v1125_v29  ;;  %v1133_v47 = vperm.slane %v2642_v49, 2  ;;  %v1136_v50 = vperm.slane %v2642_v49, 3 }
 0x10e   :  { %v1115_v34 = vadd.f32 %v1114_v1, %v1112_v32  ;;  %v1129_v44 = vmul.f32 %v2613_v20, %v1128_v39  ;;  %v1139_v15 = vperm.slane %v2642_v49, 4  ;;  %v1131_v48 = vmul.f32 %v2621_v28, %v1130_v9 }
 0x10f   :  { %v1101_v53 = vadd.f32 %v1100_v51, %v1098_v42  ;;  %v1134_v55 = vmul.f32 %v2624_v27, %v1133_v47  ;;  %v1142_v61 = vperm.slane %v2642_v49, 5  ;;  %v1137_v54 = vmul.f32 %v2627_v33, %v1136_v50 }
 0x110   :  { %v1118_v45 = vadd.f32 %v1117_v8, %v1115_v34  ;;  %v1140_v19 = vmul.f32 %v2631_v36, %v1139_v15  ;;  %v1145_v5 = vperm.slane %v2642_v49, 6  ;;  %v1132_v37 = vadd.f32 %v1131_v48, %v1129_v44 }
 0x111   :  { %v2772_v18 = vadd.f32 %v1103_v22, %v1101_v53  ;;  %v1143_v7 = vmul.f32 %v2634_v46, %v1142_v61  ;;  %v1148_v63 = vperm.slane %v2642_v49, 7  ;;  %v1151_v30 = vperm.slane %v2668_v17, 0 }
 0x112   :  { %v1121_v10 = vadd.f32 %v1120_v25, %v1118_v45  ;;  %v1146_v12 = vmul.f32 %v2637_v43, %v1145_v5  ;;  %v1153_v4 = vperm.slane %v2668_v17, 1  ;;  %v1135_v0 = vadd.f32 %v1134_v55, %v1132_v37 }
 0x113   :  { %v1149_v60 = vmul.f32 %v2648_v59, %v1148_v63  ;;  %v1156_v16 = vperm.slane %v2668_v17, 2  ;;  %v1159_v51 = vperm.slane %v2668_v17, 3  ;;  %v1152_v22 = vmul.f32 %v2613_v20, %v1151_v30 }
 0x114   :  { %v1124_v58 = vadd.f32 %v1123_v13, %v1121_v10  ;;  %v1154_v56 = vmul.f32 %v2621_v28, %v1153_v4  ;;  %v1162_v49 = vperm.slane %v2668_v17, 4  ;;  %v1138_v21 = vadd.f32 %v1137_v54, %v1135_v0 }
 0x115   :  { %v1157_v38 = vmul.f32 %v2624_v27, %v1156_v16  ;;  %v1160_v3 = vmul.f32 %v2627_v33, %v1159_v51  ;;  %v1165_v52 = vperm.slane %v2668_v17, 5  ;;  %v1168_v1 = vperm.slane %v2668_v17, 6 }
 0x116   :  { %v2788_v14 = vadd.f32 %v1126_v23, %v1124_v58  ;;  %v1155_v6 = vadd.f32 %v1154_v56, %v1152_v22  ;;  %v1163_v40 = vmul.f32 %v2631_v36, %v1162_v49  ;;  %v1141_v24 = vadd.f32 %v1140_v19, %v1138_v21 }
 0x117   :  { %v1166_v26 = vmul.f32 %v2634_v46, %v1165_v52  ;;  %v1171_v57 = vperm.slane %v2668_v17, 7  ;;  %v1174_v8 = vperm.slane %v2695_v31, 0  ;;  %v1169_v32 = vmul.f32 %v2637_v43, %v1168_v1 }
 0x118   :  { %v1158_v29 = vadd.f32 %v1157_v38, %v1155_v6  ;;  %v1176_v25 = vperm.slane %v2695_v31, 1  ;;  %v1179_v13 = vperm.slane %v2695_v31, 2  ;;  %v1144_v39 = vadd.f32 %v1143_v7, %v1141_v24 }
 0x119   :  { %v1172_v42 = vmul.f32 %v2648_v59, %v1171_v57  ;;  %v1175_v23 = vmul.f32 %v2613_v20, %v1174_v8  ;;  %v1182_v9 = vperm.slane %v2695_v31, 3  ;;  %v1185_v44 = vperm.slane %v2695_v31, 4 }
 0x11a   :  { %v1161_v47 = vadd.f32 %v1160_v3, %v1158_v29  ;;  %v1177_v34 = vmul.f32 %v2621_v28, %v1176_v25  ;;  %v1180_v17 = vmul.f32 %v2624_v27, %v1179_v13  ;;  %v1147_v50 = vadd.f32 %v1146_v12, %v1144_v39 }
 0x11b   :  { %v1183_v15 = vmul.f32 %v2627_v33, %v1182_v9  ;;  %v1188_v53 = vperm.slane %v2695_v31, 5  ;;  %v1191_v48 = vperm.slane %v2695_v31, 6  ;;  %v1186_v20 = vmul.f32 %v2631_v36, %v1185_v44 }
 0x11c   :  { %v1164_v55 = vadd.f32 %v1163_v40, %v1161_v47  ;;  %v1178_v61 = vadd.f32 %v1177_v34, %v1175_v23  ;;  %v1194_v45 = vperm.slane %v2695_v31, 7  ;;  %v2809_v54 = vadd.f32 %v1149_v60, %v1147_v50 }
 0x11d   :  { %v1189_v28 = vmul.f32 %v2634_v46, %v1188_v53  ;;  %v1192_v27 = vmul.f32 %v2637_v43, %v1191_v48  ;;  %v1197_v19 = vrot.slane %v2679_v2, 4  ;;  %v1203_v7 = vrot.slane %v2697_v11, 4 }
 0x11e   :  { %v1167_v5 = vadd.f32 %v1166_v26, %v1164_v55  ;;  %v1181_v33 = vadd.f32 %v1180_v17, %v1178_v61  ;;  %v1195_v37 = vmul.f32 %v2648_v59, %v1194_v45  ;;  %v1209_v36 = vrot.slane %v2718_v35, 4 }
 0x11f   :  { %v1198_v63 = vadd.f32 %v1197_v19, %v2679_v2  ;;  %v1215_v31 = vrot.slane %v2735_v41, 4  ;;  %v1221_v10 = vrot.slane %v2753_v62, 4  ;;  %v1204_v43 = vadd.f32 %v1203_v7, %v2697_v11 }
 0x120   :  { %v1170_v12 = vadd.f32 %v1169_v32, %v1167_v5  ;;  %v1184_v46 = vadd.f32 %v1183_v15, %v1181_v33  ;;  %v1227_v30 = vrot.slane %v2772_v18, 4  ;;  %v1210_v0 = vadd.f32 %v1209_v36, %v2718_v35 }
 0x121   :  { %v1199_v4 = vrot.slane %v1198_v63, 2  ;;  %v1216_v59 = vadd.f32 %v1215_v31, %v2735_v41  ;;  %v1222_v60 = vadd.f32 %v1221_v10, %v2753_v62  ;;  %v1205_v51 = vrot.slane %v1204_v43, 2 }
 0x122   :  { %v1173_v2 = vadd.f32 %v1172_v42, %v1170_v12  ;;  %v1187_v16 = vadd.f32 %v1186_v20, %v1184_v46  ;;  %v1228_v58 = vadd.f32 %v1227_v30, %v2772_v18  ;;  %v1211_v11 = vrot.slane %v1210_v0, 2 }
 0x123   :  { %v1200_v22 = vadd.f32 %v1199_v4, %v1198_v63  ;;  %v1217_v56 = vrot.slane %v1216_v59, 2  ;;  %v1223_v49 = vrot.slane %v1222_v60, 2  ;;  %v1206_v21 = vadd.f32 %v1205_v51, %v1204_v43 }
 0x124   :  { %v1190_v35 = vadd.f32 %v1189_v28, %v1187_v16  ;;  %v1229_v41 = vrot.slane %v1228_v58, 2  ;;  %v1233_v62 = vrot.slane %v2788_v14, 4  ;;  %v1212_v3 = vadd.f32 %v1211_v11, %v1210_v0 }
 0x125   :  { %v1201_v38 = vrot.slane %v1200_v22, 1  ;;  %v1218_v52 = vadd.f32 %v1217_v56, %v1216_v59  ;;  %v1224_v6 = vadd.f32 %v1223_v49, %v1222_v60  ;;  %v1207_v40 = vrot.slane %v1206_v21, 1 }
 0x126   :  { %v1193_v18 = vadd.f32 %v1192_v27, %v1190_v35  ;;  %v1230_v1 = vadd.f32 %v1229_v41, %v1228_v58  ;;  %v1234_v24 = vadd.f32 %v1233_v62, %v2788_v14  ;;  %v1213_v26 = vrot.slane %v1212_v3, 1 }
 0x127   :  { %v1219_v57 = vrot.slane %v1218_v52, 1  ;;  %v1225_v8 = vrot.slane %v1224_v6, 1  ;;  %v1202_v32 = vadd.f32 %v1201_v38, %v1200_v22  ;;  %v1208_v25 = vadd.f32 %v1207_v40, %v1206_v21 }
 0x128   :  { %v1196_v29 = vadd.f32 %v1195_v37, %v1193_v18  ;;  %v1235_v13 = vrot.slane %v1234_v24, 2  ;;  %v2844_v39 = vadd.f32 %v1213_v26, %v1212_v3  ;;  %v1231_v14 = vrot.slane %v1230_v1, 1 }
 0x129   :  { %v2846_v42 = vadd.f32 %v1219_v57, %v1218_v52  ;;  %v1239_v23 = vrot.slane %v2809_v54, 4  ;;  %v2851_v9 = vadd.f32 %v1225_v8, %v1224_v6  ;;  %v1245_v34 = vrot.slane %v1173_v2, 4 }
 0x12a   :  { %v1236_v47 = vadd.f32 %v1235_v13, %v1234_v24  ;;  %v1251_v17 = vrot.slane %v1196_v29, 4  ;;  %v1258_v50 = vstv %s2825_s25  ;;  %v1261_v15 = vstv %s2828_s1 }
 0x12b   :  { %v1240_v44 = vadd.f32 %v1239_v23, %v2809_v54  ;;  %v1265_v53 = vstv %s2830_s10  ;;  %v1246_v55 = vadd.f32 %v1245_v34, %v1173_v2  ;;  %v1259_v20 = vmul.f32 %v1258_v50, %v1202_v32 }
 0x12c   :  { %v1237_v48 = vrot.slane %v1236_v47, 1  ;;  %v1252_v61 = vadd.f32 %v1251_v17, %v1196_v29  ;;  %v1262_v28 = vmul.f32 %v1261_v15, %v1208_v25  ;;  %v1266_v27 = vmul.f32 %v1265_v53, %v2844_v39 }
 0x12d   :  { %v1241_v45 = vrot.slane %v1240_v44, 2  ;;  %v1269_v19 = vstv %s2833_s14  ;;  %v1232_v54 = vadd.f32 %v1231_v14, %v1230_v1  ;;  %v1247_v5 = vrot.slane %v1246_v55, 2 }
 0x12e   :  { %v1253_v33 = vrot.slane %v1252_v61, 2  ;;  %v1263_v7 = vadd.f32 %v1262_v28, %v1259_v20  ;;  %v1270_v63 = vmul.f32 %v1269_v19, %v2846_v42  ;;  %v1273_v36 = vstv %s2835_s12 }
 0x12f   :  { %v1242_v37 = vadd.f32 %v1241_v45, %v1240_v44  ;;  %v1238_v31 = vadd.f32 %v1237_v48, %v1236_v47  ;;  %v1248_v10 = vadd.f32 %v1247_v5, %v1246_v55  ;;  %v1277_v46 = vstv %s2838_s7 }
 0x130   :  { %v1254_v12 = vadd.f32 %v1253_v33, %v1252_v61  ;;  %v1267_v30 = vadd.f32 %v1266_v27, %v1263_v7  ;;  %v1274_v4 = vmul.f32 %v1273_v36, %v2851_v9  ;;  %v1281_v0 = vstv %s2840_s15 }
 0x131   :  { %v1243_v43 = vrot.slane %v1242_v37, 1  ;;  %v1249_v59 = vrot.slane %v1248_v10, 1  ;;  %v1278_v51 = vmul.f32 %v1277_v46, %v1232_v54  ;;  %v1285_v58 = vstv %s2842_s21 }
 0x132   :  { %v1255_v60 = vrot.slane %v1254_v12, 1  ;;  %v1271_v16 = vadd.f32 %v1270_v63, %v1267_v30  ;;  %v1282_v22 = vmul.f32 %v1281_v0, %v1238_v31  ;;  %v1289_v11 = vstv %s2849_s16 }
 0x133   :  { %v1244_v2 = vadd.f32 %v1243_v43, %v1242_v37  ;;  %v1301_v56 = vstv %s2859_s2  ;;  %v1304_v49 = vstv %s2861_s28  ;;  %v1250_v35 = vadd.f32 %v1249_v59, %v1248_v10 }
 0x134   :  { %v1275_v21 = vadd.f32 %v1274_v4, %v1271_v16  ;;  %v1302_v41 = vmul.f32 %v1301_v56, %v1202_v32  ;;  %v1305_v62 = vmul.f32 %v1304_v49, %v1208_v25  ;;  %v1256_v38 = vadd.f32 %v1255_v60, %v1254_v12 }
 0x135   :  { %v1286_v3 = vmul.f32 %v1285_v58, %v1244_v2  ;;  %v1308_v52 = vstv %s2865_s3  ;;  %v1312_v6 = vstv %s2867_s13  ;;  %v1293_v26 = vstv %s2853_s11 }
 0x136   :  { %v1279_v18 = vadd.f32 %v1278_v51, %v1275_v21  ;;  %v1306_v40 = vadd.f32 %v1305_v62, %v1302_v41  ;;  %v1309_v1 = vmul.f32 %v1308_v52, %v2844_v39  ;;  %v1313_v24 = vmul.f32 %v1312_v6, %v2846_v42 }
 0x137   :  { %v1316_v57 = vstv %s2871_s18  ;;  %v1320_v8 = vstv %s2874_s9  ;;  %v1290_v32 = vmul.f32 %v1289_v11, %v1250_v35  ;;  %v1324_v14 = vstv %s2878_s30 }
 0x138   :  { %v1283_v29 = vadd.f32 %v1282_v22, %v1279_v18  ;;  %v1310_v25 = vadd.f32 %v1309_v1, %v1306_v40  ;;  %v1317_v13 = vmul.f32 %v1316_v57, %v2851_v9  ;;  %v1294_v47 = vmul.f32 %v1293_v26, %v1256_v38 }
 0x139   :  { %v1321_v17 = vmul.f32 %v1320_v8, %v1232_v54  ;;  %v1328_v44 = vstv %s2884_s4  ;;  %v1325_v42 = vmul.f32 %v1324_v14, %v1238_v31  ;;  %v1297_v15 = vstv %s2886_s8 }
 0x13a   :  { %v1287_v23 = vadd.f32 %v1286_v3, %v1283_v29  ;;  %v1314_v34 = vadd.f32 %v1313_v24, %v1310_v25  ;;  %v1332_v53 = vstv %s2890_s5  ;;  %v1329_v61 = vmul.f32 %v1328_v44, %v1244_v2 }
 0x13b   :  { %v1336_v20 = vstv %s1529_s19  ;;  %v1333_v27 = vmul.f32 %v1332_v53, %v1250_v35  ;;  %v1340_v33 = vstv %s1530_s20 }
 0x13c   :  { %v1291_v39 = vadd.f32 %v1290_v32, %v1287_v23  ;;  %v1318_v50 = vadd.f32 %v1317_v13, %v1314_v34  ;;  %v1337_v19 = vmul.f32 %v1336_v20, %v1256_v38 }
 0x13e   :  { %v1295_v48 = vadd.f32 %v1294_v47, %v1291_v39  ;;  %v1322_v55 = vadd.f32 %v1321_v17, %v1318_v50 }
 0x140   :  { %v1298_v45 = vadd.f32 %v1297_v15, %v1295_v48  ;;  %v1326_v28 = vadd.f32 %v1325_v42, %v1322_v55 }
 0x142   :  { %1299 = vst [vmem:[#allocation17] sm:$0x1] %v1298_v45  ;;  %v1330_v9 = vadd.f32 %v1329_v61, %v1326_v28 }
 0x144   :  { %v1334_v5 = vadd.f32 %v1333_v27, %v1330_v9 }
 0x146   :  { %v1338_v54 = vadd.f32 %v1337_v19, %v1334_v5 }
 0x148   :  { %v1341_v37 = vadd.f32 %v1340_v33, %v1338_v54 }
 0x14a   :  { %1342 = vst [vmem:[#allocation17 + $0x1] sm:$0x1] %v1341_v37 }
 0x14b   :  { %1353 = dma.vmem_to_hbm [thread:$0]  %s1349_s17, 32, %s1351_s0, [#allocation4]  }
 0x14c   :  { %1746 = dma.done.wait [#allocation4], 32  }
 0x14d   :  { %1747 = vsyncadd [#allocation4], 4294967264 }
 0x14e   :  { %1358 = vsyncpa [#allocation3], 1 }
 0x14f   :  { %1359 = vsyncpa [#allocation8], 1 }
 0x150   :  { %1360 = vsyncpa [#allocation4], 1 }
 0x151   :  { %1361 = vsyncpa [#allocation5], 1 }
 0x152   :  { %1362 = vsyncpa [#allocation6], 1 }
 0x153   :  { %1363 = vsyncpa [#allocation12], 1 }
 0x154   :  { %1364 = vsyncpa [#allocation15], 1 }

</bundles_post_ra>
